<compile_context>
chip_gen: v5e
topology: v5e:2x2
jax: 0.10.0
libtpu: 0.0.40
codegen_flags: <defaults>
</compile_context>

<pallas_src>
import functools
import math

import jax
import jax.numpy as jnp
from jax.experimental import pallas as pl
from jax.experimental.pallas import tpu as pltpu


# ----------------------------------------------------------------------------
# Fused kernel: the whole DDSConv stack for one batch element.
#   per layer: y = depthwise_dilated_conv(x * mask)
#              y = LayerNorm1(y); y = gelu(y)
#              y = 1x1 conv (channel matmul on MXU); y = LayerNorm2(y); gelu
#              x = x + y
#   out = x * mask
# ----------------------------------------------------------------------------
def _ddsconv_fused_kernel(x_ref, *rest, kernel_size, c_real, eps,
                          compute_dtype, matmul_dtype, approximate_gelu, has_g):
    if has_g:
        (g_ref, mask_ref, wdw_ref, bdw_ref, wpw_ref, bpw_ref,
         g1_ref, b1_ref, g2_ref, b2_ref, out_ref) = rest
    else:
        g_ref = None
        (mask_ref, wdw_ref, bdw_ref, wpw_ref, bpw_ref,
         g1_ref, b1_ref, g2_ref, b2_ref, out_ref) = rest

    n_layers = wdw_ref.shape[0]
    t_pad = x_ref.shape[2]
    center = (kernel_size - 1) // 2
    inv_c = 1.0 / float(c_real)

    mask = mask_ref[0]                        # (1, Tp) f32, zero in the pad tail
    x = x_ref[0].astype(jnp.float32)          # residual accumulator stays f32
    if has_g:
        x = x + g_ref[0].astype(jnp.float32)  # fused `x + g` (saves an HBM pass)
    # Mask up front and re-mask after every residual add: the conv input is
    # always exactly `x * mask`, the zero halo/tail stays zero across layers
    # (no garbage accumulation), and the final `* mask` is already folded in.
    x = x * mask

    def layer_norm(v32, gamma, beta):
        # v32: f32 (Cp, Tp).  Stats over the real C rows only: padded rows are
        # identically 0 (weights/biases/gammas zero-padded in the wrapper), so
        # the raw sums are exact and we divide by c_real.  Stats + centering
        # in f32; gamma/beta application in compute_dtype.  Padded rows -> 0.
        mean = jnp.sum(v32, axis=0, keepdims=True) * inv_c
        ex2 = jnp.sum(v32 * v32, axis=0, keepdims=True) * inv_c
        inv_std = jax.lax.rsqrt(ex2 - mean * mean + eps)
        vn = ((v32 - mean) * inv_std).astype(compute_dtype)
        return vn * gamma + beta

    for i in range(n_layers):
        dilation = kernel_size ** i
        # Depthwise dilated conv: shifted taps via lane rolls (XLU slot) into
        # the zero tail -- t_pad includes the max halo and x's tail is masked
        # to zero, so the cyclic wrap only ever reads zeros.  Kept in f32
        # (32-bit lane rolls, accurate accumulation).
        y = bdw_ref[i]                                    # (Cp, 1) f32 bias
        for k in range(kernel_size):
            shift = (k - center) * dilation
            xs = x if shift == 0 else pltpu.roll(x, (-shift) % t_pad, axis=1)
            y = y + wdw_ref[i, k] * xs                    # (Cp,1) tap, lane bcast

        y = layer_norm(y, g1_ref[i], b1_ref[i])           # -> compute_dtype
        y = jax.nn.gelu(y, approximate=approximate_gelu)  # tanh path -> EUP

        # 1x1 conv over channels on the MXU (weights pre-cast in the wrapper,
        # f32 accumulation).
        y = jnp.dot(wpw_ref[i], y.astype(matmul_dtype),
                    preferred_element_type=jnp.float32) + bpw_ref[i]
        y = layer_norm(y, g2_ref[i], b2_ref[i])
        y = jax.nn.gelu(y, approximate=approximate_gelu)
        # TODO(synk): dropout is identity here (p_dropout=0.0 / eval); no RNG.

        x = (x + y.astype(jnp.float32)) * mask            # residual + re-mask

    out_ref[0] = x.astype(out_ref.dtype)


def _round_up(n, m):
    return (n + m - 1) // m * m


# ----------------------------------------------------------------------------
# Forward wrapper: x (B, C, T), x_mask (B, 1, T), optional g (B, C, T)
# Defaults target v6e/v7x (bf16 elementwise/MXU/IO, tanh GELU).  For v5e or
# strict PyTorch parity use all-f32 dtypes and approximate_gelu=False.
# ----------------------------------------------------------------------------
@functools.partial(jax.jit, static_argnames=("kernel_size", "compute_dtype",
                                             "matmul_dtype", "io_dtype",
                                             "approximate_gelu", "eps"))
def ddsconv_forward(x_bct, x_mask_b1t, params, *, kernel_size, g_bct=None,
                    compute_dtype=jnp.bfloat16, matmul_dtype=jnp.bfloat16,
                    io_dtype=jnp.bfloat16, approximate_gelu=True, eps=1e-5):
    B, C, T = x_bct.shape
    n_layers = len(params)

    c_pad = _round_up(C, 8)
    # Tail padding is both the lane-density pad (x128) and the zero halo the
    # roll-based depthwise conv wraps into.
    max_shift = (kernel_size ** (n_layers - 1)) * (kernel_size - 1) // 2
    t_pad = _round_up(T + max_shift, 128)
    pc, pt = c_pad - C, t_pad - T

    # Single cast+pad producer per tensor (XLA fuses these); the `x + g` add
    # and the initial mask multiply now happen inside the kernel.
    x_p = jnp.pad(x_bct.astype(io_dtype), ((0, 0), (0, pc), (0, pt)))
    m_p = jnp.pad(x_mask_b1t.astype(jnp.float32), ((0, 0), (0, 0), (0, pt)))
    inputs = [x_p]
    if g_bct is not None:
        inputs.append(jnp.pad(g_bct.astype(io_dtype), ((0, 0), (0, pc), (0, pt))))
    inputs.append(m_p)

    # Per-layer params: leading L axis; channel rows/cols zero-padded (this
    # keeps padded channels identically zero through every layer — required by
    # the LayerNorm statistics above); pre-cast to the dtype they are consumed
    # in so the kernel does no per-layer casts.
    def col(name, dtype):  # (L, C) -> (L, Cp, 1) column vectors (lane bcast)
        v = jnp.stack([p[name] for p in params])[..., None]
        return jnp.pad(v, ((0, 0), (0, pc), (0, 0))).astype(dtype)

    wdw = jnp.pad(jnp.stack([p["wdw"] for p in params]),           # (L, Cp, K)
                  ((0, 0), (0, pc), (0, 0)))
    wdw = jnp.transpose(wdw, (0, 2, 1))[..., None].astype(jnp.float32)  # (L,K,Cp,1)
    wpw = jnp.pad(jnp.stack([p["wpw"] for p in params]),
                  ((0, 0), (0, pc), (0, pc))).astype(matmul_dtype)
    param_arrays = (wdw, col("bdw", jnp.float32), wpw, col("bpw", jnp.float32),
                    col("g1", compute_dtype), col("b1", compute_dtype),
                    col("g2", compute_dtype), col("b2", compute_dtype))

    kern = functools.partial(_ddsconv_fused_kernel, kernel_size=kernel_size,
                             c_real=C, eps=eps, compute_dtype=compute_dtype,
                             matmul_dtype=matmul_dtype,
                             approximate_gelu=approximate_gelu,
                             has_g=g_bct is not None)

    act_spec = pl.BlockSpec((1, c_pad, t_pad), lambda b: (b, 0, 0))
    mask_spec = pl.BlockSpec((1, 1, t_pad), lambda b: (b, 0, 0))

    def full_spec(a):
        nd = a.ndim
        return pl.BlockSpec(a.shape, lambda b, nd=nd: (0,) * nd)

    in_specs = ([act_spec] + ([act_spec] if g_bct is not None else [])
                + [mask_spec] + [full_spec(a) for a in param_arrays])

    out = pl.pallas_call(
        kern,
        out_shape=jax.ShapeDtypeStruct((B, c_pad, t_pad), io_dtype),
        grid=(B,),
        in_specs=in_specs,
        out_specs=act_spec,
        input_output_aliases={0: 0},          # residual written in place of x
        compiler_params=pltpu.CompilerParams(
            dimension_semantics=("parallel",)),
    )(*inputs, *param_arrays)

    # TODO(synk): consumers that accept the padded (B, Cp, Tp) slab can skip
    # this slice/cast round trip entirely.
    return out[:, :C, :T].astype(x_bct.dtype)


# ----------------------------------------------------------------------------
# Parameter init (matches module __init__ shapes; deterministic, synthetic)
# ----------------------------------------------------------------------------
def init_ddsconv_params(key, channels, kernel_size, n_layers):
    layers = []
    for _ in range(n_layers):
        key, k1, k2, k3, k4 = jax.random.split(key, 5)
        bound_dw = 1.0 / math.sqrt(kernel_size)          # groups=C -> fan_in = K
        wdw = jax.random.uniform(k1, (channels, kernel_size), jnp.float32,
                                 -bound_dw, bound_dw)    # Conv1d (C,1,K) squeezed
        bdw = jax.random.uniform(k2, (channels,), jnp.float32, -bound_dw, bound_dw)
        bound_pw = 1.0 / math.sqrt(channels)
        wpw = jax.random.uniform(k3, (channels, channels), jnp.float32,
                                 -bound_pw, bound_pw)    # Conv1d 1x1 (Cout,Cin)
        bpw = jax.random.uniform(k4, (channels,), jnp.float32, -bound_pw, bound_pw)
        layers.append(dict(wdw=wdw, bdw=bdw, wpw=wpw, bpw=bpw,
                           g1=jnp.ones((channels,), jnp.float32),
                           b1=jnp.zeros((channels,), jnp.float32),
                           g2=jnp.ones((channels,), jnp.float32),
                           b2=jnp.zeros((channels,), jnp.float32)))
    return layers


# ----------------------------------------------------------------------------
# Pure-JAX reference (NCT, mirrors the PyTorch module) for sanity checks
# ----------------------------------------------------------------------------
def ddsconv_reference(x, x_mask, params, kernel_size, g=None, eps=1e-5,
                      approximate_gelu=False):
    if g is not None:
        x = x + g
    B, C, T = x.shape

    def ln(v, gamma, beta):            # v: (B, C, T); normalize over C
        vt = jnp.transpose(v, (0, 2, 1))
        mu = jnp.mean(vt, axis=-1, keepdims=True)
        var = jnp.mean((vt - mu) ** 2, axis=-1, keepdims=True)
        o = (vt - mu) * jax.lax.rsqrt(var + eps) * gamma + beta
        return jnp.transpose(o, (0, 2, 1))

    for i, p in enumerate(params):
        d = kernel_size ** i
        pad = d * (kernel_size - 1) // 2
        xm = x * x_mask
        xp = jnp.pad(xm, ((0, 0), (0, 0), (pad, pad)))
        y = p["bdw"][None, :, None]
        for k in range(kernel_size):
            y = y + p["wdw"][:, k][None, :, None] * xp[:, :, k * d:k * d + T]
        y = jax.nn.gelu(ln(y, p["g1"], p["b1"]), approximate=approximate_gelu)
        y = jnp.einsum("oc,bct->bot", p["wpw"], y) + p["bpw"][None, :, None]
        y = jax.nn.gelu(ln(y, p["g2"], p["b2"]), approximate=approximate_gelu)
        x = x + y
    return x * x_mask


if __name__ == "__main__":
    B, C, T = 2, 32, 16
    kernel_size, n_layers = 3, 3

    key = jax.random.PRNGKey(0)
    kx, kg, kp = jax.random.split(key, 3)
    x = jax.random.normal(kx, (B, C, T), jnp.float32)
    g = jax.random.normal(kg, (B, C, T), jnp.float32)
    lengths = jnp.array([T, T - 5])
    x_mask = (jnp.arange(T)[None, None, :] < lengths[:, None, None]).astype(jnp.float32)

    params = init_ddsconv_params(kp, C, kernel_size, n_layers)

    # Fast path (default, v6e/v7x): bf16 elementwise + bf16 MXU + bf16 act I/O,
    # tanh-GELU on the EUP.  Compared against a tanh-GELU f32 reference so the
    # check isolates the low-precision error.
    out_fast = jax.block_until_ready(
        ddsconv_forward(x, x_mask, params, kernel_size=kernel_size, g_bct=g))
    ref_tanh = ddsconv_reference(x, x_mask, params, kernel_size, g=g,
                                 approximate_gelu=True)
    assert out_fast.shape == (B, C, T)
    assert bool(jnp.allclose(out_fast, ref_tanh, atol=1e-1, rtol=5e-2)), \
        "fast (bf16/tanh-GELU) path mismatch vs reference"
    # NOTE: re-validate bf16 tolerance at production C/T/n_layers before
    # defaulting bf16 everywhere (error compounds through the residual).

    # Strict path (v5e / PyTorch parity): all-f32, exact erf GELU.
    out_strict = jax.block_until_ready(
        ddsconv_forward(x, x_mask, params, kernel_size=kernel_size, g_bct=g,
                        compute_dtype=jnp.float32, matmul_dtype=jnp.float32,
                        io_dtype=jnp.float32, approximate_gelu=False))
    ref_erf = ddsconv_reference(x, x_mask, params, kernel_size, g=g,
                                approximate_gelu=False)
    assert bool(jnp.allclose(out_strict, ref_erf, atol=5e-3, rtol=5e-3)), \
        "strict (f32/erf-GELU) path mismatch vs reference"

    print("KERNEL_OK")
</pallas_src>

<mosaic_0001>
module attributes {stable_mosaic.version = 11 : i64} {
  func.func @_ddsconv_fused_kernel(%arg0: i32, %arg1: memref<1x32x128xbf16, #tpu.memory_space<vmem>>, %arg2: memref<1x32x128xbf16, #tpu.memory_space<vmem>>, %arg3: memref<1x1x128xf32, #tpu.memory_space<vmem>>, %arg4: memref<3x3x32x1xf32, #tpu.memory_space<vmem>>, %arg5: memref<3x32x1xf32, #tpu.memory_space<vmem>>, %arg6: memref<3x32x32xbf16, #tpu.memory_space<vmem>>, %arg7: memref<3x32x1xf32, #tpu.memory_space<vmem>>, %arg8: memref<3x32x1xbf16, #tpu.memory_space<vmem>>, %arg9: memref<3x32x1xbf16, #tpu.memory_space<vmem>>, %arg10: memref<3x32x1xbf16, #tpu.memory_space<vmem>>, %arg11: memref<3x32x1xbf16, #tpu.memory_space<vmem>>, %arg12: memref<1x32x128xbf16, #tpu.memory_space<vmem>>) attributes {dimension_semantics = [#tpu.dimension_semantics<parallel>], iteration_bounds = array<i64: 2>, scalar_prefetch = 0 : i64, scratch_operands = 0 : i64, tpu.core_type = #tpu.core_type<tc>, window_params = [{transform_indices = @transform_0, window_bounds = array<i64: 1, 32, 128>}, {transform_indices = @transform_1, window_bounds = array<i64: 1, 32, 128>}, {transform_indices = @transform_2, window_bounds = array<i64: 1, 1, 128>}, {pipeline_mode = #tpu.pipeline_mode<synchronous>, transform_indices = @transform_3, window_bounds = array<i64: 3, 3, 32, 1>}, {pipeline_mode = #tpu.pipeline_mode<synchronous>, transform_indices = @transform_4, window_bounds = array<i64: 3, 32, 1>}, {pipeline_mode = #tpu.pipeline_mode<synchronous>, transform_indices = @transform_5, window_bounds = array<i64: 3, 32, 32>}, {pipeline_mode = #tpu.pipeline_mode<synchronous>, transform_indices = @transform_6, window_bounds = array<i64: 3, 32, 1>}, {pipeline_mode = #tpu.pipeline_mode<synchronous>, transform_indices = @transform_7, window_bounds = array<i64: 3, 32, 1>}, {pipeline_mode = #tpu.pipeline_mode<synchronous>, transform_indices = @transform_8, window_bounds = array<i64: 3, 32, 1>}, {pipeline_mode = #tpu.pipeline_mode<synchronous>, transform_indices = @transform_9, window_bounds = array<i64: 3, 32, 1>}, {pipeline_mode = #tpu.pipeline_mode<synchronous>, transform_indices = @transform_10, window_bounds = array<i64: 3, 32, 1>}, {transform_indices = @transform_11, window_bounds = array<i64: 1, 32, 128>}]} {
    %c0 = arith.constant 0 : index
    %c0_0 = arith.constant 0 : index
    %c0_1 = arith.constant 0 : index
    %0 = vector.load %arg3[%c0, %c0_0, %c0_1] : memref<1x1x128xf32, #tpu.memory_space<vmem>>, vector<1x1x128xf32>
    %1 = vector.shape_cast %0 : vector<1x1x128xf32> to vector<1x128xf32>
    %c0_2 = arith.constant 0 : index
    %c0_3 = arith.constant 0 : index
    %c0_4 = arith.constant 0 : index
    %2 = vector.load %arg1[%c0_2, %c0_3, %c0_4] : memref<1x32x128xbf16, #tpu.memory_space<vmem>>, vector<1x32x128xbf16>
    %3 = vector.shape_cast %2 : vector<1x32x128xbf16> to vector<32x128xbf16>
    %4 = arith.extf %3 : vector<32x128xbf16> to vector<32x128xf32>
    %c0_5 = arith.constant 0 : index
    %c0_6 = arith.constant 0 : index
    %c0_7 = arith.constant 0 : index
    %5 = vector.load %arg2[%c0_5, %c0_6, %c0_7] : memref<1x32x128xbf16, #tpu.memory_space<vmem>>, vector<1x32x128xbf16>
    %6 = vector.shape_cast %5 : vector<1x32x128xbf16> to vector<32x128xbf16>
    %7 = arith.extf %6 : vector<32x128xbf16> to vector<32x128xf32>
    %8 = arith.addf %4, %7 : vector<32x128xf32>
    %9 = vector.broadcast %1 : vector<1x128xf32> to vector<32x128xf32>
    %10 = arith.mulf %8, %9 : vector<32x128xf32>
    %c0_8 = arith.constant 0 : index
    %c0_9 = arith.constant 0 : index
    %c0_10 = arith.constant 0 : index
    %11 = vector.load %arg5[%c0_8, %c0_9, %c0_10] : memref<3x32x1xf32, #tpu.memory_space<vmem>>, vector<1x32x1xf32>
    %12 = vector.shape_cast %11 : vector<1x32x1xf32> to vector<32x1xf32>
    %c1_i32 = arith.constant 1 : i32
    %13 = tpu.dynamic_rotate %10 by %c1_i32 dim 1 : vector<32x128xf32>, i32 -> vector<32x128xf32>
    %c0_11 = arith.constant 0 : index
    %c0_12 = arith.constant 0 : index
    %c0_13 = arith.constant 0 : index
    %c0_14 = arith.constant 0 : index
    %14 = vector.load %arg4[%c0_11, %c0_12, %c0_13, %c0_14] : memref<3x3x32x1xf32, #tpu.memory_space<vmem>>, vector<1x1x32x1xf32>
    %15 = vector.shape_cast %14 : vector<1x1x32x1xf32> to vector<32x1xf32>
    %16 = vector.broadcast %15 : vector<32x1xf32> to vector<32x128xf32>
    %17 = arith.mulf %16, %13 : vector<32x128xf32>
    %18 = vector.broadcast %12 : vector<32x1xf32> to vector<32x128xf32>
    %19 = arith.addf %18, %17 : vector<32x128xf32>
    %c0_15 = arith.constant 0 : index
    %c1 = arith.constant 1 : index
    %c0_16 = arith.constant 0 : index
    %c0_17 = arith.constant 0 : index
    %20 = vector.load %arg4[%c0_15, %c1, %c0_16, %c0_17] : memref<3x3x32x1xf32, #tpu.memory_space<vmem>>, vector<1x1x32x1xf32>
    %21 = vector.shape_cast %20 : vector<1x1x32x1xf32> to vector<32x1xf32>
    %22 = vector.broadcast %21 : vector<32x1xf32> to vector<32x128xf32>
    %23 = arith.mulf %22, %10 : vector<32x128xf32>
    %24 = arith.addf %19, %23 : vector<32x128xf32>
    %c127_i32 = arith.constant 127 : i32
    %25 = tpu.dynamic_rotate %10 by %c127_i32 dim 1 : vector<32x128xf32>, i32 -> vector<32x128xf32>
    %c0_18 = arith.constant 0 : index
    %c2 = arith.constant 2 : index
    %c0_19 = arith.constant 0 : index
    %c0_20 = arith.constant 0 : index
    %26 = vector.load %arg4[%c0_18, %c2, %c0_19, %c0_20] : memref<3x3x32x1xf32, #tpu.memory_space<vmem>>, vector<1x1x32x1xf32>
    %27 = vector.shape_cast %26 : vector<1x1x32x1xf32> to vector<32x1xf32>
    %28 = vector.broadcast %27 : vector<32x1xf32> to vector<32x128xf32>
    %29 = arith.mulf %28, %25 : vector<32x128xf32>
    %30 = arith.addf %24, %29 : vector<32x128xf32>
    %c0_21 = arith.constant 0 : index
    %c0_22 = arith.constant 0 : index
    %c0_23 = arith.constant 0 : index
    %31 = vector.load %arg8[%c0_21, %c0_22, %c0_23] : memref<3x32x1xbf16, #tpu.memory_space<vmem>>, vector<1x32x1xbf16>
    %32 = vector.shape_cast %31 : vector<1x32x1xbf16> to vector<32x1xbf16>
    %c0_24 = arith.constant 0 : index
    %c0_25 = arith.constant 0 : index
    %c0_26 = arith.constant 0 : index
    %33 = vector.load %arg9[%c0_24, %c0_25, %c0_26] : memref<3x32x1xbf16, #tpu.memory_space<vmem>>, vector<1x32x1xbf16>
    %34 = vector.shape_cast %33 : vector<1x32x1xbf16> to vector<32x1xbf16>
    %cst = arith.constant dense<0.000000e+00> : vector<128xf32>
    %35 = vector.multi_reduction <add>, %30, %cst [0] : vector<32x128xf32> to vector<128xf32>
    %36 = vector.shape_cast %35 : vector<128xf32> to vector<1x128xf32>
    %cst_27 = arith.constant 3.125000e-02 : f32
    %37 = vector.broadcast %cst_27 : f32 to vector<1x128xf32>
    %38 = arith.mulf %36, %37 : vector<1x128xf32>
    %39 = arith.mulf %30, %30 : vector<32x128xf32>
    %cst_28 = arith.constant dense<0.000000e+00> : vector<128xf32>
    %40 = vector.multi_reduction <add>, %39, %cst_28 [0] : vector<32x128xf32> to vector<128xf32>
    %41 = vector.shape_cast %40 : vector<128xf32> to vector<1x128xf32>
    %cst_29 = arith.constant 3.125000e-02 : f32
    %42 = vector.broadcast %cst_29 : f32 to vector<1x128xf32>
    %43 = arith.mulf %41, %42 : vector<1x128xf32>
    %44 = arith.mulf %38, %38 : vector<1x128xf32>
    %45 = arith.subf %43, %44 : vector<1x128xf32>
    %cst_30 = arith.constant 9.99999974E-6 : f32
    %46 = vector.broadcast %cst_30 : f32 to vector<1x128xf32>
    %47 = arith.addf %45, %46 : vector<1x128xf32>
    %48 = math.rsqrt %47 : vector<1x128xf32>
    %49 = vector.broadcast %38 : vector<1x128xf32> to vector<32x128xf32>
    %50 = arith.subf %30, %49 : vector<32x128xf32>
    %51 = vector.broadcast %48 : vector<1x128xf32> to vector<32x128xf32>
    %52 = arith.mulf %50, %51 : vector<32x128xf32>
    %53 = arith.truncf %52 : vector<32x128xf32> to vector<32x128xbf16>
    %54 = vector.broadcast %32 : vector<32x1xbf16> to vector<32x128xbf16>
    %55 = arith.mulf %53, %54 : vector<32x128xbf16>
    %56 = vector.broadcast %34 : vector<32x1xbf16> to vector<32x128xbf16>
    %57 = arith.addf %55, %56 : vector<32x128xbf16>
    %58 = arith.mulf %57, %57 : vector<32x128xbf16>
    %59 = arith.mulf %57, %58 : vector<32x128xbf16>
    %cst_31 = arith.constant 4.467770e-02 : bf16
    %60 = vector.broadcast %cst_31 : bf16 to vector<32x128xbf16>
    %61 = arith.mulf %60, %59 : vector<32x128xbf16>
    %62 = arith.addf %57, %61 : vector<32x128xbf16>
    %cst_32 = arith.constant 7.968750e-01 : bf16
    %63 = vector.broadcast %cst_32 : bf16 to vector<32x128xbf16>
    %64 = arith.mulf %63, %62 : vector<32x128xbf16>
    %65 = math.tanh %64 : vector<32x128xbf16>
    %cst_33 = arith.constant 1.000000e+00 : bf16
    %66 = vector.broadcast %cst_33 : bf16 to vector<32x128xbf16>
    %67 = arith.addf %66, %65 : vector<32x128xbf16>
    %cst_34 = arith.constant 5.000000e-01 : bf16
    %68 = vector.broadcast %cst_34 : bf16 to vector<32x128xbf16>
    %69 = arith.mulf %68, %67 : vector<32x128xbf16>
    %70 = arith.mulf %57, %69 : vector<32x128xbf16>
    %c0_35 = arith.constant 0 : index
    %c0_36 = arith.constant 0 : index
    %c0_37 = arith.constant 0 : index
    %71 = vector.load %arg6[%c0_35, %c0_36, %c0_37] : memref<3x32x32xbf16, #tpu.memory_space<vmem>>, vector<1x32x32xbf16>
    %72 = vector.shape_cast %71 : vector<1x32x32xbf16> to vector<32x32xbf16>
    %cst_38 = arith.constant dense<0.000000e+00> : vector<32x128xf32>
    %73 = tpu.matmul %72, %70, %cst_38 {dimension_numbers = #tpu.dot_dimension_numbers<[1], [0], [0], [1], [0, 0, 1, 1], [], []>} : vector<32x32xbf16>, vector<32x128xbf16>, vector<32x128xf32> -> vector<32x128xf32>
    %c0_39 = arith.constant 0 : index
    %c0_40 = arith.constant 0 : index
    %c0_41 = arith.constant 0 : index
    %74 = vector.load %arg7[%c0_39, %c0_40, %c0_41] : memref<3x32x1xf32, #tpu.memory_space<vmem>>, vector<1x32x1xf32>
    %75 = vector.shape_cast %74 : vector<1x32x1xf32> to vector<32x1xf32>
    %76 = vector.broadcast %75 : vector<32x1xf32> to vector<32x128xf32>
    %77 = arith.addf %73, %76 : vector<32x128xf32>
    %c0_42 = arith.constant 0 : index
    %c0_43 = arith.constant 0 : index
    %c0_44 = arith.constant 0 : index
    %78 = vector.load %arg10[%c0_42, %c0_43, %c0_44] : memref<3x32x1xbf16, #tpu.memory_space<vmem>>, vector<1x32x1xbf16>
    %79 = vector.shape_cast %78 : vector<1x32x1xbf16> to vector<32x1xbf16>
    %c0_45 = arith.constant 0 : index
    %c0_46 = arith.constant 0 : index
    %c0_47 = arith.constant 0 : index
    %80 = vector.load %arg11[%c0_45, %c0_46, %c0_47] : memref<3x32x1xbf16, #tpu.memory_space<vmem>>, vector<1x32x1xbf16>
    %81 = vector.shape_cast %80 : vector<1x32x1xbf16> to vector<32x1xbf16>
    %cst_48 = arith.constant dense<0.000000e+00> : vector<128xf32>
    %82 = vector.multi_reduction <add>, %77, %cst_48 [0] : vector<32x128xf32> to vector<128xf32>
    %83 = vector.shape_cast %82 : vector<128xf32> to vector<1x128xf32>
    %cst_49 = arith.constant 3.125000e-02 : f32
    %84 = vector.broadcast %cst_49 : f32 to vector<1x128xf32>
    %85 = arith.mulf %83, %84 : vector<1x128xf32>
    %86 = arith.mulf %77, %77 : vector<32x128xf32>
    %cst_50 = arith.constant dense<0.000000e+00> : vector<128xf32>
    %87 = vector.multi_reduction <add>, %86, %cst_50 [0] : vector<32x128xf32> to vector<128xf32>
    %88 = vector.shape_cast %87 : vector<128xf32> to vector<1x128xf32>
    %cst_51 = arith.constant 3.125000e-02 : f32
    %89 = vector.broadcast %cst_51 : f32 to vector<1x128xf32>
    %90 = arith.mulf %88, %89 : vector<1x128xf32>
    %91 = arith.mulf %85, %85 : vector<1x128xf32>
    %92 = arith.subf %90, %91 : vector<1x128xf32>
    %cst_52 = arith.constant 9.99999974E-6 : f32
    %93 = vector.broadcast %cst_52 : f32 to vector<1x128xf32>
    %94 = arith.addf %92, %93 : vector<1x128xf32>
    %95 = math.rsqrt %94 : vector<1x128xf32>
    %96 = vector.broadcast %85 : vector<1x128xf32> to vector<32x128xf32>
    %97 = arith.subf %77, %96 : vector<32x128xf32>
    %98 = vector.broadcast %95 : vector<1x128xf32> to vector<32x128xf32>
    %99 = arith.mulf %97, %98 : vector<32x128xf32>
    %100 = arith.truncf %99 : vector<32x128xf32> to vector<32x128xbf16>
    %101 = vector.broadcast %79 : vector<32x1xbf16> to vector<32x128xbf16>
    %102 = arith.mulf %100, %101 : vector<32x128xbf16>
    %103 = vector.broadcast %81 : vector<32x1xbf16> to vector<32x128xbf16>
    %104 = arith.addf %102, %103 : vector<32x128xbf16>
    %105 = arith.mulf %104, %104 : vector<32x128xbf16>
    %106 = arith.mulf %104, %105 : vector<32x128xbf16>
    %cst_53 = arith.constant 4.467770e-02 : bf16
    %107 = vector.broadcast %cst_53 : bf16 to vector<32x128xbf16>
    %108 = arith.mulf %107, %106 : vector<32x128xbf16>
    %109 = arith.addf %104, %108 : vector<32x128xbf16>
    %cst_54 = arith.constant 7.968750e-01 : bf16
    %110 = vector.broadcast %cst_54 : bf16 to vector<32x128xbf16>
    %111 = arith.mulf %110, %109 : vector<32x128xbf16>
    %112 = math.tanh %111 : vector<32x128xbf16>
    %cst_55 = arith.constant 1.000000e+00 : bf16
    %113 = vector.broadcast %cst_55 : bf16 to vector<32x128xbf16>
    %114 = arith.addf %113, %112 : vector<32x128xbf16>
    %cst_56 = arith.constant 5.000000e-01 : bf16
    %115 = vector.broadcast %cst_56 : bf16 to vector<32x128xbf16>
    %116 = arith.mulf %115, %114 : vector<32x128xbf16>
    %117 = arith.mulf %104, %116 : vector<32x128xbf16>
    %118 = arith.extf %117 : vector<32x128xbf16> to vector<32x128xf32>
    %119 = arith.addf %10, %118 : vector<32x128xf32>
    %120 = vector.broadcast %1 : vector<1x128xf32> to vector<32x128xf32>
    %121 = arith.mulf %119, %120 : vector<32x128xf32>
    %c1_57 = arith.constant 1 : index
    %c0_58 = arith.constant 0 : index
    %c0_59 = arith.constant 0 : index
    %122 = vector.load %arg5[%c1_57, %c0_58, %c0_59] : memref<3x32x1xf32, #tpu.memory_space<vmem>>, vector<1x32x1xf32>
    %123 = vector.shape_cast %122 : vector<1x32x1xf32> to vector<32x1xf32>
    %c3_i32 = arith.constant 3 : i32
    %124 = tpu.dynamic_rotate %121 by %c3_i32 dim 1 : vector<32x128xf32>, i32 -> vector<32x128xf32>
    %c1_60 = arith.constant 1 : index
    %c0_61 = arith.constant 0 : index
    %c0_62 = arith.constant 0 : index
    %c0_63 = arith.constant 0 : index
    %125 = vector.load %arg4[%c1_60, %c0_61, %c0_62, %c0_63] : memref<3x3x32x1xf32, #tpu.memory_space<vmem>>, vector<1x1x32x1xf32>
    %126 = vector.shape_cast %125 : vector<1x1x32x1xf32> to vector<32x1xf32>
    %127 = vector.broadcast %126 : vector<32x1xf32> to vector<32x128xf32>
    %128 = arith.mulf %127, %124 : vector<32x128xf32>
    %129 = vector.broadcast %123 : vector<32x1xf32> to vector<32x128xf32>
    %130 = arith.addf %129, %128 : vector<32x128xf32>
    %c1_64 = arith.constant 1 : index
    %c1_65 = arith.constant 1 : index
    %c0_66 = arith.constant 0 : index
    %c0_67 = arith.constant 0 : index
    %131 = vector.load %arg4[%c1_64, %c1_65, %c0_66, %c0_67] : memref<3x3x32x1xf32, #tpu.memory_space<vmem>>, vector<1x1x32x1xf32>
    %132 = vector.shape_cast %131 : vector<1x1x32x1xf32> to vector<32x1xf32>
    %133 = vector.broadcast %132 : vector<32x1xf32> to vector<32x128xf32>
    %134 = arith.mulf %133, %121 : vector<32x128xf32>
    %135 = arith.addf %130, %134 : vector<32x128xf32>
    %c125_i32 = arith.constant 125 : i32
    %136 = tpu.dynamic_rotate %121 by %c125_i32 dim 1 : vector<32x128xf32>, i32 -> vector<32x128xf32>
    %c1_68 = arith.constant 1 : index
    %c2_69 = arith.constant 2 : index
    %c0_70 = arith.constant 0 : index
    %c0_71 = arith.constant 0 : index
    %137 = vector.load %arg4[%c1_68, %c2_69, %c0_70, %c0_71] : memref<3x3x32x1xf32, #tpu.memory_space<vmem>>, vector<1x1x32x1xf32>
    %138 = vector.shape_cast %137 : vector<1x1x32x1xf32> to vector<32x1xf32>
    %139 = vector.broadcast %138 : vector<32x1xf32> to vector<32x128xf32>
    %140 = arith.mulf %139, %136 : vector<32x128xf32>
    %141 = arith.addf %135, %140 : vector<32x128xf32>
    %c1_72 = arith.constant 1 : index
    %c0_73 = arith.constant 0 : index
    %c0_74 = arith.constant 0 : index
    %142 = vector.load %arg8[%c1_72, %c0_73, %c0_74] : memref<3x32x1xbf16, #tpu.memory_space<vmem>>, vector<1x32x1xbf16>
    %143 = vector.shape_cast %142 : vector<1x32x1xbf16> to vector<32x1xbf16>
    %c1_75 = arith.constant 1 : index
    %c0_76 = arith.constant 0 : index
    %c0_77 = arith.constant 0 : index
    %144 = vector.load %arg9[%c1_75, %c0_76, %c0_77] : memref<3x32x1xbf16, #tpu.memory_space<vmem>>, vector<1x32x1xbf16>
    %145 = vector.shape_cast %144 : vector<1x32x1xbf16> to vector<32x1xbf16>
    %cst_78 = arith.constant dense<0.000000e+00> : vector<128xf32>
    %146 = vector.multi_reduction <add>, %141, %cst_78 [0] : vector<32x128xf32> to vector<128xf32>
    %147 = vector.shape_cast %146 : vector<128xf32> to vector<1x128xf32>
    %cst_79 = arith.constant 3.125000e-02 : f32
    %148 = vector.broadcast %cst_79 : f32 to vector<1x128xf32>
    %149 = arith.mulf %147, %148 : vector<1x128xf32>
    %150 = arith.mulf %141, %141 : vector<32x128xf32>
    %cst_80 = arith.constant dense<0.000000e+00> : vector<128xf32>
    %151 = vector.multi_reduction <add>, %150, %cst_80 [0] : vector<32x128xf32> to vector<128xf32>
    %152 = vector.shape_cast %151 : vector<128xf32> to vector<1x128xf32>
    %cst_81 = arith.constant 3.125000e-02 : f32
    %153 = vector.broadcast %cst_81 : f32 to vector<1x128xf32>
    %154 = arith.mulf %152, %153 : vector<1x128xf32>
    %155 = arith.mulf %149, %149 : vector<1x128xf32>
    %156 = arith.subf %154, %155 : vector<1x128xf32>
    %cst_82 = arith.constant 9.99999974E-6 : f32
    %157 = vector.broadcast %cst_82 : f32 to vector<1x128xf32>
    %158 = arith.addf %156, %157 : vector<1x128xf32>
    %159 = math.rsqrt %158 : vector<1x128xf32>
    %160 = vector.broadcast %149 : vector<1x128xf32> to vector<32x128xf32>
    %161 = arith.subf %141, %160 : vector<32x128xf32>
    %162 = vector.broadcast %159 : vector<1x128xf32> to vector<32x128xf32>
    %163 = arith.mulf %161, %162 : vector<32x128xf32>
    %164 = arith.truncf %163 : vector<32x128xf32> to vector<32x128xbf16>
    %165 = vector.broadcast %143 : vector<32x1xbf16> to vector<32x128xbf16>
    %166 = arith.mulf %164, %165 : vector<32x128xbf16>
    %167 = vector.broadcast %145 : vector<32x1xbf16> to vector<32x128xbf16>
    %168 = arith.addf %166, %167 : vector<32x128xbf16>
    %169 = arith.mulf %168, %168 : vector<32x128xbf16>
    %170 = arith.mulf %168, %169 : vector<32x128xbf16>
    %cst_83 = arith.constant 4.467770e-02 : bf16
    %171 = vector.broadcast %cst_83 : bf16 to vector<32x128xbf16>
    %172 = arith.mulf %171, %170 : vector<32x128xbf16>
    %173 = arith.addf %168, %172 : vector<32x128xbf16>
    %cst_84 = arith.constant 7.968750e-01 : bf16
    %174 = vector.broadcast %cst_84 : bf16 to vector<32x128xbf16>
    %175 = arith.mulf %174, %173 : vector<32x128xbf16>
    %176 = math.tanh %175 : vector<32x128xbf16>
    %cst_85 = arith.constant 1.000000e+00 : bf16
    %177 = vector.broadcast %cst_85 : bf16 to vector<32x128xbf16>
    %178 = arith.addf %177, %176 : vector<32x128xbf16>
    %cst_86 = arith.constant 5.000000e-01 : bf16
    %179 = vector.broadcast %cst_86 : bf16 to vector<32x128xbf16>
    %180 = arith.mulf %179, %178 : vector<32x128xbf16>
    %181 = arith.mulf %168, %180 : vector<32x128xbf16>
    %c1_87 = arith.constant 1 : index
    %c0_88 = arith.constant 0 : index
    %c0_89 = arith.constant 0 : index
    %182 = vector.load %arg6[%c1_87, %c0_88, %c0_89] : memref<3x32x32xbf16, #tpu.memory_space<vmem>>, vector<1x32x32xbf16>
    %183 = vector.shape_cast %182 : vector<1x32x32xbf16> to vector<32x32xbf16>
    %cst_90 = arith.constant dense<0.000000e+00> : vector<32x128xf32>
    %184 = tpu.matmul %183, %181, %cst_90 {dimension_numbers = #tpu.dot_dimension_numbers<[1], [0], [0], [1], [0, 0, 1, 1], [], []>} : vector<32x32xbf16>, vector<32x128xbf16>, vector<32x128xf32> -> vector<32x128xf32>
    %c1_91 = arith.constant 1 : index
    %c0_92 = arith.constant 0 : index
    %c0_93 = arith.constant 0 : index
    %185 = vector.load %arg7[%c1_91, %c0_92, %c0_93] : memref<3x32x1xf32, #tpu.memory_space<vmem>>, vector<1x32x1xf32>
    %186 = vector.shape_cast %185 : vector<1x32x1xf32> to vector<32x1xf32>
    %187 = vector.broadcast %186 : vector<32x1xf32> to vector<32x128xf32>
    %188 = arith.addf %184, %187 : vector<32x128xf32>
    %c1_94 = arith.constant 1 : index
    %c0_95 = arith.constant 0 : index
    %c0_96 = arith.constant 0 : index
    %189 = vector.load %arg10[%c1_94, %c0_95, %c0_96] : memref<3x32x1xbf16, #tpu.memory_space<vmem>>, vector<1x32x1xbf16>
    %190 = vector.shape_cast %189 : vector<1x32x1xbf16> to vector<32x1xbf16>
    %c1_97 = arith.constant 1 : index
    %c0_98 = arith.constant 0 : index
    %c0_99 = arith.constant 0 : index
    %191 = vector.load %arg11[%c1_97, %c0_98, %c0_99] : memref<3x32x1xbf16, #tpu.memory_space<vmem>>, vector<1x32x1xbf16>
    %192 = vector.shape_cast %191 : vector<1x32x1xbf16> to vector<32x1xbf16>
    %cst_100 = arith.constant dense<0.000000e+00> : vector<128xf32>
    %193 = vector.multi_reduction <add>, %188, %cst_100 [0] : vector<32x128xf32> to vector<128xf32>
    %194 = vector.shape_cast %193 : vector<128xf32> to vector<1x128xf32>
    %cst_101 = arith.constant 3.125000e-02 : f32
    %195 = vector.broadcast %cst_101 : f32 to vector<1x128xf32>
    %196 = arith.mulf %194, %195 : vector<1x128xf32>
    %197 = arith.mulf %188, %188 : vector<32x128xf32>
    %cst_102 = arith.constant dense<0.000000e+00> : vector<128xf32>
    %198 = vector.multi_reduction <add>, %197, %cst_102 [0] : vector<32x128xf32> to vector<128xf32>
    %199 = vector.shape_cast %198 : vector<128xf32> to vector<1x128xf32>
    %cst_103 = arith.constant 3.125000e-02 : f32
    %200 = vector.broadcast %cst_103 : f32 to vector<1x128xf32>
    %201 = arith.mulf %199, %200 : vector<1x128xf32>
    %202 = arith.mulf %196, %196 : vector<1x128xf32>
    %203 = arith.subf %201, %202 : vector<1x128xf32>
    %cst_104 = arith.constant 9.99999974E-6 : f32
    %204 = vector.broadcast %cst_104 : f32 to vector<1x128xf32>
    %205 = arith.addf %203, %204 : vector<1x128xf32>
    %206 = math.rsqrt %205 : vector<1x128xf32>
    %207 = vector.broadcast %196 : vector<1x128xf32> to vector<32x128xf32>
    %208 = arith.subf %188, %207 : vector<32x128xf32>
    %209 = vector.broadcast %206 : vector<1x128xf32> to vector<32x128xf32>
    %210 = arith.mulf %208, %209 : vector<32x128xf32>
    %211 = arith.truncf %210 : vector<32x128xf32> to vector<32x128xbf16>
    %212 = vector.broadcast %190 : vector<32x1xbf16> to vector<32x128xbf16>
    %213 = arith.mulf %211, %212 : vector<32x128xbf16>
    %214 = vector.broadcast %192 : vector<32x1xbf16> to vector<32x128xbf16>
    %215 = arith.addf %213, %214 : vector<32x128xbf16>
    %216 = arith.mulf %215, %215 : vector<32x128xbf16>
    %217 = arith.mulf %215, %216 : vector<32x128xbf16>
    %cst_105 = arith.constant 4.467770e-02 : bf16
    %218 = vector.broadcast %cst_105 : bf16 to vector<32x128xbf16>
    %219 = arith.mulf %218, %217 : vector<32x128xbf16>
    %220 = arith.addf %215, %219 : vector<32x128xbf16>
    %cst_106 = arith.constant 7.968750e-01 : bf16
    %221 = vector.broadcast %cst_106 : bf16 to vector<32x128xbf16>
    %222 = arith.mulf %221, %220 : vector<32x128xbf16>
    %223 = math.tanh %222 : vector<32x128xbf16>
    %cst_107 = arith.constant 1.000000e+00 : bf16
    %224 = vector.broadcast %cst_107 : bf16 to vector<32x128xbf16>
    %225 = arith.addf %224, %223 : vector<32x128xbf16>
    %cst_108 = arith.constant 5.000000e-01 : bf16
    %226 = vector.broadcast %cst_108 : bf16 to vector<32x128xbf16>
    %227 = arith.mulf %226, %225 : vector<32x128xbf16>
    %228 = arith.mulf %215, %227 : vector<32x128xbf16>
    %229 = arith.extf %228 : vector<32x128xbf16> to vector<32x128xf32>
    %230 = arith.addf %121, %229 : vector<32x128xf32>
    %231 = vector.broadcast %1 : vector<1x128xf32> to vector<32x128xf32>
    %232 = arith.mulf %230, %231 : vector<32x128xf32>
    %c2_109 = arith.constant 2 : index
    %c0_110 = arith.constant 0 : index
    %c0_111 = arith.constant 0 : index
    %233 = vector.load %arg5[%c2_109, %c0_110, %c0_111] : memref<3x32x1xf32, #tpu.memory_space<vmem>>, vector<1x32x1xf32>
    %234 = vector.shape_cast %233 : vector<1x32x1xf32> to vector<32x1xf32>
    %c9_i32 = arith.constant 9 : i32
    %235 = tpu.dynamic_rotate %232 by %c9_i32 dim 1 : vector<32x128xf32>, i32 -> vector<32x128xf32>
    %c2_112 = arith.constant 2 : index
    %c0_113 = arith.constant 0 : index
    %c0_114 = arith.constant 0 : index
    %c0_115 = arith.constant 0 : index
    %236 = vector.load %arg4[%c2_112, %c0_113, %c0_114, %c0_115] : memref<3x3x32x1xf32, #tpu.memory_space<vmem>>, vector<1x1x32x1xf32>
    %237 = vector.shape_cast %236 : vector<1x1x32x1xf32> to vector<32x1xf32>
    %238 = vector.broadcast %237 : vector<32x1xf32> to vector<32x128xf32>
    %239 = arith.mulf %238, %235 : vector<32x128xf32>
    %240 = vector.broadcast %234 : vector<32x1xf32> to vector<32x128xf32>
    %241 = arith.addf %240, %239 : vector<32x128xf32>
    %c2_116 = arith.constant 2 : index
    %c1_117 = arith.constant 1 : index
    %c0_118 = arith.constant 0 : index
    %c0_119 = arith.constant 0 : index
    %242 = vector.load %arg4[%c2_116, %c1_117, %c0_118, %c0_119] : memref<3x3x32x1xf32, #tpu.memory_space<vmem>>, vector<1x1x32x1xf32>
    %243 = vector.shape_cast %242 : vector<1x1x32x1xf32> to vector<32x1xf32>
    %244 = vector.broadcast %243 : vector<32x1xf32> to vector<32x128xf32>
    %245 = arith.mulf %244, %232 : vector<32x128xf32>
    %246 = arith.addf %241, %245 : vector<32x128xf32>
    %c119_i32 = arith.constant 119 : i32
    %247 = tpu.dynamic_rotate %232 by %c119_i32 dim 1 : vector<32x128xf32>, i32 -> vector<32x128xf32>
    %c2_120 = arith.constant 2 : index
    %c2_121 = arith.constant 2 : index
    %c0_122 = arith.constant 0 : index
    %c0_123 = arith.constant 0 : index
    %248 = vector.load %arg4[%c2_120, %c2_121, %c0_122, %c0_123] : memref<3x3x32x1xf32, #tpu.memory_space<vmem>>, vector<1x1x32x1xf32>
    %249 = vector.shape_cast %248 : vector<1x1x32x1xf32> to vector<32x1xf32>
    %250 = vector.broadcast %249 : vector<32x1xf32> to vector<32x128xf32>
    %251 = arith.mulf %250, %247 : vector<32x128xf32>
    %252 = arith.addf %246, %251 : vector<32x128xf32>
    %c2_124 = arith.constant 2 : index
    %c0_125 = arith.constant 0 : index
    %c0_126 = arith.constant 0 : index
    %253 = vector.load %arg8[%c2_124, %c0_125, %c0_126] : memref<3x32x1xbf16, #tpu.memory_space<vmem>>, vector<1x32x1xbf16>
    %254 = vector.shape_cast %253 : vector<1x32x1xbf16> to vector<32x1xbf16>
    %c2_127 = arith.constant 2 : index
    %c0_128 = arith.constant 0 : index
    %c0_129 = arith.constant 0 : index
    %255 = vector.load %arg9[%c2_127, %c0_128, %c0_129] : memref<3x32x1xbf16, #tpu.memory_space<vmem>>, vector<1x32x1xbf16>
    %256 = vector.shape_cast %255 : vector<1x32x1xbf16> to vector<32x1xbf16>
    %cst_130 = arith.constant dense<0.000000e+00> : vector<128xf32>
    %257 = vector.multi_reduction <add>, %252, %cst_130 [0] : vector<32x128xf32> to vector<128xf32>
    %258 = vector.shape_cast %257 : vector<128xf32> to vector<1x128xf32>
    %cst_131 = arith.constant 3.125000e-02 : f32
    %259 = vector.broadcast %cst_131 : f32 to vector<1x128xf32>
    %260 = arith.mulf %258, %259 : vector<1x128xf32>
    %261 = arith.mulf %252, %252 : vector<32x128xf32>
    %cst_132 = arith.constant dense<0.000000e+00> : vector<128xf32>
    %262 = vector.multi_reduction <add>, %261, %cst_132 [0] : vector<32x128xf32> to vector<128xf32>
    %263 = vector.shape_cast %262 : vector<128xf32> to vector<1x128xf32>
    %cst_133 = arith.constant 3.125000e-02 : f32
    %264 = vector.broadcast %cst_133 : f32 to vector<1x128xf32>
    %265 = arith.mulf %263, %264 : vector<1x128xf32>
    %266 = arith.mulf %260, %260 : vector<1x128xf32>
    %267 = arith.subf %265, %266 : vector<1x128xf32>
    %cst_134 = arith.constant 9.99999974E-6 : f32
    %268 = vector.broadcast %cst_134 : f32 to vector<1x128xf32>
    %269 = arith.addf %267, %268 : vector<1x128xf32>
    %270 = math.rsqrt %269 : vector<1x128xf32>
    %271 = vector.broadcast %260 : vector<1x128xf32> to vector<32x128xf32>
    %272 = arith.subf %252, %271 : vector<32x128xf32>
    %273 = vector.broadcast %270 : vector<1x128xf32> to vector<32x128xf32>
    %274 = arith.mulf %272, %273 : vector<32x128xf32>
    %275 = arith.truncf %274 : vector<32x128xf32> to vector<32x128xbf16>
    %276 = vector.broadcast %254 : vector<32x1xbf16> to vector<32x128xbf16>
    %277 = arith.mulf %275, %276 : vector<32x128xbf16>
    %278 = vector.broadcast %256 : vector<32x1xbf16> to vector<32x128xbf16>
    %279 = arith.addf %277, %278 : vector<32x128xbf16>
    %280 = arith.mulf %279, %279 : vector<32x128xbf16>
    %281 = arith.mulf %279, %280 : vector<32x128xbf16>
    %cst_135 = arith.constant 4.467770e-02 : bf16
    %282 = vector.broadcast %cst_135 : bf16 to vector<32x128xbf16>
    %283 = arith.mulf %282, %281 : vector<32x128xbf16>
    %284 = arith.addf %279, %283 : vector<32x128xbf16>
    %cst_136 = arith.constant 7.968750e-01 : bf16
    %285 = vector.broadcast %cst_136 : bf16 to vector<32x128xbf16>
    %286 = arith.mulf %285, %284 : vector<32x128xbf16>
    %287 = math.tanh %286 : vector<32x128xbf16>
    %cst_137 = arith.constant 1.000000e+00 : bf16
    %288 = vector.broadcast %cst_137 : bf16 to vector<32x128xbf16>
    %289 = arith.addf %288, %287 : vector<32x128xbf16>
    %cst_138 = arith.constant 5.000000e-01 : bf16
    %290 = vector.broadcast %cst_138 : bf16 to vector<32x128xbf16>
    %291 = arith.mulf %290, %289 : vector<32x128xbf16>
    %292 = arith.mulf %279, %291 : vector<32x128xbf16>
    %c2_139 = arith.constant 2 : index
    %c0_140 = arith.constant 0 : index
    %c0_141 = arith.constant 0 : index
    %293 = vector.load %arg6[%c2_139, %c0_140, %c0_141] : memref<3x32x32xbf16, #tpu.memory_space<vmem>>, vector<1x32x32xbf16>
    %294 = vector.shape_cast %293 : vector<1x32x32xbf16> to vector<32x32xbf16>
    %cst_142 = arith.constant dense<0.000000e+00> : vector<32x128xf32>
    %295 = tpu.matmul %294, %292, %cst_142 {dimension_numbers = #tpu.dot_dimension_numbers<[1], [0], [0], [1], [0, 0, 1, 1], [], []>} : vector<32x32xbf16>, vector<32x128xbf16>, vector<32x128xf32> -> vector<32x128xf32>
    %c2_143 = arith.constant 2 : index
    %c0_144 = arith.constant 0 : index
    %c0_145 = arith.constant 0 : index
    %296 = vector.load %arg7[%c2_143, %c0_144, %c0_145] : memref<3x32x1xf32, #tpu.memory_space<vmem>>, vector<1x32x1xf32>
    %297 = vector.shape_cast %296 : vector<1x32x1xf32> to vector<32x1xf32>
    %298 = vector.broadcast %297 : vector<32x1xf32> to vector<32x128xf32>
    %299 = arith.addf %295, %298 : vector<32x128xf32>
    %c2_146 = arith.constant 2 : index
    %c0_147 = arith.constant 0 : index
    %c0_148 = arith.constant 0 : index
    %300 = vector.load %arg10[%c2_146, %c0_147, %c0_148] : memref<3x32x1xbf16, #tpu.memory_space<vmem>>, vector<1x32x1xbf16>
    %301 = vector.shape_cast %300 : vector<1x32x1xbf16> to vector<32x1xbf16>
    %c2_149 = arith.constant 2 : index
    %c0_150 = arith.constant 0 : index
    %c0_151 = arith.constant 0 : index
    %302 = vector.load %arg11[%c2_149, %c0_150, %c0_151] : memref<3x32x1xbf16, #tpu.memory_space<vmem>>, vector<1x32x1xbf16>
    %303 = vector.shape_cast %302 : vector<1x32x1xbf16> to vector<32x1xbf16>
    %cst_152 = arith.constant dense<0.000000e+00> : vector<128xf32>
    %304 = vector.multi_reduction <add>, %299, %cst_152 [0] : vector<32x128xf32> to vector<128xf32>
    %305 = vector.shape_cast %304 : vector<128xf32> to vector<1x128xf32>
    %cst_153 = arith.constant 3.125000e-02 : f32
    %306 = vector.broadcast %cst_153 : f32 to vector<1x128xf32>
    %307 = arith.mulf %305, %306 : vector<1x128xf32>
    %308 = arith.mulf %299, %299 : vector<32x128xf32>
    %cst_154 = arith.constant dense<0.000000e+00> : vector<128xf32>
    %309 = vector.multi_reduction <add>, %308, %cst_154 [0] : vector<32x128xf32> to vector<128xf32>
    %310 = vector.shape_cast %309 : vector<128xf32> to vector<1x128xf32>
    %cst_155 = arith.constant 3.125000e-02 : f32
    %311 = vector.broadcast %cst_155 : f32 to vector<1x128xf32>
    %312 = arith.mulf %310, %311 : vector<1x128xf32>
    %313 = arith.mulf %307, %307 : vector<1x128xf32>
    %314 = arith.subf %312, %313 : vector<1x128xf32>
    %cst_156 = arith.constant 9.99999974E-6 : f32
    %315 = vector.broadcast %cst_156 : f32 to vector<1x128xf32>
    %316 = arith.addf %314, %315 : vector<1x128xf32>
    %317 = math.rsqrt %316 : vector<1x128xf32>
    %318 = vector.broadcast %307 : vector<1x128xf32> to vector<32x128xf32>
    %319 = arith.subf %299, %318 : vector<32x128xf32>
    %320 = vector.broadcast %317 : vector<1x128xf32> to vector<32x128xf32>
    %321 = arith.mulf %319, %320 : vector<32x128xf32>
    %322 = arith.truncf %321 : vector<32x128xf32> to vector<32x128xbf16>
    %323 = vector.broadcast %301 : vector<32x1xbf16> to vector<32x128xbf16>
    %324 = arith.mulf %322, %323 : vector<32x128xbf16>
    %325 = vector.broadcast %303 : vector<32x1xbf16> to vector<32x128xbf16>
    %326 = arith.addf %324, %325 : vector<32x128xbf16>
    %327 = arith.mulf %326, %326 : vector<32x128xbf16>
    %328 = arith.mulf %326, %327 : vector<32x128xbf16>
    %cst_157 = arith.constant 4.467770e-02 : bf16
    %329 = vector.broadcast %cst_157 : bf16 to vector<32x128xbf16>
    %330 = arith.mulf %329, %328 : vector<32x128xbf16>
    %331 = arith.addf %326, %330 : vector<32x128xbf16>
    %cst_158 = arith.constant 7.968750e-01 : bf16
    %332 = vector.broadcast %cst_158 : bf16 to vector<32x128xbf16>
    %333 = arith.mulf %332, %331 : vector<32x128xbf16>
    %334 = math.tanh %333 : vector<32x128xbf16>
    %cst_159 = arith.constant 1.000000e+00 : bf16
    %335 = vector.broadcast %cst_159 : bf16 to vector<32x128xbf16>
    %336 = arith.addf %335, %334 : vector<32x128xbf16>
    %cst_160 = arith.constant 5.000000e-01 : bf16
    %337 = vector.broadcast %cst_160 : bf16 to vector<32x128xbf16>
    %338 = arith.mulf %337, %336 : vector<32x128xbf16>
    %339 = arith.mulf %326, %338 : vector<32x128xbf16>
    %340 = arith.extf %339 : vector<32x128xbf16> to vector<32x128xf32>
    %341 = arith.addf %232, %340 : vector<32x128xf32>
    %342 = vector.broadcast %1 : vector<1x128xf32> to vector<32x128xf32>
    %343 = arith.mulf %341, %342 : vector<32x128xf32>
    %344 = arith.truncf %343 : vector<32x128xf32> to vector<32x128xbf16>
    %c0_161 = arith.constant 0 : index
    %c0_162 = arith.constant 0 : index
    %c0_163 = arith.constant 0 : index
    %345 = vector.load %arg12[%c0_161, %c0_162, %c0_163] : memref<1x32x128xbf16, #tpu.memory_space<vmem>>, vector<1x32x128xbf16>
    %346 = vector.shape_cast %345 : vector<1x32x128xbf16> to vector<32x128xbf16>
    %347 = vector.shape_cast %344 : vector<32x128xbf16> to vector<1x32x128xbf16>
    tpu.vector_store %arg12[%c0_161, %c0_162, %c0_163], %347 {strides = array<i32>} : memref<1x32x128xbf16, #tpu.memory_space<vmem>>, vector<1x32x128xbf16>,
    return
  }
  func.func @transform_0(%arg0: i32) -> (i32, i32, i32) {
    %c0_i32 = arith.constant 0 : i32
    %c0_i32_0 = arith.constant 0 : i32
    %c0_i32_1 = arith.constant 0 : i32
    return %arg0, %c0_i32, %c0_i32_0 : i32, i32, i32
  }
  func.func @transform_1(%arg0: i32) -> (i32, i32, i32) {
    %c0_i32 = arith.constant 0 : i32
    %c0_i32_0 = arith.constant 0 : i32
    %c0_i32_1 = arith.constant 0 : i32
    return %arg0, %c0_i32, %c0_i32_0 : i32, i32, i32
  }
  func.func @transform_2(%arg0: i32) -> (i32, i32, i32) {
    %c0_i32 = arith.constant 0 : i32
    %c0_i32_0 = arith.constant 0 : i32
    %c0_i32_1 = arith.constant 0 : i32
    return %arg0, %c0_i32, %c0_i32_0 : i32, i32, i32
  }
  func.func @transform_3(%arg0: i32) -> (i32, i32, i32, i32) {
    %c0_i32 = arith.constant 0 : i32
    %c0_i32_0 = arith.constant 0 : i32
    %c0_i32_1 = arith.constant 0 : i32
    %c0_i32_2 = arith.constant 0 : i32
    %c0_i32_3 = arith.constant 0 : i32
    return %c0_i32, %c0_i32_0, %c0_i32_1, %c0_i32_2 : i32, i32, i32, i32
  }
  func.func @transform_4(%arg0: i32) -> (i32, i32, i32) {
    %c0_i32 = arith.constant 0 : i32
    %c0_i32_0 = arith.constant 0 : i32
    %c0_i32_1 = arith.constant 0 : i32
    %c0_i32_2 = arith.constant 0 : i32
    return %c0_i32, %c0_i32_0, %c0_i32_1 : i32, i32, i32
  }
  func.func @transform_5(%arg0: i32) -> (i32, i32, i32) {
    %c0_i32 = arith.constant 0 : i32
    %c0_i32_0 = arith.constant 0 : i32
    %c0_i32_1 = arith.constant 0 : i32
    %c0_i32_2 = arith.constant 0 : i32
    return %c0_i32, %c0_i32_0, %c0_i32_1 : i32, i32, i32
  }
  func.func @transform_6(%arg0: i32) -> (i32, i32, i32) {
    %c0_i32 = arith.constant 0 : i32
    %c0_i32_0 = arith.constant 0 : i32
    %c0_i32_1 = arith.constant 0 : i32
    %c0_i32_2 = arith.constant 0 : i32
    return %c0_i32, %c0_i32_0, %c0_i32_1 : i32, i32, i32
  }
  func.func @transform_7(%arg0: i32) -> (i32, i32, i32) {
    %c0_i32 = arith.constant 0 : i32
    %c0_i32_0 = arith.constant 0 : i32
    %c0_i32_1 = arith.constant 0 : i32
    %c0_i32_2 = arith.constant 0 : i32
    return %c0_i32, %c0_i32_0, %c0_i32_1 : i32, i32, i32
  }
  func.func @transform_8(%arg0: i32) -> (i32, i32, i32) {
    %c0_i32 = arith.constant 0 : i32
    %c0_i32_0 = arith.constant 0 : i32
    %c0_i32_1 = arith.constant 0 : i32
    %c0_i32_2 = arith.constant 0 : i32
    return %c0_i32, %c0_i32_0, %c0_i32_1 : i32, i32, i32
  }
  func.func @transform_9(%arg0: i32) -> (i32, i32, i32) {
    %c0_i32 = arith.constant 0 : i32
    %c0_i32_0 = arith.constant 0 : i32
    %c0_i32_1 = arith.constant 0 : i32
    %c0_i32_2 = arith.constant 0 : i32
    return %c0_i32, %c0_i32_0, %c0_i32_1 : i32, i32, i32
  }
  func.func @transform_10(%arg0: i32) -> (i32, i32, i32) {
    %c0_i32 = arith.constant 0 : i32
    %c0_i32_0 = arith.constant 0 : i32
    %c0_i32_1 = arith.constant 0 : i32
    %c0_i32_2 = arith.constant 0 : i32
    return %c0_i32, %c0_i32_0, %c0_i32_1 : i32, i32, i32
  }
  func.func @transform_11(%arg0: i32) -> (i32, i32, i32) {
    %c0_i32 = arith.constant 0 : i32
    %c0_i32_0 = arith.constant 0 : i32
    %c0_i32_1 = arith.constant 0 : i32
    return %arg0, %c0_i32, %c0_i32_0 : i32, i32, i32
  }
}

</mosaic_0001>

<bundles_post_ra>
// kernel: ddsconv_forward.1
= control target key start
LH: loop header
LB: loop body
LE: loop exit
PB: predicated region body
PF: predicated region fallthrough
CT: control target
= control target key end

     0   :  { %s3128_s17 = smov 0   ;;  %s3836_s0 = inlined_call_operand.vmem [shape: bf16[2,32,128], index: 0, kind: input, shape index: {}, may-alias: {0,11}]   ;;  %s3837_s1 = inlined_call_operand.vmem [shape: bf16[2,32,128], index: 1, kind: input, shape index: {}]   ;;  %s3838_s2 = inlined_call_operand.vmem [shape: f32[2,1,128], index: 2, kind: input, shape index: {}]   ;;  %s3839_s3 = inlined_call_operand.vmem [shape: f32[3,3,32,1], index: 3, kind: input, shape index: {}]   ;;  %s3840_s4 = inlined_call_operand.vmem [shape: f32[3,32,1], index: 4, kind: input, shape index: {}]   ;;  %s3841_s5 = inlined_call_operand.vmem [shape: bf16[3,32,32], index: 5, kind: input, shape index: {}]   ;;  %s3842_s6 = inlined_call_operand.vmem [shape: f32[3,32,1], index: 6, kind: input, shape index: {}]   ;;  %s3843_s7 = inlined_call_operand.vmem [shape: bf16[3,32,1], index: 7, kind: input, shape index: {}]   ;;  %s3844_s8 = inlined_call_operand.vmem [shape: bf16[3,32,1], index: 8, kind: input, shape index: {}]   ;;  %s3845_s9 = inlined_call_operand.vmem [shape: bf16[3,32,1], index: 9, kind: input, shape index: {}]   ;;  %s3846_s10 = inlined_call_operand.vmem [shape: bf16[3,32,1], index: 10, kind: input, shape index: {}]   ;;  %s3847_s11 = inlined_call_operand.vmem [shape: bf16[2,32,128], index: 11, kind: output, shape index: {}, may-alias: {0,11}]  }
   0x1 LB: > { %s2798_s18 = sadd.s32 4294967295, %s3058_s17   ;;  %p2802_p0 = scmp.ge.s32.totalorder %s3058_s17, 1  ;;  %s3058_s17 = sphi %s3128_s17, %s21_s17  }
   0x2   : > { %p355_p1 = scmp.lt.s32.totalorder %s3058_s17, 3 }
   0x4   : > { %p356_p2 = pnand %p2802_p0, %p355_p1 }
   0x5   : > { %p403_p3 = scmp.lt.s32.totalorder (!%p356_p2), %s2798_s18, 1  ;;  %s3061_s16 = smov (!%p356_p2), 1  }
   0x6   : > { %359 = sbr.rel (%p356_p2) target bundleno = 1673 (0x689), region = 64  ;;  %s3062_s15 = smov (!%p356_p2), 127  }
   0x7   : > { %s3064_s21 = smov (!%p356_p2), 3   ;;  %s3065_s22 = smov (!%p356_p2), 125  }
   0x8   : > { %s3067_s20 = smov (!%p356_p2), 119  }
   0xb   : > { %v462_v0 = vld [vmem:[%s3839_s3] sm:$0xff]  ;;  %v464_v1 = vld [vmem:[%s3839_s3 + $0x10] sm:$0xff]  ;;  %v3060_v2 = vmov 0   ;;  %s3849_s18 = smov (!%p403_p3, %s2798_s18), 1  ;;  %v463_v6 = vld [vmem:[%s3839_s3 + $0x8] sm:$0xff]  ;;  %vm893_vm3 = vcmask 261120  }
   0xc   : > { %2985 = vset.pattern.permute.xlu1 %v3060_v2  ;;  %2986 = vset.pattern.permute.xlu2 %v3060_v2  ;;  %s3142_s23 = sshll.u32 %s3849_s18, 4  ;;  %s3147_s26 = scalar_lea.vmem %s3838_s2, %s3849_s18  ;;  %v451_v20 = vld [vmem:[%s3840_s4 + $0x8] sm:$0xff]  ;;  %v2809_v23 = vld [vmem:[%s3839_s3 + $0x20] sm:$0xff]  ;;  %v452_v29 = vld [vmem:[%s3840_s4 + $0x10] sm:$0xff] }
   0xd   : > { %468 = vperm.xlu1 %2985, %v462_v0   ;;  %478 = vperm.xlu2 %2986, %v464_v1   ;;  %s407_s29 = scalar_lea.vmem %s3836_s0, %s3142_s23  ;;  %s412_s13 = scalar_lea.vmem %s3837_s1, %s3142_s23  ;;  %v2988_v9 = vld [vmem:[%s3147_s26] ss:$0 sm:$0xff]  ;;  %v2810_v26 = vld [vmem:[%s3839_s3 + $0x28] sm:$0xff]  ;;  %v2811_v30 = vld [vmem:[%s3839_s3 + $0x30] sm:$0xff] }
   0xe   : > { %2987 = vset.pattern.permute.xlu0 %v3060_v2  ;;  %v2964_v3 = vld [vmem:[%s407_s29 + $0x8] sm:$0xff]   ;;  %v2939_v5 = vld [vmem:[%s407_s29] sm:$0xff]   ;;  %v465_v31 = vld [vmem:[%s3839_s3 + $0x18] sm:$0xff] }
   0xf   : > { %v2965_v4 = vld [vmem:[%s412_s13 + $0x8] sm:$0xff]   ;;  %v2944_v7 = vunpack.c.l.bf16 %v2964_v3  ;;  %v2940_v10 = vunpack.c.l.bf16 %v2939_v5  ;;  %v2947_v11 = vld [vmem:[%s412_s13] sm:$0xff]   ;;  %v2941_v15 = vunpack.c.h.bf16 %v2939_v5  ;;  %v2945_v21 = vunpack.c.h.bf16 %v2964_v3  ;;  %v453_v33 = vld [vmem:[%s3840_s4 + $0x18] sm:$0xff] }
  0x10   : > { %v2952_v8 = vunpack.c.l.bf16 %v2965_v4  ;;  %v2948_v12 = vunpack.c.l.bf16 %v2947_v11  ;;  %v2949_v16 = vunpack.c.h.bf16 %v2947_v11  ;;  %v2953_v22 = vunpack.c.h.bf16 %v2965_v4  ;;  %v450_v28 = vld [vmem:[%s3840_s4] sm:$0xff]  ;;  %v2812_v34 = vld [vmem:[%s3839_s3 + $0x38] sm:$0xff]  ;;  %v2814_v35 = vld [vmem:[%s3839_s3 + $0x48] sm:$0xff] }
  0x11   : > { %v2813_v32 = vld [vmem:[%s3839_s3 + $0x40] sm:$0xff]  ;;  %v2815_v36 = vld [vmem:[%s3839_s3 + $0x50] sm:$0xff]  ;;  %v590_v37 = vld [vmem:[%s3843_s7 + $0x8] sm:$0xf] }
  0x12   : > { %v441_v13 = vadd.f32 %v2952_v8, %v2944_v7  ;;  %v439_v14 = vadd.f32 %v2948_v12, %v2940_v10  ;;  %v440_v19 = vadd.f32 %v2949_v16, %v2941_v15  ;;  %v442_v25 = vadd.f32 %v2953_v22, %v2945_v21  ;;  %v591_v38 = vld [vmem:[%s3843_s7 + $0xc] sm:$0xf]  ;;  %v2816_v39 = vld [vmem:[%s3839_s3 + $0x58] sm:$0xff]  ;;  %v589_v40 = vld [vmem:[%s3843_s7 + $0x4] sm:$0xf] }
  0x13   : > { %v594_v41 = vld [vmem:[%s3844_s8 + $0x8] sm:$0xf]  ;;  %v588_v42 = vld [vmem:[%s3843_s7] sm:$0xf]  ;;  %v593_v44 = vld [vmem:[%s3844_s8 + $0x4] sm:$0xf] }
  0x14   : > { %v3161_v17 = vmul.f32 %v2988_v9, %v441_v13  ;;  %v3163_v18 = vmul.f32 %v2988_v9, %v439_v14  ;;  %v3173_v24 = vmul.f32 %v2988_v9, %v440_v19  ;;  %v3179_v27 = vmul.f32 %v2988_v9, %v442_v25  ;;  %v592_v43 = vld [vmem:[%s3844_s8] sm:$0xf]  ;;  %v595_v45 = vld [vmem:[%s3844_s8 + $0xc] sm:$0xf]  ;;  %v861_v47 = vld [vmem:[%s3842_s6 + $0x10] sm:$0xff] }
  0x15   : > { %473 = vperm.xlu1 %2985, %v463_v6   ;;  %v860_v46 = vld [vmem:[%s3842_s6 + $0x8] sm:$0xff]  ;;  %v859_v48 = vld [vmem:[%s3842_s6] sm:$0xff]  ;;  %v862_v51 = vld [vmem:[%s3842_s6 + $0x18] sm:$0xff] }
  0x16   : > { %458 = vrot.lane.b32.xlu2 %v3161_v17, %s3061_s16  ;;  %454 = vrot.lane.b32.xlu0 %v3163_v18, %s3061_s16  ;;  %v919_v49 = vld [vmem:[%s3845_s9] sm:$0xf]  ;;  %v920_v50 = vld [vmem:[%s3845_s9 + $0x4] sm:$0xf] }
  0x17   : > { %v922_v52 = vld [vmem:[%s3845_s9 + $0xc] sm:$0xf]  ;;  %v923_v53 = vld [vmem:[%s3846_s10] sm:$0xf]  ;;  %v921_v54 = vld [vmem:[%s3845_s9 + $0x8] sm:$0xf] }
  0x18   : > { %v925_v55 = vld [vmem:[%s3846_s10 + $0x8] sm:$0xf]  ;;  %v926_v57 = vld [vmem:[%s3846_s10 + $0xc] sm:$0xf]  ;;  %v924_v58 = vld [vmem:[%s3846_s10 + $0x4] sm:$0xf] }
  0x19   : > { %v2828_v60 = vld [vmem:[%s3840_s4 + $0x28] sm:$0xff]  ;;  %v2831_v61 = vld [vmem:[%s3839_s3 + $0x60] sm:$0xff]  ;;  %v2837_v1 = vld [vmem:[%s3839_s3 + $0x90] sm:$0xff] }
  0x1a   : > { %v2832_v62 = vld [vmem:[%s3839_s3 + $0x68] sm:$0xff]  ;;  %v2833_v3 = vld [vmem:[%s3839_s3 + $0x70] sm:$0xff]  ;;  %v2827_v4 = vld [vmem:[%s3840_s4 + $0x20] sm:$0xff] }
  0x1b   : > { %v2839_v7 = vld [vmem:[%s3839_s3 + $0xa0] sm:$0xff]  ;;  %v2836_v10 = vld [vmem:[%s3839_s3 + $0x88] sm:$0xff]  ;;  %v2838_v12 = vld [vmem:[%s3839_s3 + $0x98] sm:$0xff] }
  0x1c   : > { %v2835_v9 = vld [vmem:[%s3839_s3 + $0x80] sm:$0xff]  ;;  %v2834_v15 = vld [vmem:[%s3839_s3 + $0x78] sm:$0xff]  ;;  %v2829_v16 = vld [vmem:[%s3840_s4 + $0x30] sm:$0xff] }
  0x1d   : > { %497 = vperm.xlu1 %2985, %v451_v20   ;;  %v2840_v22 = vld [vmem:[%s3839_s3 + $0xa8] sm:$0xff] }
  0x1e   : > { %521 = vperm.xlu2 %2986, %v2809_v23   ;;  %456 = vrot.lane.b32.xlu0 %v3173_v24, %s3061_s16  ;;  %v2830_v23 = vld [vmem:[%s3840_s4 + $0x38] sm:$0xff] }
  0x25   : > { %526 = vperm.xlu1 %2985, %v2810_v26  }
  0x26   : > { %460 = vrot.lane.b32.xlu2 %v3179_v27, %s3061_s16  ;;  %492 = vperm.xlu0 %2987, %v450_v28  }
  0x2d   : > { %502 = vperm.xlu1 %2985, %v452_v29  }
  0x2e   : > { %531 = vperm.xlu2 %2986, %v2811_v30   ;;  %483 = vperm.xlu0 %2987, %v465_v31  }
  0x35   : > { %549 = vrot.lane.b32.xlu1 %v3173_v24, %s3062_s15 }
  0x36   : > { %562 = vperm.xlu2 %2986, %v2813_v32   ;;  %547 = vrot.lane.b32.xlu0 %v3163_v18, %s3062_s15 }
  0x3d   : > { %507 = vperm.xlu1 %2985, %v453_v33  }
  0x3e   : > { %536 = vperm.xlu2 %2986, %v2812_v34   ;;  %567 = vperm.xlu0 %2987, %v2814_v35  }
  0x45   : > { %572 = vperm.xlu1 %2985, %v2815_v36  }
  0x46   : > { %553 = vrot.lane.b32.xlu2 %v3179_v27, %s3062_s15  ;;  %551 = vrot.lane.b32.xlu0 %v3161_v17, %s3062_s15  ;;  %s3066_s15 = smov 9  }
  0x4d   : > { %665 = vperm.xlu1 %2985, %v590_v37  }
  0x4e   : > { %674 = vperm.xlu2 %2986, %v591_v38   ;;  %577 = vperm.xlu0 %2987, %v2816_v39  }
  0x55   : > { %656 = vperm.xlu1 %2985, %v589_v40  }
  0x56   : > { %717 = vperm.xlu2 %2986, %v594_v41   ;;  %647 = vperm.xlu0 %2987, %v588_v42  }
  0x5d   : > { %699 = vperm.xlu1 %2985, %v592_v43  }
  0x5e   : > { %708 = vperm.xlu2 %2986, %v593_v44   ;;  %726 = vperm.xlu0 %2987, %v595_v45  }
  0x65   : > { %870 = vperm.xlu1 %2985, %v860_v46  }
  0x66   : > { %875 = vperm.xlu2 %2986, %v861_v47   ;;  %865 = vperm.xlu0 %2987, %v859_v48  }
  0x67   : > { %v479_v56 = vpop.permute.xlu2 %478 }
  0x6d   : > { %978 = vperm.xlu1 %2985, %v919_v49  }
  0x6e   : > { %987 = vperm.xlu2 %2986, %v920_v50   ;;  %880 = vperm.xlu0 %2987, %v862_v51  }
  0x70   : > { %v459_v63 = vpop.permute.xlu2 %458 }
  0x71   : > { %v488_v33 = vmul.f32 %v479_v56, %v459_v63 }
  0x75   : > { %1005 = vperm.xlu1 %2985, %v922_v52  }
  0x76   : > { %1030 = vperm.xlu2 %2986, %v923_v53   ;;  %996 = vperm.xlu0 %2987, %v921_v54  }
  0x78   : > { %v522_v6 = vpop.permute.xlu2 %521 }
  0x79   : > { %v539_v40 = vmul.f32 %v522_v6, %v3163_v18 }
  0x7d   : > { %1048 = vperm.xlu1 %2985, %v925_v55  }
  0x7e   : > { %1057 = vperm.xlu2 %2986, %v926_v57   ;;  %1039 = vperm.xlu0 %2987, %v924_v58  }
  0x7f   : > { %v469_v59 = vpop.permute.xlu1 %468 }
  0x80   : > { %v461_v13 = vpop.permute.xlu2 %460 }
  0x85   : > { %1249 = vperm.xlu1 %2985, %v2828_v60  }
  0x86   : > { %1220 = vperm.xlu2 %2986, %v2831_v61   ;;  %1225 = vperm.xlu0 %2987, %v2832_v62  }
  0x87   : > { %v474_v0 = vpop.permute.xlu1 %473 }
  0x88   : > { %v455_v2 = vpop.permute.xlu0 %454  ;;  %v532_v21 = vpop.permute.xlu2 %531 }
  0x89   : > { %v486_v32 = vmul.f32 %v469_v59, %v455_v2  ;;  %v541_v44 = vmul.f32 %v532_v21, %v3161_v17 }
  0x8d   : > { %1283 = vperm.xlu1 %2985, %v2837_v1  }
  0x8e   : > { %1230 = vperm.xlu2 %2986, %v2833_v3   ;;  %1244 = vperm.xlu0 %2987, %v2827_v4  }
  0x8f   : > { %v498_v5 = vpop.permute.xlu1 %497 }
  0x90   : > { %v457_v8 = vpop.permute.xlu0 %456  ;;  %v563_v28 = vpop.permute.xlu2 %562 }
  0x91   : > { %v487_v31 = vmul.f32 %v474_v0, %v457_v8 }
  0x93   : > { %v511_v37 = vadd.f32 %v498_v5, %v487_v31 }
  0x95   : > { %1314 = vperm.xlu1 %2985, %v2839_v7  }
  0x96   : > { %1273 = vperm.xlu2 %2986, %v2835_v9   ;;  %1278 = vperm.xlu0 %2987, %v2836_v10  }
  0x97   : > { %v527_v11 = vpop.permute.xlu1 %526 }
  0x98   : > { %v493_v14 = vpop.permute.xlu0 %492  ;;  %v540_v34 = vmul.f32 %v527_v11, %v3173_v24  ;;  %v537_v35 = vpop.permute.xlu2 %536 }
  0x99   : > { %v510_v36 = vadd.f32 %v493_v14, %v486_v32  ;;  %v542_v54 = vmul.f32 %v537_v35, %v3179_v27 }
  0x9a   : > { %v544_v45 = vadd.f32 %v540_v34, %v511_v37 }
  0x9b   : > { %v543_v47 = vadd.f32 %v539_v40, %v510_v36 }
  0x9d   : > { %1288 = vperm.xlu1 %2985, %v2838_v12  }
  0x9e   : > { %1235 = vperm.xlu2 %2986, %v2834_v15   ;;  %1254 = vperm.xlu0 %2987, %v2829_v16  }
  0x9f   : > { %v503_v19 = vpop.permute.xlu1 %502 }
  0xa0   : > { %v484_v20 = vpop.permute.xlu0 %483  ;;  %v512_v38 = vadd.f32 %v503_v19, %v488_v33  ;;  %v554_v56 = vpop.permute.xlu2 %553 }
  0xa1   : > { %v489_v49 = vmul.f32 %v484_v20, %v461_v13 }
  0xa2   : > { %v545_v48 = vadd.f32 %v541_v44, %v512_v38 }
  0xa6   : > { %1319 = vperm.xlu2 %2986, %v2840_v22   ;;  %1259 = vperm.xlu0 %2987, %v2830_v23  }
  0xa7   : > { %v550_v25 = vpop.permute.xlu1 %549 }
  0xa8   : > { %v548_v26 = vpop.permute.xlu0 %547 }
  0xa9   : > { %v580_v41 = vmul.f32 %v563_v28, %v548_v26  ;;  %v675_v26 = vpop.permute.xlu2 %674 }
  0xab   : > { %v3323_v51 = vadd.f32 %v580_v41, %v543_v47 }
  0xad   : > { %v606_v57 = vmul.f32 %v3323_v51, %v3323_v51 }
  0xaf   : > { %v508_v29 = vpop.permute.xlu1 %507 }
  0xb0   : > { %v568_v30 = vpop.permute.xlu0 %567  ;;  %v513_v52 = vadd.f32 %v508_v29, %v489_v49 }
  0xb1   : > { %v581_v39 = vmul.f32 %v568_v30, %v550_v25  ;;  %v3063_v30 = vmov 839922192   ;;  %v718_v33 = vpop.permute.xlu2 %717 }
  0xb2   : > { %v546_v59 = vadd.f32 %v542_v54, %v513_v52  ;;  %v651_v31 = vunpack.c.l.s4 %v3063_v30 }
  0xb3   : > { %v3321_v50 = vadd.f32 %v581_v39, %v544_v45 }
  0xb4   : > { %v3337_v37 = vunpack.c.0.s8 %v651_v31 }
  0xb5   : > { %v607_v55 = vmul.f32 %v3321_v50, %v3321_v50  ;;  %v596_v60 = vadd.f32 %v3321_v50, %v3323_v51 }
  0xb6   : > { %v680_v40 = vperm.slane %v675_v26, %v3337_v37 }
  0xb7   : > { %v573_v42 = vpop.permute.xlu1 %572  ;;  %v610_v63 = vadd.f32 %v607_v55, %v606_v57 }
  0xb8   : > { %v552_v43 = vpop.permute.xlu0 %551 }
  0xb9   : > { %v582_v46 = vmul.f32 %v573_v42, %v552_v43  ;;  %v709_v57 = vpop.permute.xlu2 %708 }
  0xbb   : > { %v3325_v53 = vadd.f32 %v582_v46, %v545_v48 }
  0xbd   : > { %v608_v61 = vmul.f32 %v3325_v53, %v3325_v53  ;;  %v597_v0 = vadd.f32 %v596_v60, %v3325_v53 }
  0xbf   : > { %v611_v2 = vadd.f32 %v610_v63, %v608_v61  ;;  %v666_v28 = vpop.permute.xlu1 %665 }
  0xc0   : > { %v578_v58 = vpop.permute.xlu0 %577  ;;  %v671_v46 = vperm.slane %v666_v28, %v3337_v37 }
  0xc1   : > { %v583_v62 = vmul.f32 %v578_v58, %v554_v56 }
  0xc3   : > { %v587_v1 = vadd.f32 %v583_v62, %v546_v59  ;;  %v688_v62 = vunpack.c.l.bf16 %v680_v40 }
  0xc5   : > { %v598_v3 = vadd.f32 %v597_v0, %v587_v1  ;;  %v609_v4 = vmul.f32 %v587_v1, %v587_v1 }
  0xc7   : > { %v599_v5 = vrot.slane %v598_v3, 4  ;;  %v612_v6 = vadd.f32 %v611_v2, %v609_v4  ;;  %v657_v35 = vpop.permute.xlu1 %656 }
  0xc8   : > { %v648_v36 = vpop.permute.xlu0 %647  ;;  %v662_v48 = vperm.slane %v657_v35, %v3337_v37 }
  0xc9   : > { %v600_v7 = vadd.f32 %v599_v5, %v598_v3  ;;  %v613_v8 = vrot.slane %v612_v6, 4  ;;  %v653_v49 = vperm.slane %v648_v36, %v3337_v37  ;;  %v723_v5 = vperm.slane %v718_v33, %v3337_v37 }
  0xca   : > { %v686_v63 = vunpack.c.l.bf16 %v662_v48 }
  0xcb   : > { %v601_v9 = vrot.slane %v600_v7, 2  ;;  %v614_v10 = vadd.f32 %v613_v8, %v612_v6  ;;  %v685_v0 = vunpack.c.l.bf16 %v653_v49  ;;  %v714_v6 = vperm.slane %v709_v57, %v3337_v37 }
  0xcd   : > { %v602_v11 = vadd.f32 %v601_v9, %v600_v7  ;;  %v615_v12 = vrot.slane %v614_v10, 2 }
  0xcf   : > { %v603_v13 = vrot.slane %v602_v11, 1  ;;  %v616_v14 = vadd.f32 %v615_v12, %v614_v10 }
  0xd0   : > { %v727_v61 = vpop.permute.xlu0 %726 }
  0xd1   : > { %v604_v15 = vadd.f32 %v603_v13, %v602_v11  ;;  %v617_v16 = vrot.slane %v616_v14, 1  ;;  %v732_v8 = vperm.slane %v727_v61, %v3337_v37 }
  0xd3   : > { %v605_v19 = vmul.f32 0.03125, %v604_v15  ;;  %v618_v20 = vadd.f32 %v617_v16, %v616_v14 }
  0xd5   : > { %v619_v21 = vmul.f32 0.03125, %v618_v20  ;;  %v620_v22 = vmul.f32 %v605_v19, %v605_v19  ;;  %v636_v42 = vsub.f32 %v587_v1, %v605_v19  ;;  %v634_v43 = vsub.f32 %v3321_v50, %v605_v19  ;;  %v700_v50 = vpop.permute.xlu1 %699 }
  0xd6   : > { %v635_v44 = vsub.f32 %v3325_v53, %v605_v19  ;;  %v633_v45 = vsub.f32 %v3323_v51, %v605_v19  ;;  %v687_v51 = vunpack.c.l.bf16 %v671_v46  ;;  %v705_v7 = vperm.slane %v700_v50, %v3337_v37 }
  0xd7   : > { %v621_v23 = vsub.f32 %v619_v21, %v620_v22  ;;  %v739_v19 = vunpack.c.l.bf16 %v723_v5  ;;  %v738_v20 = vunpack.c.l.bf16 %v714_v6  ;;  %v740_v22 = vunpack.c.l.bf16 %v732_v8 }
  0xd8   : > { %v737_v21 = vunpack.c.l.bf16 %v705_v7 }
  0xd9   : > { %v622_v25 = vadd.f32 1e-05, %v621_v23 }
  0xdb   : > { %2989 = vrsqrt.f32 %v622_v25  ;;  %vm629_vm1 = vweird.f32 %v622_v25 }
  0xe1   : > { %v2990_v29 = vpop.eup %2989 }
  0xe2   : > { %v624_v32 = vmul.f32 %v2990_v29, %v622_v25  ;;  %vm630_vm0 = vweird.f32 %v2990_v29 }
  0xe3   : > { %vm631_vm2 = vmor %vm629_vm1, %vm630_vm0 }
  0xe4   : > { %v625_v34 = vmul.f32 %v2990_v29, %v624_v32 }
  0xe6   : > { %v626_v38 = vmul.f32 0.5, %v625_v34 }
  0xe8   : > { %v627_v39 = vsub.f32 1.5, %v626_v38 }
  0xea   : > { %v628_v41 = vmul.f32 %v2990_v29, %v627_v39 }
  0xec   : > { %v632_v47 = vsel %vm631_vm2, %v2990_v29, %v628_v41 }
  0xed   : > { %v638_v52 = vmul.f32 %v634_v43, %v632_v47  ;;  %v639_v54 = vmul.f32 %v635_v44, %v632_v47  ;;  %v637_v55 = vmul.f32 %v633_v45, %v632_v47  ;;  %v640_v56 = vmul.f32 %v636_v42, %v632_v47 }
  0xef   : > { %v642_v58 = vpack.c.bf16 %v638_v52, %v638_v52  ;;  %v643_v59 = vpack.c.bf16 %v639_v54, %v639_v54  ;;  %v641_v60 = vpack.c.bf16 %v637_v55, %v637_v55  ;;  %v644_v53 = vpack.c.bf16 %v640_v56, %v640_v56 }
  0xf1   : > { %v682_v1 = vunpack.c.l.bf16 %v642_v58  ;;  %v683_v2 = vunpack.c.l.bf16 %v643_v59  ;;  %v681_v3 = vunpack.c.l.bf16 %v641_v60  ;;  %v684_v4 = vunpack.c.l.bf16 %v644_v53 }
  0xf3   : > { %v690_v9 = vmul.f32 %v686_v63, %v682_v1  ;;  %v689_v10 = vmul.f32 %v685_v0, %v681_v3  ;;  %v692_v11 = vmul.f32 %v688_v62, %v684_v4  ;;  %v691_v12 = vmul.f32 %v687_v51, %v683_v2 }
  0xf5   : > { %v694_v13 = vpack.c.bf16 %v690_v9, %v690_v9  ;;  %v693_v14 = vpack.c.bf16 %v689_v10, %v689_v10  ;;  %v696_v15 = vpack.c.bf16 %v692_v11, %v692_v11  ;;  %v695_v16 = vpack.c.bf16 %v691_v12, %v691_v12 }
  0xf7   : > { %v734_v23 = vunpack.c.l.bf16 %v694_v13  ;;  %v733_v25 = vunpack.c.l.bf16 %v693_v14  ;;  %v736_v26 = vunpack.c.l.bf16 %v696_v15  ;;  %v735_v28 = vunpack.c.l.bf16 %v695_v16 }
  0xf9   : > { %v742_v29 = vadd.f32 %v738_v20, %v734_v23  ;;  %v741_v30 = vadd.f32 %v737_v21, %v733_v25  ;;  %v744_v31 = vadd.f32 %v740_v22, %v736_v26  ;;  %v743_v32 = vadd.f32 %v739_v19, %v735_v28 }
  0xfb   : > { %v746_v33 = vpack.c.bf16 %v742_v29, %v742_v29  ;;  %v745_v34 = vpack.c.bf16 %v741_v30, %v741_v30  ;;  %v748_v35 = vpack.c.bf16 %v744_v31, %v744_v31  ;;  %v747_v36 = vpack.c.bf16 %v743_v32, %v743_v32 }
  0xfd   : > { %v3350_v38 = vunpack.c.l.bf16 %v746_v33  ;;  %v3352_v39 = vunpack.c.l.bf16 %v745_v34  ;;  %v3354_v40 = vunpack.c.l.bf16 %v748_v35  ;;  %v3356_v41 = vunpack.c.l.bf16 %v747_v36 }
  0xff   : > { %v754_v42 = vmul.f32 %v3350_v38, %v3350_v38  ;;  %v753_v43 = vmul.f32 %v3352_v39, %v3352_v39  ;;  %v756_v44 = vmul.f32 %v3354_v40, %v3354_v40  ;;  %v755_v45 = vmul.f32 %v3356_v41, %v3356_v41 }
 0x101   : > { %v758_v46 = vpack.c.bf16 %v754_v42, %v754_v42  ;;  %v757_v47 = vpack.c.bf16 %v753_v43, %v753_v43  ;;  %v760_v48 = vpack.c.bf16 %v756_v44, %v756_v44  ;;  %v759_v49 = vpack.c.bf16 %v755_v45, %v755_v45 }
 0x103   : > { %v762_v52 = vunpack.c.l.bf16 %v758_v46  ;;  %v761_v54 = vunpack.c.l.bf16 %v757_v47  ;;  %v764_v55 = vunpack.c.l.bf16 %v760_v48  ;;  %v763_v56 = vunpack.c.l.bf16 %v759_v49 }
 0x105   : > { %v766_v57 = vmul.f32 %v762_v52, %v3350_v38  ;;  %v765_v58 = vmul.f32 %v761_v54, %v3352_v39  ;;  %v768_v59 = vmul.f32 %v764_v55, %v3354_v40  ;;  %v767_v60 = vmul.f32 %v763_v56, %v3356_v41 }
 0x107   : > { %v770_v50 = vpack.c.bf16 %v766_v57, %v766_v57  ;;  %v769_v61 = vpack.c.bf16 %v765_v58, %v765_v58  ;;  %v772_v53 = vpack.c.bf16 %v768_v59, %v768_v59  ;;  %v771_v62 = vpack.c.bf16 %v767_v60, %v767_v60 }
 0x109   : > { %v774_v51 = vunpack.c.l.bf16 %v770_v50  ;;  %v773_v63 = vunpack.c.l.bf16 %v769_v61  ;;  %v776_v0 = vunpack.c.l.bf16 %v772_v53  ;;  %v775_v1 = vunpack.c.l.bf16 %v771_v62 }
 0x10b   : > { %v778_v2 = vmul.f32 0.044677734, %v774_v51  ;;  %v777_v3 = vmul.f32 0.044677734, %v773_v63  ;;  %v780_v4 = vmul.f32 0.044677734, %v776_v0  ;;  %v779_v5 = vmul.f32 0.044677734, %v775_v1 }
 0x10d   : > { %v781_v6 = vpack.c.bf16 %v777_v3, %v777_v3  ;;  %v784_v7 = vpack.c.bf16 %v780_v4, %v780_v4  ;;  %v783_v8 = vpack.c.bf16 %v779_v5, %v779_v5  ;;  %v782_v9 = vpack.c.bf16 %v778_v2, %v778_v2 }
 0x10f   : > { %v785_v10 = vunpack.c.l.bf16 %v781_v6  ;;  %v788_v11 = vunpack.c.l.bf16 %v784_v7  ;;  %v787_v12 = vunpack.c.l.bf16 %v783_v8  ;;  %v786_v13 = vunpack.c.l.bf16 %v782_v9 }
 0x111   : > { %v789_v14 = vadd.f32 %v785_v10, %v3352_v39  ;;  %v792_v15 = vadd.f32 %v788_v11, %v3354_v40  ;;  %v791_v16 = vadd.f32 %v787_v12, %v3356_v41  ;;  %v790_v19 = vadd.f32 %v786_v13, %v3350_v38 }
 0x113   : > { %v793_v20 = vpack.c.bf16 %v789_v14, %v789_v14  ;;  %v796_v21 = vpack.c.bf16 %v792_v15, %v792_v15  ;;  %v795_v22 = vpack.c.bf16 %v791_v16, %v791_v16  ;;  %v794_v23 = vpack.c.bf16 %v790_v19, %v790_v19 }
 0x115   : > { %v799_v25 = vunpack.c.l.bf16 %v795_v22  ;;  %v800_v26 = vunpack.c.l.bf16 %v796_v21  ;;  %v797_v28 = vunpack.c.l.bf16 %v793_v20  ;;  %v798_v29 = vunpack.c.l.bf16 %v794_v23 }
 0x117   : > { %v803_v30 = vmul.f32 0.796875, %v799_v25  ;;  %v804_v31 = vmul.f32 0.796875, %v800_v26  ;;  %v801_v32 = vmul.f32 0.796875, %v797_v28  ;;  %v802_v33 = vmul.f32 0.796875, %v798_v29  ;;  %v2932_v29 = vld [vmem:[%s3841_s5] sm:$0xff] }
 0x119   : > { %v807_v34 = vpack.c.bf16 %v803_v30, %v803_v30  ;;  %v808_v35 = vpack.c.bf16 %v804_v31, %v804_v31  ;;  %v805_v36 = vpack.c.bf16 %v801_v32, %v801_v32  ;;  %v806_v42 = vpack.c.bf16 %v802_v33, %v802_v33  ;;  %v871_v31 = vpop.permute.xlu1 %870 }
 0x11b   : > { %v811_v43 = vunpack.c.l.bf16 %v807_v34  ;;  %v812_v44 = vunpack.c.l.bf16 %v808_v35  ;;  %v809_v45 = vunpack.c.l.bf16 %v805_v36  ;;  %v810_v46 = vunpack.c.l.bf16 %v806_v42  ;;  %v876_v34 = vpop.permute.xlu2 %875 }
 0x11d   : > { %2991 = vtanh.f32 %v811_v43 }
 0x11e   : > { %2993 = vtanh.f32 %v812_v44 }
 0x11f   : > { %2995 = vtanh.f32 %v809_v45 }
 0x120   : > { %2997 = vtanh.f32 %v810_v46 }
 0x123   : > { %v2992_v47 = vpop.eup %2991 }
 0x124   : > { %v2994_v48 = vpop.eup %2993  ;;  %v819_v49 = vpack.c.bf16 %v2992_v47, %v2992_v47 }
 0x125   : > { %v2996_v52 = vpop.eup %2995  ;;  %v820_v54 = vpack.c.bf16 %v2994_v48, %v2994_v48 }
 0x126   : > { %v2998_v55 = vpop.eup %2997  ;;  %v823_v56 = vunpack.c.l.bf16 %v819_v49  ;;  %v817_v57 = vpack.c.bf16 %v2996_v52, %v2996_v52 }
 0x127   : > { %v824_v58 = vunpack.c.l.bf16 %v820_v54  ;;  %v818_v59 = vpack.c.bf16 %v2998_v55, %v2998_v55 }
 0x128   : > { %v827_v60 = vadd.f32 1.0, %v823_v56  ;;  %v821_v50 = vunpack.c.l.bf16 %v817_v57 }
 0x129   : > { %v828_v61 = vadd.f32 1.0, %v824_v58  ;;  %v822_v53 = vunpack.c.l.bf16 %v818_v59 }
 0x12a   : > { %v831_v62 = vpack.c.bf16 %v827_v60, %v827_v60  ;;  %v825_v51 = vadd.f32 1.0, %v821_v50 }
 0x12b   : > { %v832_v63 = vpack.c.bf16 %v828_v61, %v828_v61  ;;  %v826_v0 = vadd.f32 1.0, %v822_v53 }
 0x12c   : > { %v835_v1 = vunpack.c.l.bf16 %v831_v62  ;;  %v829_v2 = vpack.c.bf16 %v825_v51, %v825_v51 }
 0x12d   : > { %v836_v3 = vunpack.c.l.bf16 %v832_v63  ;;  %v830_v4 = vpack.c.bf16 %v826_v0, %v826_v0 }
 0x12e   : > { %v839_v5 = vmul.f32 0.5, %v835_v1  ;;  %v833_v6 = vunpack.c.l.bf16 %v829_v2 }
 0x12f   : > { %v840_v7 = vmul.f32 0.5, %v836_v3  ;;  %v834_v8 = vunpack.c.l.bf16 %v830_v4 }
 0x130   : > { %v843_v9 = vpack.c.bf16 %v839_v5, %v839_v5  ;;  %v837_v10 = vmul.f32 0.5, %v833_v6 }
 0x131   : > { %v844_v11 = vpack.c.bf16 %v840_v7, %v840_v7  ;;  %v838_v12 = vmul.f32 0.5, %v834_v8  ;;  %v988_v7 = vpop.permute.xlu2 %987  ;;  %v979_v8 = vpop.permute.xlu1 %978 }
 0x132   : > { %v847_v13 = vunpack.c.l.bf16 %v843_v9  ;;  %v841_v14 = vpack.c.bf16 %v837_v10, %v837_v10 }
 0x133   : > { %v848_v15 = vunpack.c.l.bf16 %v844_v11  ;;  %v842_v16 = vpack.c.bf16 %v838_v12, %v838_v12 }
 0x134   : > { %v851_v19 = vmul.f32 %v847_v13, %v3356_v41  ;;  %v845_v20 = vunpack.c.l.bf16 %v841_v14  ;;  %v2933_v41 = vld [vmem:[%s3841_s5 + $0x8] sm:$0xff] }
 0x135   : > { %v852_v21 = vmul.f32 %v848_v15, %v3354_v40  ;;  %v846_v22 = vunpack.c.l.bf16 %v842_v16 }
 0x136   : > { %v849_v25 = vmul.f32 %v845_v20, %v3352_v39 }
 0x137   : > { %v854_v23 = vpack.c.bf16 %v852_v21, %v851_v19  ;;  %v850_v26 = vmul.f32 %v846_v22, %v3350_v38  ;;  %v866_v38 = vpop.permute.xlu0 %865  ;;  %v993_v19 = vperm.slane %v988_v7, %v3337_v37 }
 0x139   : > { %906 = vmatpush.bf16.msra.mxu0 %v854_v23  ;;  %2967 = vmatpush.bf16.msra.mxu3 %v854_v23  ;;  %v853_v28 = vpack.c.bf16 %v850_v26, %v849_v25  ;;  %v1031_v11 = vpop.permute.xlu2 %1030  ;;  %v1006_v13 = vpop.permute.xlu1 %1005  ;;  %v984_v26 = vperm.slane %v979_v8, %v3337_v37 }
 0x13d   : > { %907 = vmatpush.bf16.msra.mxu0 %v853_v28  ;;  %2968 = vmatpush.bf16.msra.mxu3 %v853_v28  ;;  %v1011_v28 = vperm.slane %v1006_v13, %v3337_v37 }
 0x13f   : > { %v881_v45 = vpop.permute.xlu0 %880 }
 0x140   : > { %2825 = vmatmul.msk.bf16.vlgmr.msra.gmra.mxu0 %vm893_vm3, %v2932_v29  ;;  %2826 = vmatmul.msk.bf16.vlgmr.msra.gmra.mxu3 %vm893_vm3, %v2933_v41 }
 0x147   : > { %v997_v14 = vpop.permute.xlu0 %996 }
 0x148   : > { %v1002_v29 = vperm.slane %v997_v14, %v3337_v37 }
 0x1bd   : > { %v909_v39 = vpop.f32.mrf.mxu0 }
 0x1be   : > { %v910_v30 = vadd.f32 %v909_v39, %v866_v38 }
 0x1c0   : > { %v937_v35 = vmul.f32 %v910_v30, %v910_v30 }
 0x1c3   : > { %v914_v40 = vpop.f32.mrf.mxu3 }
 0x1c4   : > { %v915_v36 = vadd.f32 %v914_v40, %v876_v34  ;;  %v1049_v34 = vpop.permute.xlu1 %1048 }
 0x1c5   : > { %v911_v32 = vpop.f32.mrf.mxu0 }
 0x1c6   : > { %v912_v33 = vadd.f32 %v911_v32, %v871_v31  ;;  %v939_v47 = vmul.f32 %v915_v36, %v915_v36  ;;  %v1058_v32 = vpop.permute.xlu2 %1057 }
 0x1c8   : > { %v927_v42 = vadd.f32 %v912_v33, %v910_v30  ;;  %v938_v43 = vmul.f32 %v912_v33, %v912_v33 }
 0x1ca   : > { %v941_v44 = vadd.f32 %v938_v43, %v937_v35  ;;  %v928_v49 = vadd.f32 %v927_v42, %v915_v36  ;;  %v1040_v35 = vpop.permute.xlu0 %1039 }
 0x1cb   : > { %v916_v46 = vpop.f32.mrf.mxu3 }
 0x1cc   : > { %v917_v48 = vadd.f32 %v916_v46, %v881_v45  ;;  %v942_v55 = vadd.f32 %v941_v44, %v939_v47  ;;  %v1016_v44 = vunpack.c.l.bf16 %v984_v26  ;;  %v1019_v45 = vunpack.c.l.bf16 %v1011_v28 }
 0x1cd   : > { %v1018_v46 = vunpack.c.l.bf16 %v1002_v29 }
 0x1ce   : > { %v929_v52 = vadd.f32 %v928_v49, %v917_v48  ;;  %v940_v54 = vmul.f32 %v917_v48, %v917_v48 }
 0x1d0   : > { %v930_v56 = vrot.slane %v929_v52, 4  ;;  %v943_v57 = vadd.f32 %v942_v55, %v940_v54  ;;  %v1036_v54 = vperm.slane %v1031_v11, %v3337_v37  ;;  %v1063_v55 = vperm.slane %v1058_v32, %v3337_v37 }
 0x1d2   : > { %v931_v58 = vadd.f32 %v930_v56, %v929_v52  ;;  %v944_v59 = vrot.slane %v943_v57, 4  ;;  %v1054_v56 = vperm.slane %v1049_v34, %v3337_v37 }
 0x1d4   : > { %v932_v60 = vrot.slane %v931_v58, 2  ;;  %v945_v50 = vadd.f32 %v944_v59, %v943_v57  ;;  %v1045_v57 = vperm.slane %v1040_v35, %v3337_v37 }
 0x1d6   : > { %v933_v61 = vadd.f32 %v932_v60, %v931_v58  ;;  %v946_v53 = vrot.slane %v945_v50, 2 }
 0x1d8   : > { %v934_v62 = vrot.slane %v933_v61, 1  ;;  %v947_v51 = vadd.f32 %v946_v53, %v945_v50 }
 0x1da   : > { %v935_v63 = vadd.f32 %v934_v62, %v933_v61  ;;  %v948_v0 = vrot.slane %v947_v51, 1 }
 0x1dc   : > { %v936_v1 = vmul.f32 0.03125, %v935_v63  ;;  %v949_v2 = vadd.f32 %v948_v0, %v947_v51  ;;  %v1068_v63 = vunpack.c.l.bf16 %v1036_v54  ;;  %v1071_v0 = vunpack.c.l.bf16 %v1063_v55 }
 0x1de   : > { %v950_v3 = vmul.f32 0.03125, %v949_v2  ;;  %v951_v4 = vmul.f32 %v936_v1, %v936_v1  ;;  %v964_v21 = vsub.f32 %v910_v30, %v936_v1  ;;  %v965_v22 = vsub.f32 %v912_v33, %v936_v1 }
 0x1df   : > { %v966_v23 = vsub.f32 %v915_v36, %v936_v1  ;;  %v967_v25 = vsub.f32 %v917_v48, %v936_v1  ;;  %v1017_v36 = vunpack.c.l.bf16 %v993_v19  ;;  %v1070_v1 = vunpack.c.l.bf16 %v1054_v56 }
 0x1e0   : > { %v952_v5 = vsub.f32 %v950_v3, %v951_v4  ;;  %v1069_v2 = vunpack.c.l.bf16 %v1045_v57 }
 0x1e2   : > { %v953_v6 = vadd.f32 1e-05, %v952_v5 }
 0x1e4   : > { %2999 = vrsqrt.f32 %v953_v6  ;;  %vm960_vm5 = vweird.f32 %v953_v6 }
 0x1ea   : > { %v3000_v9 = vpop.eup %2999 }
 0x1eb   : > { %v955_v10 = vmul.f32 %v3000_v9, %v953_v6  ;;  %vm961_vm4 = vweird.f32 %v3000_v9 }
 0x1ec   : > { %vm962_vm6 = vmor %vm960_vm5, %vm961_vm4 }
 0x1ed   : > { %v956_v12 = vmul.f32 %v3000_v9, %v955_v10 }
 0x1ef   : > { %v957_v15 = vmul.f32 0.5, %v956_v12 }
 0x1f1   : > { %v958_v16 = vsub.f32 1.5, %v957_v15 }
 0x1f3   : > { %v959_v20 = vmul.f32 %v3000_v9, %v958_v16 }
 0x1f5   : > { %v963_v41 = vsel %vm962_vm6, %v3000_v9, %v959_v20 }
 0x1f6   : > { %v968_v39 = vmul.f32 %v964_v21, %v963_v41  ;;  %v969_v38 = vmul.f32 %v965_v22, %v963_v41  ;;  %v970_v40 = vmul.f32 %v966_v23, %v963_v41  ;;  %v971_v31 = vmul.f32 %v967_v25, %v963_v41 }
 0x1f8   : > { %v972_v42 = vpack.c.bf16 %v968_v39, %v968_v39  ;;  %v973_v43 = vpack.c.bf16 %v969_v38, %v969_v38  ;;  %v974_v30 = vpack.c.bf16 %v970_v40, %v970_v40  ;;  %v975_v33 = vpack.c.bf16 %v971_v31, %v971_v31 }
 0x1fa   : > { %v1012_v47 = vunpack.c.l.bf16 %v972_v42  ;;  %v1013_v48 = vunpack.c.l.bf16 %v973_v43  ;;  %v1014_v49 = vunpack.c.l.bf16 %v974_v30  ;;  %v1015_v52 = vunpack.c.l.bf16 %v975_v33 }
 0x1fc   : > { %v1020_v58 = vmul.f32 %v1016_v44, %v1012_v47  ;;  %v1021_v59 = vmul.f32 %v1017_v36, %v1013_v48  ;;  %v1022_v60 = vmul.f32 %v1018_v46, %v1014_v49  ;;  %v1023_v50 = vmul.f32 %v1019_v45, %v1015_v52 }
 0x1fe   : > { %v1024_v61 = vpack.c.bf16 %v1020_v58, %v1020_v58  ;;  %v1025_v53 = vpack.c.bf16 %v1021_v59, %v1021_v59  ;;  %v1026_v62 = vpack.c.bf16 %v1022_v60, %v1022_v60  ;;  %v1027_v51 = vpack.c.bf16 %v1023_v50, %v1023_v50 }
 0x200   : > { %v1064_v3 = vunpack.c.l.bf16 %v1024_v61  ;;  %v1065_v4 = vunpack.c.l.bf16 %v1025_v53  ;;  %v1066_v5 = vunpack.c.l.bf16 %v1026_v62  ;;  %v1067_v6 = vunpack.c.l.bf16 %v1027_v51 }
 0x202   : > { %v1072_v7 = vadd.f32 %v1068_v63, %v1064_v3  ;;  %v1073_v8 = vadd.f32 %v1069_v2, %v1065_v4  ;;  %v1074_v9 = vadd.f32 %v1070_v1, %v1066_v5  ;;  %v1075_v10 = vadd.f32 %v1071_v0, %v1067_v6 }
 0x204   : > { %v1079_v11 = vpack.c.bf16 %v1075_v10, %v1075_v10  ;;  %v1077_v12 = vpack.c.bf16 %v1073_v8, %v1073_v8  ;;  %v1076_v13 = vpack.c.bf16 %v1072_v7, %v1072_v7  ;;  %v1078_v14 = vpack.c.bf16 %v1074_v9, %v1074_v9 }
 0x206   : > { %v3394_v15 = vunpack.c.l.bf16 %v1079_v11  ;;  %v3396_v16 = vunpack.c.l.bf16 %v1077_v12  ;;  %v3398_v19 = vunpack.c.l.bf16 %v1076_v13  ;;  %v3400_v20 = vunpack.c.l.bf16 %v1078_v14 }
 0x208   : > { %v1087_v21 = vmul.f32 %v3394_v15, %v3394_v15  ;;  %v1085_v22 = vmul.f32 %v3396_v16, %v3396_v16  ;;  %v1084_v23 = vmul.f32 %v3398_v19, %v3398_v19  ;;  %v1086_v25 = vmul.f32 %v3400_v20, %v3400_v20 }
 0x20a   : > { %v1091_v26 = vpack.c.bf16 %v1087_v21, %v1087_v21  ;;  %v1089_v28 = vpack.c.bf16 %v1085_v22, %v1085_v22  ;;  %v1088_v29 = vpack.c.bf16 %v1084_v23, %v1084_v23  ;;  %v1090_v41 = vpack.c.bf16 %v1086_v25, %v1086_v25 }
 0x20c   : > { %v1095_v39 = vunpack.c.l.bf16 %v1091_v26  ;;  %v1093_v38 = vunpack.c.l.bf16 %v1089_v28  ;;  %v1092_v40 = vunpack.c.l.bf16 %v1088_v29  ;;  %v1094_v31 = vunpack.c.l.bf16 %v1090_v41 }
 0x20e   : > { %v1099_v32 = vmul.f32 %v1095_v39, %v3394_v15  ;;  %v1097_v34 = vmul.f32 %v1093_v38, %v3396_v16  ;;  %v1096_v35 = vmul.f32 %v1092_v40, %v3398_v19  ;;  %v1098_v42 = vmul.f32 %v1094_v31, %v3400_v20 }
 0x210   : > { %v1103_v43 = vpack.c.bf16 %v1099_v32, %v1099_v32  ;;  %v1101_v30 = vpack.c.bf16 %v1097_v34, %v1097_v34  ;;  %v1100_v33 = vpack.c.bf16 %v1096_v35, %v1096_v35  ;;  %v1102_v36 = vpack.c.bf16 %v1098_v42, %v1098_v42 }
 0x212   : > { %v1107_v44 = vunpack.c.l.bf16 %v1103_v43  ;;  %v1105_v45 = vunpack.c.l.bf16 %v1101_v30  ;;  %v1104_v46 = vunpack.c.l.bf16 %v1100_v33  ;;  %v1106_v47 = vunpack.c.l.bf16 %v1102_v36 }
 0x214   : > { %v1111_v48 = vmul.f32 0.044677734, %v1107_v44  ;;  %v1109_v49 = vmul.f32 0.044677734, %v1105_v45  ;;  %v1108_v52 = vmul.f32 0.044677734, %v1104_v46  ;;  %v1110_v54 = vmul.f32 0.044677734, %v1106_v47 }
 0x216   : > { %v1115_v55 = vpack.c.bf16 %v1111_v48, %v1111_v48  ;;  %v1113_v56 = vpack.c.bf16 %v1109_v49, %v1109_v49  ;;  %v1112_v57 = vpack.c.bf16 %v1108_v52, %v1108_v52  ;;  %v1114_v58 = vpack.c.bf16 %v1110_v54, %v1110_v54 }
 0x218   : > { %v1119_v59 = vunpack.c.l.bf16 %v1115_v55  ;;  %v1117_v60 = vunpack.c.l.bf16 %v1113_v56  ;;  %v1116_v50 = vunpack.c.l.bf16 %v1112_v57  ;;  %v1118_v61 = vunpack.c.l.bf16 %v1114_v58 }
 0x21a   : > { %v1123_v53 = vadd.f32 %v1119_v59, %v3394_v15  ;;  %v1121_v62 = vadd.f32 %v1117_v60, %v3396_v16  ;;  %v1120_v51 = vadd.f32 %v1116_v50, %v3398_v19  ;;  %v1122_v63 = vadd.f32 %v1118_v61, %v3400_v20 }
 0x21c   : > { %v1125_v0 = vpack.c.bf16 %v1121_v62, %v1121_v62  ;;  %v1124_v1 = vpack.c.bf16 %v1120_v51, %v1120_v51  ;;  %v1126_v2 = vpack.c.bf16 %v1122_v63, %v1122_v63  ;;  %v1127_v3 = vpack.c.bf16 %v1123_v53, %v1123_v53 }
 0x21e   : > { %v1129_v4 = vunpack.c.l.bf16 %v1125_v0  ;;  %v1128_v5 = vunpack.c.l.bf16 %v1124_v1  ;;  %v1130_v6 = vunpack.c.l.bf16 %v1126_v2  ;;  %v1131_v7 = vunpack.c.l.bf16 %v1127_v3 }
 0x220   : > { %v1133_v8 = vmul.f32 0.796875, %v1129_v4  ;;  %v1132_v9 = vmul.f32 0.796875, %v1128_v5  ;;  %v1134_v10 = vmul.f32 0.796875, %v1130_v6  ;;  %v1135_v11 = vmul.f32 0.796875, %v1131_v7 }
 0x222   : > { %v1137_v12 = vpack.c.bf16 %v1133_v8, %v1133_v8  ;;  %v1136_v13 = vpack.c.bf16 %v1132_v9, %v1132_v9  ;;  %v1138_v14 = vpack.c.bf16 %v1134_v10, %v1134_v10  ;;  %v1139_v21 = vpack.c.bf16 %v1135_v11, %v1135_v11  ;;  %v3049_v11 = vld [vmem:[%s3147_s26] ss:$0 sm:$0xff] }
 0x224   : > { %v1141_v22 = vunpack.c.l.bf16 %v1137_v12  ;;  %v1140_v23 = vunpack.c.l.bf16 %v1136_v13  ;;  %v1142_v25 = vunpack.c.l.bf16 %v1138_v14  ;;  %v1143_v26 = vunpack.c.l.bf16 %v1139_v21 }
 0x226   : > { %3001 = vtanh.f32 %v1141_v22  ;;  %v2842_v22 = vld [vmem:[%s3839_s3 + $0xb8] sm:$0xff] }
 0x227   : > { %3003 = vtanh.f32 %v1140_v23  ;;  %v2843_v23 = vld [vmem:[%s3843_s7 + $0x10] sm:$0xf] }
 0x228   : > { %3005 = vtanh.f32 %v1142_v25  ;;  %v2846_v25 = vld [vmem:[%s3843_s7 + $0x1c] sm:$0xf] }
 0x229   : > { %3007 = vtanh.f32 %v1143_v26  ;;  %v2850_v26 = vld [vmem:[%s3844_s8 + $0x1c] sm:$0xf] }
 0x22c   : > { %v3002_v28 = vpop.eup %3001 }
 0x22d   : > { %v3004_v29 = vpop.eup %3003  ;;  %v1149_v41 = vpack.c.bf16 %v3002_v28, %v3002_v28  ;;  %v2844_v28 = vld [vmem:[%s3843_s7 + $0x14] sm:$0xf] }
 0x22e   : > { %v3006_v39 = vpop.eup %3005  ;;  %v1148_v38 = vpack.c.bf16 %v3004_v29, %v3004_v29  ;;  %v2849_v29 = vld [vmem:[%s3844_s8 + $0x18] sm:$0xf] }
 0x22f   : > { %v3008_v40 = vpop.eup %3007  ;;  %v1153_v31 = vunpack.c.l.bf16 %v1149_v41  ;;  %v1150_v32 = vpack.c.bf16 %v3006_v39, %v3006_v39  ;;  %v2855_v41 = vld [vmem:[%s3842_s6 + $0x20] sm:$0xff]  ;;  %v2847_v39 = vld [vmem:[%s3844_s8 + $0x10] sm:$0xf] }
 0x230   : > { %v1152_v34 = vunpack.c.l.bf16 %v1148_v38  ;;  %v1151_v35 = vpack.c.bf16 %v3008_v40, %v3008_v40  ;;  %v2848_v38 = vld [vmem:[%s3844_s8 + $0x14] sm:$0xf]  ;;  %v2858_v40 = vld [vmem:[%s3842_s6 + $0x38] sm:$0xff] }
 0x231   : > { %v1157_v42 = vadd.f32 1.0, %v1153_v31  ;;  %v1154_v43 = vunpack.c.l.bf16 %v1150_v32  ;;  %v2856_v31 = vld [vmem:[%s3842_s6 + $0x28] sm:$0xff]  ;;  %v2857_v32 = vld [vmem:[%s3842_s6 + $0x30] sm:$0xff] }
 0x232   : > { %v1156_v30 = vadd.f32 1.0, %v1152_v34  ;;  %v1155_v33 = vunpack.c.l.bf16 %v1151_v35  ;;  %v2871_v34 = vld [vmem:[%s3845_s9 + $0x18] sm:$0xf]  ;;  %v2869_v35 = vld [vmem:[%s3845_s9 + $0x10] sm:$0xf] }
 0x233   : > { %v1161_v36 = vpack.c.bf16 %v1157_v42, %v1157_v42  ;;  %v1158_v44 = vadd.f32 1.0, %v1154_v43  ;;  %v2870_v42 = vld [vmem:[%s3845_s9 + $0x14] sm:$0xf] }
 0x234   : > { %v1160_v45 = vpack.c.bf16 %v1156_v30, %v1156_v30  ;;  %v1159_v46 = vadd.f32 1.0, %v1155_v33  ;;  %v2874_v43 = vld [vmem:[%s3846_s10 + $0x14] sm:$0xf]  ;;  %v2872_v30 = vld [vmem:[%s3845_s9 + $0x1c] sm:$0xf]  ;;  %v1226_v33 = vpop.permute.xlu0 %1225 }
 0x235   : > { %v1165_v47 = vunpack.c.l.bf16 %v1161_v36  ;;  %v1162_v48 = vpack.c.bf16 %v1158_v44, %v1158_v44  ;;  %v2873_v36 = vld [vmem:[%s3846_s10 + $0x10] sm:$0xf]  ;;  %v1221_v44 = vpop.permute.xlu2 %1220 }
 0x236   : > { %v1164_v49 = vunpack.c.l.bf16 %v1160_v45  ;;  %v1163_v52 = vpack.c.bf16 %v1159_v46, %v1159_v46  ;;  %v2882_v45 = vld [vmem:[%s3839_s3 + $0xc8] sm:$0xff]  ;;  %v2875_v46 = vld [vmem:[%s3846_s10 + $0x18] sm:$0xf] }
 0x237   : > { %v1169_v54 = vmul.f32 0.5, %v1165_v47  ;;  %v1166_v55 = vunpack.c.l.bf16 %v1162_v48  ;;  %v1250_v47 = vpop.permute.xlu1 %1249 }
 0x238   : > { %v1168_v56 = vmul.f32 0.5, %v1164_v49  ;;  %v1167_v57 = vunpack.c.l.bf16 %v1163_v52  ;;  %v2876_v49 = vld [vmem:[%s3846_s10 + $0x1c] sm:$0xf]  ;;  %v2877_v52 = vld [vmem:[%s3840_s4 + $0x40] sm:$0xff] }
 0x239   : > { %v1173_v58 = vpack.c.bf16 %v1169_v54, %v1169_v54  ;;  %v1170_v59 = vmul.f32 0.5, %v1166_v55  ;;  %v2878_v54 = vld [vmem:[%s3840_s4 + $0x48] sm:$0xff] }
 0x23a   : > { %v1172_v60 = vpack.c.bf16 %v1168_v56, %v1168_v56  ;;  %v1171_v50 = vmul.f32 0.5, %v1167_v57  ;;  %v2881_v56 = vld [vmem:[%s3839_s3 + $0xc0] sm:$0xff] }
 0x23b   : > { %v1177_v61 = vunpack.c.l.bf16 %v1173_v58  ;;  %v1174_v53 = vpack.c.bf16 %v1170_v59, %v1170_v59  ;;  %v2886_v58 = vld [vmem:[%s3839_s3 + $0xe8] sm:$0xff]  ;;  %v2887_v59 = vld [vmem:[%s3839_s3 + $0xf0] sm:$0xff] }
 0x23c   : > { %v1176_v62 = vunpack.c.l.bf16 %v1172_v60  ;;  %v1175_v0 = vpack.c.bf16 %v1171_v50, %v1171_v50  ;;  %v1245_v48 = vpop.permute.xlu0 %1244 }
 0x23d   : > { %v1181_v51 = vmul.f32 %v1177_v61, %v3396_v16  ;;  %v1178_v63 = vunpack.c.l.bf16 %v1174_v53  ;;  %v1231_v55 = vpop.permute.xlu2 %1230  ;;  %v2883_v61 = vld [vmem:[%s3839_s3 + $0xd0] sm:$0xff] }
 0x23e   : > { %v1180_v1 = vmul.f32 %v1176_v62, %v3398_v19  ;;  %v1179_v7 = vunpack.c.l.bf16 %v1175_v0  ;;  %v2879_v53 = vld [vmem:[%s3840_s4 + $0x50] sm:$0xff]  ;;  %v2889_v62 = vld [vmem:[%s3839_s3 + $0x100] sm:$0xff] }
 0x23f   : > { %v1185_v2 = vpack.c.bf16 %v1181_v51, %v1181_v51  ;;  %v1182_v3 = vmul.f32 %v1178_v63, %v3400_v20  ;;  %v1284_v57 = vpop.permute.xlu1 %1283 }
 0x240   : > { %v1184_v4 = vpack.c.bf16 %v1180_v1, %v1180_v1  ;;  %v1183_v13 = vmul.f32 %v1179_v7, %v3394_v15  ;;  %v2885_v1 = vld [vmem:[%s3839_s3 + $0xe0] sm:$0xff] }
 0x241   : > { %v1189_v5 = vunpack.c.l.bf16 %v1185_v2  ;;  %v1186_v6 = vpack.c.bf16 %v1182_v3, %v1182_v3  ;;  %v2880_v2 = vld [vmem:[%s3840_s4 + $0x58] sm:$0xff] }
 0x242   : > { %v1188_v8 = vunpack.c.l.bf16 %v1184_v4  ;;  %v1187_v19 = vpack.c.bf16 %v1183_v13, %v1183_v13  ;;  %v2888_v3 = vld [vmem:[%s3839_s3 + $0xf8] sm:$0xff] }
 0x243   : > { %v1193_v9 = vadd.f32 %v1189_v5, %v3173_v24  ;;  %v1190_v16 = vunpack.c.l.bf16 %v1186_v6  ;;  %v2884_v6 = vld [vmem:[%s3839_s3 + $0xd8] sm:$0xff] }
 0x244   : > { %v1192_v10 = vadd.f32 %v1188_v8, %v3163_v18  ;;  %v1191_v20 = vunpack.c.l.bf16 %v1187_v19  ;;  %v1279_v60 = vpop.permute.xlu0 %1278 }
 0x245   : > { %v3424_v12 = vmul.f32 %v3049_v11, %v1193_v9  ;;  %v1194_v24 = vadd.f32 %v1190_v16, %v3161_v17  ;;  %v2841_v17 = vld [vmem:[%s3839_s3 + $0xb0] sm:$0xff]  ;;  %v1274_v50 = vpop.permute.xlu2 %1273 }
 0x246   : > { %v3427_v14 = vmul.f32 %v3049_v11, %v1192_v10  ;;  %v1195_v15 = vadd.f32 %v1191_v20, %v3179_v27  ;;  %v2845_v27 = vld [vmem:[%s3843_s7 + $0x18] sm:$0xf]  ;;  %v2890_v10 = vld [vmem:[%s3839_s3 + $0x108] sm:$0xff] }
 0x247   : > { %1207 = vrot.lane.b32.xlu1 %v3424_v12, %s3064_s21  ;;  %v3433_v18 = vmul.f32 %v3049_v11, %v1194_v24  ;;  %v1315_v51 = vpop.permute.xlu1 %1314 }
 0x248   : > { %1299 = vrot.lane.b32.xlu2 %v3427_v14, %s3065_s22  ;;  %1205 = vrot.lane.b32.xlu0 %v3427_v14, %s3064_s21  ;;  %v3439_v21 = vmul.f32 %v3049_v11, %v1195_v15 }
 0x24c   : > { %v1255_v63 = vpop.permute.xlu0 %1254 }
 0x24d   : > { %v1236_v0 = vpop.permute.xlu2 %1235 }
 0x24f   : > { %1209 = vrot.lane.b32.xlu1 %v3433_v18, %s3064_s21  ;;  %v1289_v4 = vpop.permute.xlu1 %1288 }
 0x250   : > { %1303 = vrot.lane.b32.xlu2 %v3433_v18, %s3065_s22  ;;  %1301 = vrot.lane.b32.xlu0 %v3424_v12, %s3065_s22 }
 0x254   : > { %v1260_v5 = vpop.permute.xlu0 %1259 }
 0x255   : > { %v1320_v7 = vpop.permute.xlu2 %1319 }
 0x257   : > { %1211 = vrot.lane.b32.xlu1 %v3439_v21, %s3064_s21 }
 0x258   : > { %1329 = vperm.xlu2 %2986, %v2842_v22   ;;  %1324 = vperm.xlu0 %2987, %v2841_v17  }
 0x25f   : > { %1305 = vrot.lane.b32.xlu1 %v3439_v21, %s3065_s22  ;;  %s420_s22 = scalar_lea.vmem %s3847_s11, %s3142_s23 }
 0x260   : > { %1401 = vperm.xlu2 %2986, %v2843_v23   ;;  %1419 = vperm.xlu0 %2987, %v2845_v27   ;;  %v1291_v23 = vmul.f32 %v1274_v50, %v3427_v14 }
 0x267   : > { %1428 = vperm.xlu1 %2985, %v2846_v25   ;;  %v1292_v25 = vmul.f32 %v1279_v60, %v3424_v12 }
 0x268   : > { %1480 = vperm.xlu2 %2986, %v2850_v26   ;;  %1410 = vperm.xlu0 %2987, %v2844_v28  }
 0x26f   : > { %1471 = vperm.xlu1 %2985, %v2849_v29  }
 0x270   : > { %1621 = vperm.xlu2 %2986, %v2855_v41   ;;  %1453 = vperm.xlu0 %2987, %v2847_v39  }
 0x277   : > { %1462 = vperm.xlu1 %2985, %v2848_v38   ;;  %v1293_v38 = vmul.f32 %v1284_v57, %v3433_v18 }
 0x278   : > { %1636 = vperm.xlu2 %2986, %v2858_v40   ;;  %1626 = vperm.xlu0 %2987, %v2856_v31  }
 0x27f   : > { %1631 = vperm.xlu1 %2985, %v2857_v32  }
 0x280   : > { %1753 = vperm.xlu2 %2986, %v2871_v34   ;;  %1735 = vperm.xlu0 %2987, %v2869_v35  }
 0x287   : > { %1744 = vperm.xlu1 %2985, %v2870_v42  }
 0x288   : > { %1796 = vperm.xlu2 %2986, %v2874_v43   ;;  %1762 = vperm.xlu0 %2987, %v2872_v30  }
 0x28f   : > { %1787 = vperm.xlu1 %2985, %v2873_v36   ;;  %v1294_v36 = vmul.f32 %v1289_v4, %v3439_v21 }
 0x290   : > { %1982 = vperm.xlu2 %2986, %v2882_v45   ;;  %1805 = vperm.xlu0 %2987, %v2875_v46  }
 0x297   : > { %1814 = vperm.xlu1 %2985, %v2876_v49  }
 0x298   : > { %2001 = vperm.xlu2 %2986, %v2877_v52   ;;  %2006 = vperm.xlu0 %2987, %v2878_v54  }
 0x29f   : > { %1977 = vperm.xlu1 %2985, %v2881_v56  }
 0x2a0   : > { %2035 = vperm.xlu2 %2986, %v2886_v58   ;;  %2040 = vperm.xlu0 %2987, %v2887_v59  }
 0x2a2   : > { %v1300_v11 = vpop.permute.xlu2 %1299 }
 0x2a3   : > { %v1332_v31 = vmul.f32 %v1315_v51, %v1300_v11 }
 0x2a7   : > { %1987 = vperm.xlu1 %2985, %v2883_v61  }
 0x2a8   : > { %2011 = vperm.xlu2 %2986, %v2879_v53   ;;  %2071 = vperm.xlu0 %2987, %v2889_v62  }
 0x2aa   : > { %v1304_v17 = vpop.permute.xlu2 %1303 }
 0x2af   : > { %2030 = vperm.xlu1 %2985, %v2885_v1  }
 0x2b0   : > { %2016 = vperm.xlu2 %2986, %v2880_v2   ;;  %2045 = vperm.xlu0 %2987, %v2888_v3  }
 0x2b7   : > { %1992 = vperm.xlu1 %2985, %v2884_v6  }
 0x2b9   : > { %v1208_v8 = vpop.permute.xlu1 %1207 }
 0x2ba   : > { %v1206_v9 = vpop.permute.xlu0 %1205  ;;  %v1239_v24 = vmul.f32 %v1226_v33, %v1208_v8 }
 0x2bb   : > { %v1238_v16 = vmul.f32 %v1221_v44, %v1206_v9  ;;  %v1330_v44 = vpop.permute.xlu2 %1329 }
 0x2bc   : > { %v1263_v22 = vadd.f32 %v1250_v47, %v1239_v24 }
 0x2bd   : > { %v1262_v15 = vadd.f32 %v1245_v48, %v1238_v16 }
 0x2be   : > { %v1296_v41 = vadd.f32 %v1292_v25, %v1263_v22 }
 0x2bf   : > { %2076 = vperm.xlu1 %2985, %v2890_v10   ;;  %v1295_v28 = vadd.f32 %v1291_v23, %v1262_v15 }
 0x2c1   : > { %v1210_v13 = vpop.permute.xlu1 %1209  ;;  %v3556_v42 = vadd.f32 %v1332_v31, %v1295_v28 }
 0x2c2   : > { %v1302_v19 = vpop.permute.xlu0 %1301  ;;  %v1240_v20 = vmul.f32 %v1231_v55, %v1210_v13 }
 0x2c3   : > { %v1333_v26 = vmul.f32 %v1320_v7, %v1302_v19  ;;  %v1360_v45 = vmul.f32 %v3556_v42, %v3556_v42  ;;  %v1402_v19 = vpop.permute.xlu2 %1401 }
 0x2c4   : > { %v1264_v27 = vadd.f32 %v1255_v63, %v1240_v20 }
 0x2c5   : > { %v3554_v34 = vadd.f32 %v1333_v26, %v1296_v41 }
 0x2c6   : > { %v1297_v35 = vadd.f32 %v1293_v38, %v1264_v27  ;;  %v1407_v27 = vperm.slane %v1402_v19, %v3337_v37 }
 0x2c7   : > { %v1361_v33 = vmul.f32 %v3554_v34, %v3554_v34  ;;  %v1350_v47 = vadd.f32 %v3554_v34, %v3556_v42 }
 0x2c9   : > { %v1212_v29 = vpop.permute.xlu1 %1211  ;;  %v1364_v54 = vadd.f32 %v1361_v33, %v1360_v45 }
 0x2ca   : > { %v1241_v39 = vmul.f32 %v1236_v0, %v1212_v29  ;;  %v1325_v40 = vpop.permute.xlu0 %1324 }
 0x2cb   : > { %v1334_v32 = vmul.f32 %v1325_v40, %v1304_v17 }
 0x2cc   : > { %v1265_v43 = vadd.f32 %v1260_v5, %v1241_v39 }
 0x2cd   : > { %v1338_v30 = vadd.f32 %v1334_v32, %v1297_v35 }
 0x2ce   : > { %v1298_v49 = vadd.f32 %v1294_v36, %v1265_v43  ;;  %v1481_v36 = vpop.permute.xlu2 %1480 }
 0x2cf   : > { %v1362_v48 = vmul.f32 %v1338_v30, %v1338_v30  ;;  %v1351_v55 = vadd.f32 %v1350_v47, %v1338_v30 }
 0x2d1   : > { %v1306_v46 = vpop.permute.xlu1 %1305  ;;  %v1365_v57 = vadd.f32 %v1364_v54, %v1362_v48  ;;  %v1439_v48 = vunpack.c.l.bf16 %v1407_v27 }
 0x2d2   : > { %v1335_v52 = vmul.f32 %v1330_v44, %v1306_v46  ;;  %v1420_v11 = vpop.permute.xlu0 %1419 }
 0x2d3   : > { %v1425_v38 = vperm.slane %v1420_v11, %v3337_v37 }
 0x2d4   : > { %v1339_v56 = vadd.f32 %v1335_v52, %v1298_v49 }
 0x2d6   : > { %v1352_v58 = vadd.f32 %v1351_v55, %v1339_v56  ;;  %v1363_v59 = vmul.f32 %v1339_v56, %v1339_v56 }
 0x2d8   : > { %v1353_v60 = vrot.slane %v1352_v58, 4  ;;  %v1366_v50 = vadd.f32 %v1365_v57, %v1363_v59 }
 0x2d9   : > { %v1429_v16 = vpop.permute.xlu1 %1428 }
 0x2da   : > { %v1354_v61 = vadd.f32 %v1353_v60, %v1352_v58  ;;  %v1367_v53 = vrot.slane %v1366_v50, 4  ;;  %v1411_v15 = vpop.permute.xlu0 %1410  ;;  %v1434_v40 = vperm.slane %v1429_v16, %v3337_v37  ;;  %v1486_v58 = vperm.slane %v1481_v36, %v3337_v37 }
 0x2db   : > { %v1416_v31 = vperm.slane %v1411_v15, %v3337_v37 }
 0x2dc   : > { %v1355_v62 = vrot.slane %v1354_v61, 2  ;;  %v1368_v51 = vadd.f32 %v1367_v53, %v1366_v50  ;;  %v1442_v49 = vunpack.c.l.bf16 %v1434_v40 }
 0x2dd   : > { %v1440_v52 = vunpack.c.l.bf16 %v1416_v31 }
 0x2de   : > { %v1356_v63 = vadd.f32 %v1355_v62, %v1354_v61  ;;  %v1369_v0 = vrot.slane %v1368_v51, 2 }
 0x2e0   : > { %v1357_v1 = vrot.slane %v1356_v63, 1  ;;  %v1370_v2 = vadd.f32 %v1369_v0, %v1368_v51 }
 0x2e1   : > { %v1472_v22 = vpop.permute.xlu1 %1471 }
 0x2e2   : > { %v1358_v3 = vadd.f32 %v1357_v1, %v1356_v63  ;;  %v1371_v4 = vrot.slane %v1370_v2, 1  ;;  %v1477_v59 = vperm.slane %v1472_v22, %v3337_v37 }
 0x2e4   : > { %v1359_v5 = vmul.f32 0.03125, %v1358_v3  ;;  %v1372_v6 = vadd.f32 %v1371_v4, %v1370_v2  ;;  %v1494_v3 = vunpack.c.l.bf16 %v1486_v58  ;;  %v1493_v4 = vunpack.c.l.bf16 %v1477_v59 }
 0x2e6   : > { %v1373_v7 = vmul.f32 0.03125, %v1372_v6  ;;  %v1374_v8 = vmul.f32 %v1359_v5, %v1359_v5  ;;  %v1390_v26 = vsub.f32 %v1339_v56, %v1359_v5  ;;  %v1389_v28 = vsub.f32 %v1338_v30, %v1359_v5  ;;  %v1454_v30 = vpop.permute.xlu0 %1453 }
 0x2e7   : > { %v1388_v29 = vsub.f32 %v3554_v34, %v1359_v5  ;;  %v1387_v41 = vsub.f32 %v3556_v42, %v1359_v5  ;;  %v1441_v42 = vunpack.c.l.bf16 %v1425_v38  ;;  %v1459_v60 = vperm.slane %v1454_v30, %v3337_v37 }
 0x2e8   : > { %v1375_v9 = vsub.f32 %v1373_v7, %v1374_v8 }
 0x2e9   : > { %v1463_v34 = vpop.permute.xlu1 %1462  ;;  %v1491_v5 = vunpack.c.l.bf16 %v1459_v60 }
 0x2ea   : > { %v1376_v10 = vadd.f32 1e-05, %v1375_v9  ;;  %v1468_v50 = vperm.slane %v1463_v34, %v3337_v37 }
 0x2ec   : > { %3009 = vrsqrt.f32 %v1376_v10  ;;  %vm1383_vm8 = vweird.f32 %v1376_v10  ;;  %v1492_v6 = vunpack.c.l.bf16 %v1468_v50 }
 0x2f2   : > { %v3010_v13 = vpop.eup %3009 }
 0x2f3   : > { %v1378_v24 = vmul.f32 %v3010_v13, %v1376_v10  ;;  %vm1384_vm7 = vweird.f32 %v3010_v13 }
 0x2f4   : > { %vm1385_vm9 = vmor %vm1383_vm8, %vm1384_vm7 }
 0x2f5   : > { %v1379_v20 = vmul.f32 %v3010_v13, %v1378_v24 }
 0x2f7   : > { %v1380_v17 = vmul.f32 0.5, %v1379_v20 }
 0x2f9   : > { %v1381_v23 = vsub.f32 1.5, %v1380_v17 }
 0x2fb   : > { %v1382_v25 = vmul.f32 %v3010_v13, %v1381_v23 }
 0x2fd   : > { %v1386_v39 = vsel %vm1385_vm9, %v3010_v13, %v1382_v25 }
 0x2fe   : > { %v1393_v32 = vmul.f32 %v1389_v28, %v1386_v39  ;;  %v1394_v35 = vmul.f32 %v1390_v26, %v1386_v39  ;;  %v1392_v43 = vmul.f32 %v1388_v29, %v1386_v39  ;;  %v1391_v33 = vmul.f32 %v1387_v41, %v1386_v39 }
 0x300   : > { %v1397_v44 = vpack.c.bf16 %v1393_v32, %v1393_v32  ;;  %v1398_v45 = vpack.c.bf16 %v1394_v35, %v1394_v35  ;;  %v1396_v46 = vpack.c.bf16 %v1392_v43, %v1392_v43  ;;  %v1395_v47 = vpack.c.bf16 %v1391_v33, %v1391_v33 }
 0x302   : > { %v1437_v54 = vunpack.c.l.bf16 %v1397_v44  ;;  %v1438_v55 = vunpack.c.l.bf16 %v1398_v45  ;;  %v1436_v56 = vunpack.c.l.bf16 %v1396_v46  ;;  %v1435_v57 = vunpack.c.l.bf16 %v1395_v47 }
 0x304   : > { %v1445_v61 = vmul.f32 %v1441_v42, %v1437_v54  ;;  %v1446_v53 = vmul.f32 %v1442_v49, %v1438_v55  ;;  %v1444_v62 = vmul.f32 %v1440_v52, %v1436_v56  ;;  %v1443_v51 = vmul.f32 %v1439_v48, %v1435_v57 }
 0x306   : > { %v1449_v63 = vpack.c.bf16 %v1445_v61, %v1445_v61  ;;  %v1450_v0 = vpack.c.bf16 %v1446_v53, %v1446_v53  ;;  %v1448_v1 = vpack.c.bf16 %v1444_v62, %v1444_v62  ;;  %v1447_v2 = vpack.c.bf16 %v1443_v51, %v1443_v51 }
 0x308   : > { %v1489_v7 = vunpack.c.l.bf16 %v1449_v63  ;;  %v1490_v8 = vunpack.c.l.bf16 %v1450_v0  ;;  %v1488_v9 = vunpack.c.l.bf16 %v1448_v1  ;;  %v1487_v10 = vunpack.c.l.bf16 %v1447_v2 }
 0x30a   : > { %v1498_v11 = vadd.f32 %v1494_v3, %v1490_v8  ;;  %v1497_v16 = vadd.f32 %v1493_v4, %v1489_v7  ;;  %v1495_v13 = vadd.f32 %v1491_v5, %v1487_v10  ;;  %v1496_v24 = vadd.f32 %v1492_v6, %v1488_v9 }
 0x30c   : > { %v1502_v19 = vpack.c.bf16 %v1498_v11, %v1498_v11  ;;  %v1501_v20 = vpack.c.bf16 %v1497_v16, %v1497_v16  ;;  %v1499_v15 = vpack.c.bf16 %v1495_v13, %v1495_v13  ;;  %v1500_v22 = vpack.c.bf16 %v1496_v24, %v1496_v24 }
 0x30e   : > { %v3575_v17 = vunpack.c.l.bf16 %v1502_v19  ;;  %v3577_v23 = vunpack.c.l.bf16 %v1501_v20  ;;  %v3579_v27 = vunpack.c.l.bf16 %v1499_v15  ;;  %v3581_v25 = vunpack.c.l.bf16 %v1500_v22 }
 0x310   : > { %v1510_v26 = vmul.f32 %v3575_v17, %v3575_v17  ;;  %v1509_v28 = vmul.f32 %v3577_v23, %v3577_v23  ;;  %v1507_v29 = vmul.f32 %v3579_v27, %v3579_v27  ;;  %v1508_v41 = vmul.f32 %v3581_v25, %v3581_v25 }
 0x312   : > { %v1514_v39 = vpack.c.bf16 %v1510_v26, %v1510_v26  ;;  %v1513_v38 = vpack.c.bf16 %v1509_v28, %v1509_v28  ;;  %v1511_v40 = vpack.c.bf16 %v1507_v29, %v1507_v29  ;;  %v1512_v31 = vpack.c.bf16 %v1508_v41, %v1508_v41 }
 0x314   : > { %v1518_v32 = vunpack.c.l.bf16 %v1514_v39  ;;  %v1517_v35 = vunpack.c.l.bf16 %v1513_v38  ;;  %v1515_v43 = vunpack.c.l.bf16 %v1511_v40  ;;  %v1516_v33 = vunpack.c.l.bf16 %v1512_v31 }
 0x316   : > { %v1522_v36 = vmul.f32 %v1518_v32, %v3575_v17  ;;  %v1521_v44 = vmul.f32 %v1517_v35, %v3577_v23  ;;  %v1519_v45 = vmul.f32 %v1515_v43, %v3579_v27  ;;  %v1520_v46 = vmul.f32 %v1516_v33, %v3581_v25 }
 0x318   : > { %v1526_v30 = vpack.c.bf16 %v1522_v36, %v1522_v36  ;;  %v1525_v47 = vpack.c.bf16 %v1521_v44, %v1521_v44  ;;  %v1523_v34 = vpack.c.bf16 %v1519_v45, %v1519_v45  ;;  %v1524_v48 = vpack.c.bf16 %v1520_v46, %v1520_v46 }
 0x31a   : > { %v1529_v42 = vunpack.c.l.bf16 %v1525_v47  ;;  %v1527_v49 = vunpack.c.l.bf16 %v1523_v34  ;;  %v1528_v52 = vunpack.c.l.bf16 %v1524_v48  ;;  %v1530_v54 = vunpack.c.l.bf16 %v1526_v30 }
 0x31c   : > { %v1533_v55 = vmul.f32 0.044677734, %v1529_v42  ;;  %v1531_v56 = vmul.f32 0.044677734, %v1527_v49  ;;  %v1532_v57 = vmul.f32 0.044677734, %v1528_v52  ;;  %v1534_v58 = vmul.f32 0.044677734, %v1530_v54 }
 0x31e   : > { %v1537_v59 = vpack.c.bf16 %v1533_v55, %v1533_v55  ;;  %v1535_v60 = vpack.c.bf16 %v1531_v56, %v1531_v56  ;;  %v1536_v50 = vpack.c.bf16 %v1532_v57, %v1532_v57  ;;  %v1538_v61 = vpack.c.bf16 %v1534_v58, %v1534_v58 }
 0x320   : > { %v1541_v53 = vunpack.c.l.bf16 %v1537_v59  ;;  %v1539_v62 = vunpack.c.l.bf16 %v1535_v60  ;;  %v1540_v51 = vunpack.c.l.bf16 %v1536_v50  ;;  %v1542_v63 = vunpack.c.l.bf16 %v1538_v61 }
 0x322   : > { %v1545_v0 = vadd.f32 %v1541_v53, %v3577_v23  ;;  %v1543_v1 = vadd.f32 %v1539_v62, %v3579_v27  ;;  %v1544_v2 = vadd.f32 %v1540_v51, %v3581_v25  ;;  %v1546_v3 = vadd.f32 %v1542_v63, %v3575_v17 }
 0x324   : > { %v1547_v4 = vpack.c.bf16 %v1543_v1, %v1543_v1  ;;  %v1548_v5 = vpack.c.bf16 %v1544_v2, %v1544_v2  ;;  %v1549_v6 = vpack.c.bf16 %v1545_v0, %v1545_v0  ;;  %v1550_v7 = vpack.c.bf16 %v1546_v3, %v1546_v3 }
 0x326   : > { %v1553_v8 = vunpack.c.l.bf16 %v1549_v6  ;;  %v1554_v9 = vunpack.c.l.bf16 %v1550_v7  ;;  %v1551_v10 = vunpack.c.l.bf16 %v1547_v4  ;;  %v1552_v11 = vunpack.c.l.bf16 %v1548_v5 }
 0x328   : > { %v1557_v16 = vmul.f32 0.796875, %v1553_v8  ;;  %v1558_v13 = vmul.f32 0.796875, %v1554_v9  ;;  %v1555_v24 = vmul.f32 0.796875, %v1551_v10  ;;  %v1556_v19 = vmul.f32 0.796875, %v1552_v11  ;;  %v2934_v11 = vld [vmem:[%s3841_s5 + $0x10] sm:$0xff] }
 0x32a   : > { %v1561_v20 = vpack.c.bf16 %v1557_v16, %v1557_v16  ;;  %v1562_v15 = vpack.c.bf16 %v1558_v13, %v1558_v13  ;;  %v1559_v22 = vpack.c.bf16 %v1555_v24, %v1555_v24  ;;  %v1560_v26 = vpack.c.bf16 %v1556_v19, %v1556_v19  ;;  %v1627_v13 = vpop.permute.xlu0 %1626  ;;  %v1632_v19 = vpop.permute.xlu1 %1631 }
 0x32c   : > { %v1565_v28 = vunpack.c.l.bf16 %v1561_v20  ;;  %v1566_v29 = vunpack.c.l.bf16 %v1562_v15  ;;  %v1563_v41 = vunpack.c.l.bf16 %v1559_v22  ;;  %v1564_v39 = vunpack.c.l.bf16 %v1560_v26 }
 0x32e   : > { %3011 = vtanh.f32 %v1565_v28 }
 0x32f   : > { %3013 = vtanh.f32 %v1566_v29 }
 0x330   : > { %3015 = vtanh.f32 %v1563_v41 }
 0x331   : > { %3017 = vtanh.f32 %v1564_v39 }
 0x334   : > { %v3012_v38 = vpop.eup %3011 }
 0x335   : > { %v3014_v40 = vpop.eup %3013  ;;  %v1573_v31 = vpack.c.bf16 %v3012_v38, %v3012_v38 }
 0x336   : > { %v3016_v32 = vpop.eup %3015  ;;  %v1574_v35 = vpack.c.bf16 %v3014_v40, %v3014_v40 }
 0x337   : > { %v3018_v43 = vpop.eup %3017  ;;  %v1577_v33 = vunpack.c.l.bf16 %v1573_v31  ;;  %v1571_v36 = vpack.c.bf16 %v3016_v32, %v3016_v32 }
 0x338   : > { %v1578_v44 = vunpack.c.l.bf16 %v1574_v35  ;;  %v1572_v45 = vpack.c.bf16 %v3018_v43, %v3018_v43 }
 0x339   : > { %v1581_v46 = vadd.f32 1.0, %v1577_v33  ;;  %v1575_v30 = vunpack.c.l.bf16 %v1571_v36 }
 0x33a   : > { %v1582_v47 = vadd.f32 1.0, %v1578_v44  ;;  %v1576_v34 = vunpack.c.l.bf16 %v1572_v45 }
 0x33b   : > { %v1585_v48 = vpack.c.bf16 %v1581_v46, %v1581_v46  ;;  %v1579_v42 = vadd.f32 1.0, %v1575_v30 }
 0x33c   : > { %v1586_v49 = vpack.c.bf16 %v1582_v47, %v1582_v47  ;;  %v1580_v52 = vadd.f32 1.0, %v1576_v34 }
 0x33d   : > { %v1589_v54 = vunpack.c.l.bf16 %v1585_v48  ;;  %v1583_v55 = vpack.c.bf16 %v1579_v42, %v1579_v42 }
 0x33e   : > { %v1590_v56 = vunpack.c.l.bf16 %v1586_v49  ;;  %v1584_v57 = vpack.c.bf16 %v1580_v52, %v1580_v52 }
 0x33f   : > { %v1593_v58 = vmul.f32 0.5, %v1589_v54  ;;  %v1587_v59 = vunpack.c.l.bf16 %v1583_v55 }
 0x340   : > { %v1594_v60 = vmul.f32 0.5, %v1590_v56  ;;  %v1588_v50 = vunpack.c.l.bf16 %v1584_v57 }
 0x341   : > { %v1597_v61 = vpack.c.bf16 %v1593_v58, %v1593_v58  ;;  %v1591_v53 = vmul.f32 0.5, %v1587_v59 }
 0x342   : > { %v1598_v62 = vpack.c.bf16 %v1594_v60, %v1594_v60  ;;  %v1592_v51 = vmul.f32 0.5, %v1588_v50  ;;  %v1736_v60 = vpop.permute.xlu0 %1735  ;;  %v1745_v50 = vpop.permute.xlu1 %1744 }
 0x343   : > { %v1601_v63 = vunpack.c.l.bf16 %v1597_v61  ;;  %v1595_v0 = vpack.c.bf16 %v1591_v53, %v1591_v53 }
 0x344   : > { %v1602_v1 = vunpack.c.l.bf16 %v1598_v62  ;;  %v1596_v2 = vpack.c.bf16 %v1592_v51, %v1592_v51 }
 0x345   : > { %v1605_v3 = vmul.f32 %v1601_v63, %v3577_v23  ;;  %v1599_v4 = vunpack.c.l.bf16 %v1595_v0  ;;  %v2935_v23 = vld [vmem:[%s3841_s5 + $0x18] sm:$0xff] }
 0x346   : > { %v1606_v5 = vmul.f32 %v1602_v1, %v3575_v17  ;;  %v1600_v6 = vunpack.c.l.bf16 %v1596_v2 }
 0x347   : > { %v1603_v8 = vmul.f32 %v1599_v4, %v3579_v27  ;;  %v1622_v27 = vpop.permute.xlu2 %1621 }
 0x348   : > { %v1608_v7 = vpack.c.bf16 %v1606_v5, %v1605_v3  ;;  %v1604_v9 = vmul.f32 %v1600_v6, %v3581_v25 }
 0x34a   : > { %1661 = vmatpush.bf16.msra.mxu1 %v1608_v7  ;;  %v1607_v10 = vpack.c.bf16 %v1604_v9, %v1603_v8  ;;  %v1763_v63 = vpop.permute.xlu0 %1762  ;;  %v1788_v0 = vpop.permute.xlu1 %1787  ;;  %v1741_v9 = vperm.slane %v1736_v60, %v3337_v37 }
 0x34e   : > { %1662 = vmatpush.bf16.msra.mxu1 %v1607_v10  ;;  %v1750_v10 = vperm.slane %v1745_v50, %v3337_v37 }
 0x34f   : > { %v1637_v41 = vpop.permute.xlu2 %1636 }
 0x351   : > { %2867 = vmatmul.msk.bf16.vlgmr.msra.gmra.mxu1 %vm893_vm3, %v2934_v11  ;;  %v1768_v11 = vperm.slane %v1763_v63, %v3337_v37 }
 0x357   : > { %v1754_v62 = vpop.permute.xlu2 %1753 }
 0x358   : > { %v1759_v3 = vperm.slane %v1754_v62, %v3337_v37 }
 0x361   : > { %2868 = vmatmul.msk.bf16.gmra.mxu1 %vm893_vm3, %v2935_v23 }
 0x3ce   : > { %v1664_v17 = vpop.f32.mrf.mxu1 }
 0x3cf   : > { %v1665_v20 = vadd.f32 %v1664_v17, %v1622_v27 }
 0x3d1   : > { %v1694_v26 = vmul.f32 %v1665_v20, %v1665_v20 }
 0x3d6   : > { %v1666_v16 = vpop.f32.mrf.mxu1 }
 0x3d7   : > { %v1667_v24 = vadd.f32 %v1666_v16, %v1627_v13 }
 0x3d9   : > { %v1695_v22 = vmul.f32 %v1667_v24, %v1667_v24  ;;  %v1684_v28 = vadd.f32 %v1667_v24, %v1665_v20 }
 0x3db   : > { %v1698_v38 = vadd.f32 %v1695_v22, %v1694_v26  ;;  %v1815_v22 = vpop.permute.xlu1 %1814 }
 0x3de   : > { %v1669_v25 = vpop.f32.mrf.mxu1 }
 0x3df   : > { %v1670_v15 = vadd.f32 %v1669_v25, %v1632_v19  ;;  %v1797_v25 = vpop.permute.xlu2 %1796  ;;  %v1806_v19 = vpop.permute.xlu0 %1805 }
 0x3e1   : > { %v1696_v29 = vmul.f32 %v1670_v15, %v1670_v15  ;;  %v1685_v40 = vadd.f32 %v1684_v28, %v1670_v15 }
 0x3e3   : > { %v1699_v32 = vadd.f32 %v1698_v38, %v1696_v29  ;;  %v1773_v29 = vunpack.c.l.bf16 %v1741_v9 }
 0x3e6   : > { %v1671_v39 = vpop.f32.mrf.mxu1 }
 0x3e7   : > { %v1672_v31 = vadd.f32 %v1671_v39, %v1637_v41  ;;  %v1774_v41 = vunpack.c.l.bf16 %v1750_v10  ;;  %v1776_v39 = vunpack.c.l.bf16 %v1768_v11 }
 0x3e9   : > { %v1686_v35 = vadd.f32 %v1685_v40, %v1672_v31  ;;  %v1697_v43 = vmul.f32 %v1672_v31, %v1672_v31 }
 0x3eb   : > { %v1687_v33 = vrot.slane %v1686_v35, 4  ;;  %v1700_v36 = vadd.f32 %v1699_v32, %v1697_v43  ;;  %v1793_v43 = vperm.slane %v1788_v0, %v3337_v37 }
 0x3ed   : > { %v1688_v44 = vadd.f32 %v1687_v33, %v1686_v35  ;;  %v1701_v45 = vrot.slane %v1700_v36, 4  ;;  %v1802_v35 = vperm.slane %v1797_v25, %v3337_v37  ;;  %v1811_v33 = vperm.slane %v1806_v19, %v3337_v37 }
 0x3ef   : > { %v1689_v46 = vrot.slane %v1688_v44, 2  ;;  %v1702_v30 = vadd.f32 %v1701_v45, %v1700_v36  ;;  %v1820_v36 = vperm.slane %v1815_v22, %v3337_v37 }
 0x3f1   : > { %v1690_v47 = vadd.f32 %v1689_v46, %v1688_v44  ;;  %v1703_v34 = vrot.slane %v1702_v30, 2 }
 0x3f3   : > { %v1691_v48 = vrot.slane %v1690_v47, 1  ;;  %v1704_v42 = vadd.f32 %v1703_v34, %v1702_v30 }
 0x3f5   : > { %v1692_v49 = vadd.f32 %v1691_v48, %v1690_v47  ;;  %v1705_v52 = vrot.slane %v1704_v42, 1 }
 0x3f7   : > { %v1693_v54 = vmul.f32 0.03125, %v1692_v49  ;;  %v1706_v55 = vadd.f32 %v1705_v52, %v1704_v42  ;;  %v1826_v49 = vunpack.c.l.bf16 %v1802_v35  ;;  %v1825_v52 = vunpack.c.l.bf16 %v1793_v43 }
 0x3f9   : > { %v1707_v56 = vmul.f32 0.03125, %v1706_v55  ;;  %v1708_v57 = vmul.f32 %v1693_v54, %v1693_v54  ;;  %v1721_v5 = vsub.f32 %v1665_v20, %v1693_v54  ;;  %v1722_v6 = vsub.f32 %v1667_v24, %v1693_v54 }
 0x3fa   : > { %v1723_v7 = vsub.f32 %v1670_v15, %v1693_v54  ;;  %v1724_v8 = vsub.f32 %v1672_v31, %v1693_v54  ;;  %v1775_v15 = vunpack.c.l.bf16 %v1759_v3  ;;  %v1827_v54 = vunpack.c.l.bf16 %v1811_v33 }
 0x3fb   : > { %v1709_v58 = vsub.f32 %v1707_v56, %v1708_v57  ;;  %v1828_v55 = vunpack.c.l.bf16 %v1820_v36 }
 0x3fd   : > { %v1710_v59 = vadd.f32 1e-05, %v1709_v58 }
 0x3ff   : > { %3019 = vrsqrt.f32 %v1710_v59  ;;  %vm1717_vm11 = vweird.f32 %v1710_v59 }
 0x405   : > { %v3020_v61 = vpop.eup %3019 }
 0x406   : > { %v1712_v53 = vmul.f32 %v3020_v61, %v1710_v59  ;;  %vm1718_vm10 = vweird.f32 %v3020_v61 }
 0x407   : > { %vm1719_vm12 = vmor %vm1717_vm11, %vm1718_vm10 }
 0x408   : > { %v1713_v51 = vmul.f32 %v3020_v61, %v1712_v53 }
 0x40a   : > { %v1714_v1 = vmul.f32 0.5, %v1713_v51 }
 0x40c   : > { %v1715_v2 = vsub.f32 1.5, %v1714_v1 }
 0x40e   : > { %v1716_v4 = vmul.f32 %v3020_v61, %v1715_v2 }
 0x410   : > { %v1720_v23 = vsel %vm1719_vm12, %v3020_v61, %v1716_v4 }
 0x411   : > { %v1725_v17 = vmul.f32 %v1721_v5, %v1720_v23  ;;  %v1726_v16 = vmul.f32 %v1722_v6, %v1720_v23  ;;  %v1727_v27 = vmul.f32 %v1723_v7, %v1720_v23  ;;  %v1728_v13 = vmul.f32 %v1724_v8, %v1720_v23 }
 0x413   : > { %v1729_v26 = vpack.c.bf16 %v1725_v17, %v1725_v17  ;;  %v1730_v28 = vpack.c.bf16 %v1726_v16, %v1726_v16  ;;  %v1731_v20 = vpack.c.bf16 %v1727_v27, %v1727_v27  ;;  %v1732_v24 = vpack.c.bf16 %v1728_v13, %v1728_v13 }
 0x415   : > { %v1769_v38 = vunpack.c.l.bf16 %v1729_v26  ;;  %v1770_v40 = vunpack.c.l.bf16 %v1730_v28  ;;  %v1771_v31 = vunpack.c.l.bf16 %v1731_v20  ;;  %v1772_v32 = vunpack.c.l.bf16 %v1732_v24 }
 0x417   : > { %v1777_v44 = vmul.f32 %v1773_v29, %v1769_v38  ;;  %v1778_v45 = vmul.f32 %v1774_v41, %v1770_v40  ;;  %v1779_v46 = vmul.f32 %v1775_v15, %v1771_v31  ;;  %v1780_v30 = vmul.f32 %v1776_v39, %v1772_v32 }
 0x419   : > { %v1781_v47 = vpack.c.bf16 %v1777_v44, %v1777_v44  ;;  %v1782_v34 = vpack.c.bf16 %v1778_v45, %v1778_v45  ;;  %v1783_v48 = vpack.c.bf16 %v1779_v46, %v1779_v46  ;;  %v1784_v42 = vpack.c.bf16 %v1780_v30, %v1780_v30 }
 0x41b   : > { %v1821_v56 = vunpack.c.l.bf16 %v1781_v47  ;;  %v1822_v57 = vunpack.c.l.bf16 %v1782_v34  ;;  %v1823_v58 = vunpack.c.l.bf16 %v1783_v48  ;;  %v1824_v59 = vunpack.c.l.bf16 %v1784_v42 }
 0x41d   : > { %v1829_v60 = vadd.f32 %v1825_v52, %v1821_v56  ;;  %v1830_v50 = vadd.f32 %v1826_v49, %v1822_v57  ;;  %v1831_v61 = vadd.f32 %v1827_v54, %v1823_v58  ;;  %v1832_v53 = vadd.f32 %v1828_v55, %v1824_v59 }
 0x41f   : > { %v1836_v62 = vpack.c.bf16 %v1832_v53, %v1832_v53  ;;  %v1834_v51 = vpack.c.bf16 %v1830_v50, %v1830_v50  ;;  %v1833_v63 = vpack.c.bf16 %v1829_v60, %v1829_v60  ;;  %v1835_v0 = vpack.c.bf16 %v1831_v61, %v1831_v61 }
 0x421   : > { %v3619_v1 = vunpack.c.l.bf16 %v1836_v62  ;;  %v3621_v2 = vunpack.c.l.bf16 %v1834_v51  ;;  %v3623_v3 = vunpack.c.l.bf16 %v1833_v63  ;;  %v3625_v4 = vunpack.c.l.bf16 %v1835_v0 }
 0x423   : > { %v1844_v5 = vmul.f32 %v3619_v1, %v3619_v1  ;;  %v1842_v6 = vmul.f32 %v3621_v2, %v3621_v2  ;;  %v1841_v7 = vmul.f32 %v3623_v3, %v3623_v3  ;;  %v1843_v8 = vmul.f32 %v3625_v4, %v3625_v4 }
 0x425   : > { %v1848_v9 = vpack.c.bf16 %v1844_v5, %v1844_v5  ;;  %v1846_v10 = vpack.c.bf16 %v1842_v6, %v1842_v6  ;;  %v1845_v11 = vpack.c.bf16 %v1841_v7, %v1841_v7  ;;  %v1847_v23 = vpack.c.bf16 %v1843_v8, %v1843_v8 }
 0x427   : > { %v1852_v17 = vunpack.c.l.bf16 %v1848_v9  ;;  %v1850_v16 = vunpack.c.l.bf16 %v1846_v10  ;;  %v1849_v27 = vunpack.c.l.bf16 %v1845_v11  ;;  %v1851_v13 = vunpack.c.l.bf16 %v1847_v23 }
 0x429   : > { %v1856_v25 = vmul.f32 %v1852_v17, %v3619_v1  ;;  %v1854_v19 = vmul.f32 %v1850_v16, %v3621_v2  ;;  %v1853_v22 = vmul.f32 %v1849_v27, %v3623_v3  ;;  %v1855_v26 = vmul.f32 %v1851_v13, %v3625_v4 }
 0x42b   : > { %v1860_v28 = vpack.c.bf16 %v1856_v25, %v1856_v25  ;;  %v1858_v20 = vpack.c.bf16 %v1854_v19, %v1854_v19  ;;  %v1857_v24 = vpack.c.bf16 %v1853_v22, %v1853_v22  ;;  %v1859_v15 = vpack.c.bf16 %v1855_v26, %v1855_v26 }
 0x42d   : > { %v1864_v29 = vunpack.c.l.bf16 %v1860_v28  ;;  %v1862_v41 = vunpack.c.l.bf16 %v1858_v20  ;;  %v1861_v39 = vunpack.c.l.bf16 %v1857_v24  ;;  %v1863_v38 = vunpack.c.l.bf16 %v1859_v15 }
 0x42f   : > { %v1868_v40 = vmul.f32 0.044677734, %v1864_v29  ;;  %v1866_v31 = vmul.f32 0.044677734, %v1862_v41  ;;  %v1865_v32 = vmul.f32 0.044677734, %v1861_v39  ;;  %v1867_v35 = vmul.f32 0.044677734, %v1863_v38 }
 0x431   : > { %v1872_v43 = vpack.c.bf16 %v1868_v40, %v1868_v40  ;;  %v1870_v33 = vpack.c.bf16 %v1866_v31, %v1866_v31  ;;  %v1869_v36 = vpack.c.bf16 %v1865_v32, %v1865_v32  ;;  %v1871_v44 = vpack.c.bf16 %v1867_v35, %v1867_v35 }
 0x433   : > { %v1876_v45 = vunpack.c.l.bf16 %v1872_v43  ;;  %v1874_v46 = vunpack.c.l.bf16 %v1870_v33  ;;  %v1873_v30 = vunpack.c.l.bf16 %v1869_v36  ;;  %v1875_v47 = vunpack.c.l.bf16 %v1871_v44 }
 0x435   : > { %v1880_v34 = vadd.f32 %v1876_v45, %v3619_v1  ;;  %v1878_v48 = vadd.f32 %v1874_v46, %v3621_v2  ;;  %v1877_v42 = vadd.f32 %v1873_v30, %v3623_v3  ;;  %v1879_v49 = vadd.f32 %v1875_v47, %v3625_v4 }
 0x437   : > { %v1882_v52 = vpack.c.bf16 %v1878_v48, %v1878_v48  ;;  %v1881_v54 = vpack.c.bf16 %v1877_v42, %v1877_v42  ;;  %v1883_v55 = vpack.c.bf16 %v1879_v49, %v1879_v49  ;;  %v1884_v56 = vpack.c.bf16 %v1880_v34, %v1880_v34 }
 0x439   : > { %v1886_v57 = vunpack.c.l.bf16 %v1882_v52  ;;  %v1885_v58 = vunpack.c.l.bf16 %v1881_v54  ;;  %v1887_v59 = vunpack.c.l.bf16 %v1883_v55  ;;  %v1888_v60 = vunpack.c.l.bf16 %v1884_v56 }
 0x43b   : > { %v1890_v50 = vmul.f32 0.796875, %v1886_v57  ;;  %v1889_v61 = vmul.f32 0.796875, %v1885_v58  ;;  %v1891_v53 = vmul.f32 0.796875, %v1887_v59  ;;  %v1892_v62 = vmul.f32 0.796875, %v1888_v60 }
 0x43d   : > { %v1894_v51 = vpack.c.bf16 %v1890_v50, %v1890_v50  ;;  %v1893_v63 = vpack.c.bf16 %v1889_v61, %v1889_v61  ;;  %v1895_v0 = vpack.c.bf16 %v1891_v53, %v1891_v53  ;;  %v1896_v5 = vpack.c.bf16 %v1892_v62, %v1892_v62  ;;  %v3050_v62 = vld [vmem:[%s3147_s26] ss:$0 sm:$0xff] }
 0x43f   : > { %v1898_v6 = vunpack.c.l.bf16 %v1894_v51  ;;  %v1897_v7 = vunpack.c.l.bf16 %v1893_v63  ;;  %v1899_v8 = vunpack.c.l.bf16 %v1895_v0  ;;  %v1900_v9 = vunpack.c.l.bf16 %v1896_v5 }
 0x441   : > { %3021 = vtanh.f32 %v1898_v6  ;;  %v2892_v6 = vld [vmem:[%s3839_s3 + $0x118] sm:$0xff] }
 0x442   : > { %3023 = vtanh.f32 %v1897_v7  ;;  %v2893_v7 = vld [vmem:[%s3843_s7 + $0x20] sm:$0xf] }
 0x443   : > { %3025 = vtanh.f32 %v1899_v8  ;;  %v2896_v8 = vld [vmem:[%s3843_s7 + $0x2c] sm:$0xf] }
 0x444   : > { %3027 = vtanh.f32 %v1900_v9  ;;  %v2900_v9 = vld [vmem:[%s3844_s8 + $0x2c] sm:$0xf] }
 0x447   : > { %v3022_v10 = vpop.eup %3021 }
 0x448   : > { %v3024_v11 = vpop.eup %3023  ;;  %v1906_v23 = vpack.c.bf16 %v3022_v10, %v3022_v10  ;;  %v2894_v10 = vld [vmem:[%s3843_s7 + $0x24] sm:$0xf] }
 0x449   : > { %v3026_v17 = vpop.eup %3025  ;;  %v1905_v16 = vpack.c.bf16 %v3024_v11, %v3024_v11  ;;  %v2899_v11 = vld [vmem:[%s3844_s8 + $0x28] sm:$0xf] }
 0x44a   : > { %v3028_v27 = vpop.eup %3027  ;;  %v1910_v13 = vunpack.c.l.bf16 %v1906_v23  ;;  %v1907_v25 = vpack.c.bf16 %v3026_v17, %v3026_v17  ;;  %v2905_v23 = vld [vmem:[%s3842_s6 + $0x40] sm:$0xff] }
 0x44b   : > { %v1909_v19 = vunpack.c.l.bf16 %v1905_v16  ;;  %v1908_v22 = vpack.c.bf16 %v3028_v27, %v3028_v27  ;;  %v2897_v17 = vld [vmem:[%s3844_s8 + $0x20] sm:$0xf]  ;;  %v2898_v16 = vld [vmem:[%s3844_s8 + $0x24] sm:$0xf]  ;;  %v2908_v27 = vld [vmem:[%s3842_s6 + $0x58] sm:$0xff] }
 0x44c   : > { %v1914_v26 = vadd.f32 1.0, %v1910_v13  ;;  %v1911_v28 = vunpack.c.l.bf16 %v1907_v25  ;;  %v2906_v13 = vld [vmem:[%s3842_s6 + $0x48] sm:$0xff]  ;;  %v2907_v25 = vld [vmem:[%s3842_s6 + $0x50] sm:$0xff] }
 0x44d   : > { %v1913_v20 = vadd.f32 1.0, %v1909_v19  ;;  %v1912_v24 = vunpack.c.l.bf16 %v1908_v22  ;;  %v2921_v19 = vld [vmem:[%s3845_s9 + $0x28] sm:$0xf]  ;;  %v2919_v22 = vld [vmem:[%s3845_s9 + $0x20] sm:$0xf] }
 0x44e   : > { %v1918_v15 = vpack.c.bf16 %v1914_v26, %v1914_v26  ;;  %v1915_v29 = vadd.f32 1.0, %v1911_v28  ;;  %v2920_v26 = vld [vmem:[%s3845_s9 + $0x24] sm:$0xf] }
 0x44f   : > { %v1917_v41 = vpack.c.bf16 %v1913_v20, %v1913_v20  ;;  %v1916_v39 = vadd.f32 1.0, %v1912_v24  ;;  %v2924_v28 = vld [vmem:[%s3846_s10 + $0x24] sm:$0xf]  ;;  %v2922_v20 = vld [vmem:[%s3845_s9 + $0x2c] sm:$0xf]  ;;  %v1983_v24 = vpop.permute.xlu2 %1982 }
 0x450   : > { %v1922_v38 = vunpack.c.l.bf16 %v1918_v15  ;;  %v1919_v40 = vpack.c.bf16 %v1915_v29, %v1915_v29  ;;  %v2923_v15 = vld [vmem:[%s3846_s10 + $0x20] sm:$0xf]  ;;  %v1978_v29 = vpop.permute.xlu1 %1977 }
 0x451   : > { %v1921_v31 = vunpack.c.l.bf16 %v1917_v41  ;;  %v1920_v32 = vpack.c.bf16 %v1916_v39, %v1916_v39  ;;  %v2925_v41 = vld [vmem:[%s3846_s10 + $0x28] sm:$0xf] }
 0x452   : > { %v1926_v35 = vmul.f32 0.5, %v1922_v38  ;;  %v1923_v43 = vunpack.c.l.bf16 %v1919_v40  ;;  %v2007_v38 = vpop.permute.xlu0 %2006  ;;  %v2926_v40 = vld [vmem:[%s3846_s10 + $0x2c] sm:$0xf] }
 0x453   : > { %v1925_v33 = vmul.f32 0.5, %v1921_v31  ;;  %v1924_v36 = vunpack.c.l.bf16 %v1920_v32 }
 0x454   : > { %v1930_v44 = vpack.c.bf16 %v1926_v35, %v1926_v35  ;;  %v1927_v45 = vmul.f32 0.5, %v1923_v43 }
 0x455   : > { %v1929_v46 = vpack.c.bf16 %v1925_v33, %v1925_v33  ;;  %v1928_v30 = vmul.f32 0.5, %v1924_v36 }
 0x456   : > { %v1934_v47 = vunpack.c.l.bf16 %v1930_v44  ;;  %v1931_v34 = vpack.c.bf16 %v1927_v45, %v1927_v45 }
 0x457   : > { %v1933_v48 = vunpack.c.l.bf16 %v1929_v46  ;;  %v1932_v52 = vpack.c.bf16 %v1928_v30, %v1928_v30  ;;  %v2002_v39 = vpop.permute.xlu2 %2001 }
 0x458   : > { %v1938_v42 = vmul.f32 %v1934_v47, %v3621_v2  ;;  %v1935_v49 = vunpack.c.l.bf16 %v1931_v34  ;;  %v1988_v31 = vpop.permute.xlu1 %1987 }
 0x459   : > { %v1937_v54 = vmul.f32 %v1933_v48, %v3623_v3  ;;  %v1936_v60 = vunpack.c.l.bf16 %v1932_v52 }
 0x45a   : > { %v1942_v55 = vpack.c.bf16 %v1938_v42, %v1938_v42  ;;  %v1939_v56 = vmul.f32 %v1935_v49, %v3625_v4  ;;  %v2041_v35 = vpop.permute.xlu0 %2040 }
 0x45b   : > { %v1941_v57 = vpack.c.bf16 %v1937_v54, %v1937_v54  ;;  %v1940_v63 = vmul.f32 %v1936_v60, %v3619_v1 }
 0x45c   : > { %v1946_v58 = vunpack.c.l.bf16 %v1942_v55  ;;  %v1943_v59 = vpack.c.bf16 %v1939_v56, %v1939_v56 }
 0x45d   : > { %v1945_v50 = vunpack.c.l.bf16 %v1941_v57  ;;  %v1944_v3 = vpack.c.bf16 %v1940_v63, %v1940_v63 }
 0x45e   : > { %v1950_v61 = vadd.f32 %v1946_v58, %v3424_v12  ;;  %v1947_v2 = vunpack.c.l.bf16 %v1943_v59 }
 0x45f   : > { %v1949_v53 = vadd.f32 %v1945_v50, %v3427_v14  ;;  %v1948_v4 = vunpack.c.l.bf16 %v1944_v3  ;;  %v2036_v32 = vpop.permute.xlu2 %2035 }
 0x460   : > { %v3649_v51 = vmul.f32 %v3050_v62, %v1950_v61  ;;  %v1951_v12 = vadd.f32 %v1947_v2, %v3433_v18  ;;  %v2891_v18 = vld [vmem:[%s3839_s3 + $0x110] sm:$0xff]  ;;  %v2031_v43 = vpop.permute.xlu1 %2030 }
 0x461   : > { %v3652_v0 = vmul.f32 %v3050_v62, %v1949_v53  ;;  %v1952_v1 = vadd.f32 %v1948_v4, %v3439_v21  ;;  %v2895_v21 = vld [vmem:[%s3843_s7 + $0x28] sm:$0xf] }
 0x462   : > { %1964 = vrot.lane.b32.xlu0 %v3649_v51, %s3066_s15  ;;  %v3658_v14 = vmul.f32 %v3050_v62, %v1951_v12  ;;  %v2072_v36 = vpop.permute.xlu0 %2071  ;;  %v2049_v57 = vmul.f32 %v2036_v32, %v3649_v51 }
 0x463   : > { %2056 = vrot.lane.b32.xlu1 %v3652_v0, %s3067_s20  ;;  %1962 = vrot.lane.b32.xlu2 %v3652_v0, %s3066_s15  ;;  %v3664_v5 = vmul.f32 %v3050_v62, %v1952_v1  ;;  %v2048_v53 = vmul.f32 %v2031_v43, %v3652_v0 }
 0x464   : > { %v2050_v61 = vmul.f32 %v2041_v35, %v3658_v14 }
 0x467   : > { %v2012_v33 = vpop.permute.xlu2 %2011 }
 0x468   : > { %v1993_v44 = vpop.permute.xlu1 %1992 }
 0x46a   : > { %1966 = vrot.lane.b32.xlu0 %v3658_v14, %s3066_s15  ;;  %v2046_v46 = vpop.permute.xlu0 %2045 }
 0x46b   : > { %2060 = vrot.lane.b32.xlu1 %v3658_v14, %s3067_s20  ;;  %2058 = vrot.lane.b32.xlu2 %v3649_v51, %s3067_s20 }
 0x46f   : > { %v2017_v45 = vpop.permute.xlu2 %2016 }
 0x470   : > { %v2077_v30 = vpop.permute.xlu1 %2076 }
 0x472   : > { %1968 = vrot.lane.b32.xlu0 %v3664_v5, %s3066_s15 }
 0x473   : > { %2086 = vperm.xlu1 %2985, %v2892_v6   ;;  %2081 = vperm.xlu2 %2986, %v2891_v18  }
 0x47a   : > { %2062 = vrot.lane.b32.xlu0 %v3664_v5, %s3067_s20 }
 0x47b   : > { %2158 = vperm.xlu1 %2985, %v2893_v7   ;;  %2176 = vperm.xlu2 %2986, %v2895_v21  }
 0x482   : > { %2185 = vperm.xlu0 %2987, %v2896_v8  }
 0x483   : > { %2237 = vperm.xlu1 %2985, %v2900_v9   ;;  %2167 = vperm.xlu2 %2986, %v2894_v10   ;;  %v2051_v10 = vmul.f32 %v2046_v46, %v3664_v5 }
 0x48a   : > { %2228 = vperm.xlu0 %2987, %v2899_v11  }
 0x48b   : > { %2378 = vperm.xlu1 %2985, %v2905_v23   ;;  %2210 = vperm.xlu2 %2986, %v2897_v17  }
 0x492   : > { %2219 = vperm.xlu0 %2987, %v2898_v16  }
 0x493   : > { %2393 = vperm.xlu1 %2985, %v2908_v27   ;;  %2383 = vperm.xlu2 %2986, %v2906_v13  }
 0x49a   : > { %2388 = vperm.xlu0 %2987, %v2907_v25  }
 0x49b   : > { %2510 = vperm.xlu1 %2985, %v2921_v19   ;;  %2492 = vperm.xlu2 %2986, %v2919_v22  }
 0x4a2   : > { %2501 = vperm.xlu0 %2987, %v2920_v26  }
 0x4a3   : > { %2553 = vperm.xlu1 %2985, %v2924_v28   ;;  %2519 = vperm.xlu2 %2986, %v2922_v20  }
 0x4aa   : > { %2544 = vperm.xlu0 %2987, %v2923_v15  }
 0x4ab   : > { %2562 = vperm.xlu2 %2986, %v2925_v41  }
 0x4b2   : > { %2571 = vperm.xlu0 %2987, %v2926_v40  }
 0x4bd   : > { %v1963_v47 = vpop.permute.xlu2 %1962 }
 0x4be   : > { %v1995_v55 = vmul.f32 %v1978_v29, %v1963_v47 }
 0x4c0   : > { %v2019_v59 = vadd.f32 %v2002_v39, %v1995_v55 }
 0x4c2   : > { %v2052_v1 = vadd.f32 %v2048_v53, %v2019_v59 }
 0x4c5   : > { %v2059_v49 = vpop.permute.xlu2 %2058 }
 0x4c6   : > { %v2090_v63 = vmul.f32 %v2077_v30, %v2059_v49 }
 0x4cd   : > { %v2082_v4 = vpop.permute.xlu2 %2081 }
 0x4d4   : > { %v1965_v34 = vpop.permute.xlu0 %1964 }
 0x4d5   : > { %v2057_v48 = vpop.permute.xlu1 %2056  ;;  %v1996_v42 = vmul.f32 %v1983_v24, %v1965_v34 }
 0x4d6   : > { %v2089_v62 = vmul.f32 %v2072_v36, %v2057_v48  ;;  %v2177_v48 = vpop.permute.xlu2 %2176 }
 0x4d7   : > { %v2020_v56 = vadd.f32 %v2007_v38, %v1996_v42 }
 0x4d8   : > { %v2093_v7 = vadd.f32 %v2089_v62, %v2052_v1 }
 0x4d9   : > { %v2053_v50 = vadd.f32 %v2049_v57, %v2020_v56 }
 0x4da   : > { %v2117_v11 = vmul.f32 %v2093_v7, %v2093_v7 }
 0x4db   : > { %v3737_v6 = vadd.f32 %v2090_v63, %v2053_v50 }
 0x4dc   : > { %v1967_v52 = vpop.permute.xlu0 %1966 }
 0x4dd   : > { %v1997_v54 = vmul.f32 %v1988_v31, %v1967_v52  ;;  %v2061_v60 = vpop.permute.xlu1 %2060  ;;  %v2118_v9 = vmul.f32 %v3737_v6, %v3737_v6  ;;  %v2107_v16 = vadd.f32 %v3737_v6, %v2093_v7 }
 0x4de   : > { %v2091_v18 = vmul.f32 %v2082_v4, %v2061_v60  ;;  %v2182_v60 = vperm.slane %v2177_v48, %v3337_v37 }
 0x4df   : > { %v2021_v58 = vadd.f32 %v2012_v33, %v1997_v54  ;;  %v2121_v19 = vadd.f32 %v2118_v9, %v2117_v11  ;;  %v2168_v54 = vpop.permute.xlu2 %2167 }
 0x4e0   : > { %v2173_v63 = vperm.slane %v2168_v54, %v3337_v37 }
 0x4e1   : > { %v2054_v12 = vadd.f32 %v2050_v61, %v2021_v58 }
 0x4e3   : > { %v2095_v21 = vadd.f32 %v2091_v18, %v2054_v12 }
 0x4e4   : > { %v1969_v2 = vpop.permute.xlu0 %1968 }
 0x4e5   : > { %v1998_v3 = vmul.f32 %v1993_v44, %v1969_v2  ;;  %v2087_v23 = vpop.permute.xlu1 %2086  ;;  %v2119_v27 = vmul.f32 %v2095_v21, %v2095_v21  ;;  %v2108_v22 = vadd.f32 %v2107_v16, %v2095_v21 }
 0x4e7   : > { %v2022_v8 = vadd.f32 %v2017_v45, %v1998_v3  ;;  %v2122_v28 = vadd.f32 %v2121_v19, %v2119_v27  ;;  %v2198_v27 = vunpack.c.l.bf16 %v2182_v60 }
 0x4e9   : > { %v2055_v13 = vadd.f32 %v2051_v10, %v2022_v8  ;;  %v2211_v10 = vpop.permute.xlu2 %2210 }
 0x4ec   : > { %v2063_v17 = vpop.permute.xlu0 %2062 }
 0x4ed   : > { %v2092_v25 = vmul.f32 %v2087_v23, %v2063_v17  ;;  %v2159_v56 = vpop.permute.xlu1 %2158 }
 0x4ee   : > { %v2164_v3 = vperm.slane %v2159_v56, %v3337_v37 }
 0x4ef   : > { %v2096_v26 = vadd.f32 %v2092_v25, %v2055_v13 }
 0x4f0   : > { %v2196_v13 = vunpack.c.l.bf16 %v2164_v3 }
 0x4f1   : > { %v2109_v20 = vadd.f32 %v2108_v22, %v2096_v26  ;;  %v2120_v24 = vmul.f32 %v2096_v26, %v2096_v26 }
 0x4f3   : > { %v2110_v15 = vrot.slane %v2109_v20, 4  ;;  %v2123_v29 = vadd.f32 %v2122_v28, %v2120_v24 }
 0x4f4   : > { %v2186_v42 = vpop.permute.xlu0 %2185 }
 0x4f5   : > { %v2111_v41 = vadd.f32 %v2110_v15, %v2109_v20  ;;  %v2124_v39 = vrot.slane %v2123_v29, 4  ;;  %v2191_v4 = vperm.slane %v2186_v42, %v3337_v37  ;;  %v2238_v17 = vpop.permute.xlu1 %2237  ;;  %v2216_v20 = vperm.slane %v2211_v10, %v3337_v37 }
 0x4f6   : > { %v2243_v24 = vperm.slane %v2238_v17, %v3337_v37 }
 0x4f7   : > { %v2112_v38 = vrot.slane %v2111_v41, 2  ;;  %v2125_v40 = vadd.f32 %v2124_v39, %v2123_v29  ;;  %v2199_v25 = vunpack.c.l.bf16 %v2191_v4 }
 0x4f9   : > { %v2113_v31 = vadd.f32 %v2112_v38, %v2111_v41  ;;  %v2126_v32 = vrot.slane %v2125_v40, 2 }
 0x4fb   : > { %v2114_v35 = vrot.slane %v2113_v31, 1  ;;  %v2127_v43 = vadd.f32 %v2126_v32, %v2125_v40 }
 0x4fc   : > { %v2229_v57 = vpop.permute.xlu0 %2228 }
 0x4fd   : > { %v2115_v33 = vadd.f32 %v2114_v35, %v2113_v31  ;;  %v2128_v36 = vrot.slane %v2127_v43, 1  ;;  %v2234_v15 = vperm.slane %v2229_v57, %v3337_v37 }
 0x4ff   : > { %v2116_v44 = vmul.f32 0.03125, %v2115_v33  ;;  %v2129_v45 = vadd.f32 %v2128_v36, %v2127_v43  ;;  %v2248_v33 = vunpack.c.l.bf16 %v2216_v20  ;;  %v2251_v36 = vunpack.c.l.bf16 %v2243_v24 }
 0x501   : > { %v2130_v46 = vmul.f32 0.03125, %v2129_v45  ;;  %v2131_v30 = vmul.f32 %v2116_v44, %v2116_v44  ;;  %v2147_v61 = vsub.f32 %v2096_v26, %v2116_v44  ;;  %v2144_v53 = vsub.f32 %v2093_v7, %v2116_v44 }
 0x502   : > { %v2146_v62 = vsub.f32 %v2095_v21, %v2116_v44  ;;  %v2145_v2 = vsub.f32 %v3737_v6, %v2116_v44  ;;  %v2197_v6 = vunpack.c.l.bf16 %v2173_v63  ;;  %v2250_v44 = vunpack.c.l.bf16 %v2234_v15 }
 0x503   : > { %v2132_v47 = vsub.f32 %v2130_v46, %v2131_v30 }
 0x504   : > { %v2220_v7 = vpop.permute.xlu0 %2219 }
 0x505   : > { %v2133_v34 = vadd.f32 1e-05, %v2132_v47  ;;  %v2225_v29 = vperm.slane %v2220_v7, %v3337_v37 }
 0x507   : > { %3029 = vrsqrt.f32 %v2133_v34  ;;  %vm2140_vm14 = vweird.f32 %v2133_v34  ;;  %v2249_v45 = vunpack.c.l.bf16 %v2225_v29 }
 0x50d   : > { %v3030_v49 = vpop.eup %3029 }
 0x50e   : > { %v2135_v52 = vmul.f32 %v3030_v49, %v2133_v34  ;;  %vm2141_vm13 = vweird.f32 %v3030_v49 }
 0x50f   : > { %vm2142_vm15 = vmor %vm2140_vm14, %vm2141_vm13 }
 0x510   : > { %v2136_v55 = vmul.f32 %v3030_v49, %v2135_v52 }
 0x512   : > { %v2137_v58 = vmul.f32 0.5, %v2136_v55 }
 0x514   : > { %v2138_v59 = vsub.f32 1.5, %v2137_v58 }
 0x516   : > { %v2139_v50 = vmul.f32 %v3030_v49, %v2138_v59 }
 0x518   : > { %v2143_v12 = vsel %vm2142_vm15, %v3030_v49, %v2139_v50 }
 0x519   : > { %v2148_v1 = vmul.f32 %v2144_v53, %v2143_v12  ;;  %v2151_v18 = vmul.f32 %v2147_v61, %v2143_v12  ;;  %v2150_v8 = vmul.f32 %v2146_v62, %v2143_v12  ;;  %v2149_v9 = vmul.f32 %v2145_v2, %v2143_v12 }
 0x51b   : > { %v2152_v11 = vpack.c.bf16 %v2148_v1, %v2148_v1  ;;  %v2155_v23 = vpack.c.bf16 %v2151_v18, %v2151_v18  ;;  %v2154_v16 = vpack.c.bf16 %v2150_v8, %v2150_v8  ;;  %v2153_v21 = vpack.c.bf16 %v2149_v9, %v2149_v9 }
 0x51d   : > { %v2192_v19 = vunpack.c.l.bf16 %v2152_v11  ;;  %v2195_v22 = vunpack.c.l.bf16 %v2155_v23  ;;  %v2194_v26 = vunpack.c.l.bf16 %v2154_v16  ;;  %v2193_v28 = vunpack.c.l.bf16 %v2153_v21 }
 0x51f   : > { %v2200_v41 = vmul.f32 %v2196_v13, %v2192_v19  ;;  %v2203_v39 = vmul.f32 %v2199_v25, %v2195_v22  ;;  %v2202_v38 = vmul.f32 %v2198_v27, %v2194_v26  ;;  %v2201_v40 = vmul.f32 %v2197_v6, %v2193_v28 }
 0x521   : > { %v2204_v31 = vpack.c.bf16 %v2200_v41, %v2200_v41  ;;  %v2207_v32 = vpack.c.bf16 %v2203_v39, %v2203_v39  ;;  %v2206_v35 = vpack.c.bf16 %v2202_v38, %v2202_v38  ;;  %v2205_v43 = vpack.c.bf16 %v2201_v40, %v2201_v40 }
 0x523   : > { %v2244_v46 = vunpack.c.l.bf16 %v2204_v31  ;;  %v2247_v30 = vunpack.c.l.bf16 %v2207_v32  ;;  %v2246_v47 = vunpack.c.l.bf16 %v2206_v35  ;;  %v2245_v34 = vunpack.c.l.bf16 %v2205_v43 }
 0x525   : > { %v2252_v48 = vadd.f32 %v2248_v33, %v2244_v46  ;;  %v2255_v42 = vadd.f32 %v2251_v36, %v2247_v30  ;;  %v2254_v49 = vadd.f32 %v2250_v44, %v2246_v47  ;;  %v2253_v52 = vadd.f32 %v2249_v45, %v2245_v34 }
 0x527   : > { %v2256_v54 = vpack.c.bf16 %v2252_v48, %v2252_v48  ;;  %v2259_v55 = vpack.c.bf16 %v2255_v42, %v2255_v42  ;;  %v2258_v56 = vpack.c.bf16 %v2254_v49, %v2254_v49  ;;  %v2257_v57 = vpack.c.bf16 %v2253_v52, %v2253_v52 }
 0x529   : > { %v3752_v58 = vunpack.c.l.bf16 %v2256_v54  ;;  %v3754_v59 = vunpack.c.l.bf16 %v2259_v55  ;;  %v3756_v60 = vunpack.c.l.bf16 %v2258_v56  ;;  %v3758_v50 = vunpack.c.l.bf16 %v2257_v57 }
 0x52b   : > { %v2264_v61 = vmul.f32 %v3752_v58, %v3752_v58  ;;  %v2267_v53 = vmul.f32 %v3754_v59, %v3754_v59  ;;  %v2266_v62 = vmul.f32 %v3756_v60, %v3756_v60  ;;  %v2265_v2 = vmul.f32 %v3758_v50, %v3758_v50 }
 0x52d   : > { %v2268_v63 = vpack.c.bf16 %v2264_v61, %v2264_v61  ;;  %v2271_v12 = vpack.c.bf16 %v2267_v53, %v2267_v53  ;;  %v2270_v3 = vpack.c.bf16 %v2266_v62, %v2266_v62  ;;  %v2269_v4 = vpack.c.bf16 %v2265_v2, %v2265_v2 }
 0x52f   : > { %v2272_v1 = vunpack.c.l.bf16 %v2268_v63  ;;  %v2275_v18 = vunpack.c.l.bf16 %v2271_v12  ;;  %v2274_v8 = vunpack.c.l.bf16 %v2270_v3  ;;  %v2273_v9 = vunpack.c.l.bf16 %v2269_v4 }
 0x531   : > { %v2276_v10 = vmul.f32 %v2272_v1, %v3752_v58  ;;  %v2279_v11 = vmul.f32 %v2275_v18, %v3754_v59  ;;  %v2278_v23 = vmul.f32 %v2274_v8, %v3756_v60  ;;  %v2277_v17 = vmul.f32 %v2273_v9, %v3758_v50 }
 0x533   : > { %v2280_v16 = vpack.c.bf16 %v2276_v10, %v2276_v10  ;;  %v2283_v7 = vpack.c.bf16 %v2279_v11, %v2279_v11  ;;  %v2282_v21 = vpack.c.bf16 %v2278_v23, %v2278_v23  ;;  %v2281_v27 = vpack.c.bf16 %v2277_v17, %v2277_v17 }
 0x535   : > { %v2284_v6 = vunpack.c.l.bf16 %v2280_v16  ;;  %v2287_v13 = vunpack.c.l.bf16 %v2283_v7  ;;  %v2286_v25 = vunpack.c.l.bf16 %v2282_v21  ;;  %v2285_v19 = vunpack.c.l.bf16 %v2281_v27 }
 0x537   : > { %v2288_v22 = vmul.f32 0.044677734, %v2284_v6  ;;  %v2291_v26 = vmul.f32 0.044677734, %v2287_v13  ;;  %v2290_v28 = vmul.f32 0.044677734, %v2286_v25  ;;  %v2289_v20 = vmul.f32 0.044677734, %v2285_v19 }
 0x539   : > { %v2295_v24 = vpack.c.bf16 %v2291_v26, %v2291_v26  ;;  %v2294_v15 = vpack.c.bf16 %v2290_v28, %v2290_v28  ;;  %v2293_v29 = vpack.c.bf16 %v2289_v20, %v2289_v20  ;;  %v2292_v41 = vpack.c.bf16 %v2288_v22, %v2288_v22 }
 0x53b   : > { %v2299_v39 = vunpack.c.l.bf16 %v2295_v24  ;;  %v2298_v38 = vunpack.c.l.bf16 %v2294_v15  ;;  %v2297_v40 = vunpack.c.l.bf16 %v2293_v29  ;;  %v2296_v31 = vunpack.c.l.bf16 %v2292_v41 }
 0x53d   : > { %v2303_v32 = vadd.f32 %v2299_v39, %v3754_v59  ;;  %v2302_v35 = vadd.f32 %v2298_v38, %v3756_v60  ;;  %v2301_v43 = vadd.f32 %v2297_v40, %v3758_v50  ;;  %v2300_v33 = vadd.f32 %v2296_v31, %v3752_v58 }
 0x53f   : > { %v2305_v36 = vpack.c.bf16 %v2301_v43, %v2301_v43  ;;  %v2306_v44 = vpack.c.bf16 %v2302_v35, %v2302_v35  ;;  %v2307_v45 = vpack.c.bf16 %v2303_v32, %v2303_v32  ;;  %v2304_v46 = vpack.c.bf16 %v2300_v33, %v2300_v33 }
 0x541   : > { %v2310_v30 = vunpack.c.l.bf16 %v2306_v44  ;;  %v2311_v47 = vunpack.c.l.bf16 %v2307_v45  ;;  %v2308_v34 = vunpack.c.l.bf16 %v2304_v46  ;;  %v2309_v48 = vunpack.c.l.bf16 %v2305_v36 }
 0x543   : > { %v2314_v42 = vmul.f32 0.796875, %v2310_v30  ;;  %v2315_v49 = vmul.f32 0.796875, %v2311_v47  ;;  %v2312_v52 = vmul.f32 0.796875, %v2308_v34  ;;  %v2313_v54 = vmul.f32 0.796875, %v2309_v48  ;;  %v2936_v48 = vld [vmem:[%s3841_s5 + $0x20] sm:$0xff] }
 0x545   : > { %v2318_v55 = vpack.c.bf16 %v2314_v42, %v2314_v42  ;;  %v2319_v56 = vpack.c.bf16 %v2315_v49, %v2315_v49  ;;  %v2316_v57 = vpack.c.bf16 %v2312_v52, %v2312_v52  ;;  %v2317_v61 = vpack.c.bf16 %v2313_v54, %v2313_v54  ;;  %v2384_v49 = vpop.permute.xlu2 %2383  ;;  %v2389_v54 = vpop.permute.xlu0 %2388 }
 0x547   : > { %v2322_v53 = vunpack.c.l.bf16 %v2318_v55  ;;  %v2323_v62 = vunpack.c.l.bf16 %v2319_v56  ;;  %v2320_v2 = vunpack.c.l.bf16 %v2316_v57  ;;  %v2321_v63 = vunpack.c.l.bf16 %v2317_v61 }
 0x549   : > { %3031 = vtanh.f32 %v2322_v53 }
 0x54a   : > { %3033 = vtanh.f32 %v2323_v62 }
 0x54b   : > { %3035 = vtanh.f32 %v2320_v2 }
 0x54c   : > { %3037 = vtanh.f32 %v2321_v63 }
 0x54f   : > { %v3032_v12 = vpop.eup %3031 }
 0x550   : > { %v3034_v3 = vpop.eup %3033  ;;  %v2330_v4 = vpack.c.bf16 %v3032_v12, %v3032_v12 }
 0x551   : > { %v3036_v1 = vpop.eup %3035  ;;  %v2331_v18 = vpack.c.bf16 %v3034_v3, %v3034_v3 }
 0x552   : > { %v3038_v8 = vpop.eup %3037  ;;  %v2334_v9 = vunpack.c.l.bf16 %v2330_v4  ;;  %v2328_v10 = vpack.c.bf16 %v3036_v1, %v3036_v1 }
 0x553   : > { %v2335_v11 = vunpack.c.l.bf16 %v2331_v18  ;;  %v2329_v23 = vpack.c.bf16 %v3038_v8, %v3038_v8 }
 0x554   : > { %v2338_v17 = vadd.f32 1.0, %v2334_v9  ;;  %v2332_v16 = vunpack.c.l.bf16 %v2328_v10 }
 0x555   : > { %v2339_v7 = vadd.f32 1.0, %v2335_v11  ;;  %v2333_v21 = vunpack.c.l.bf16 %v2329_v23 }
 0x556   : > { %v2342_v27 = vpack.c.bf16 %v2338_v17, %v2338_v17  ;;  %v2336_v6 = vadd.f32 1.0, %v2332_v16 }
 0x557   : > { %v2343_v13 = vpack.c.bf16 %v2339_v7, %v2339_v7  ;;  %v2337_v25 = vadd.f32 1.0, %v2333_v21 }
 0x558   : > { %v2346_v19 = vunpack.c.l.bf16 %v2342_v27  ;;  %v2340_v22 = vpack.c.bf16 %v2336_v6, %v2336_v6 }
 0x559   : > { %v2347_v26 = vunpack.c.l.bf16 %v2343_v13  ;;  %v2341_v28 = vpack.c.bf16 %v2337_v25, %v2337_v25 }
 0x55a   : > { %v2350_v20 = vmul.f32 0.5, %v2346_v19  ;;  %v2344_v24 = vunpack.c.l.bf16 %v2340_v22 }
 0x55b   : > { %v2351_v15 = vmul.f32 0.5, %v2347_v26  ;;  %v2345_v29 = vunpack.c.l.bf16 %v2341_v28 }
 0x55c   : > { %v2354_v41 = vpack.c.bf16 %v2350_v20, %v2350_v20  ;;  %v2348_v39 = vmul.f32 0.5, %v2344_v24 }
 0x55d   : > { %v2355_v38 = vpack.c.bf16 %v2351_v15, %v2351_v15  ;;  %v2349_v40 = vmul.f32 0.5, %v2345_v29  ;;  %v2493_v15 = vpop.permute.xlu2 %2492  ;;  %v2502_v29 = vpop.permute.xlu0 %2501 }
 0x55e   : > { %v2358_v31 = vunpack.c.l.bf16 %v2354_v41  ;;  %v2352_v32 = vpack.c.bf16 %v2348_v39, %v2348_v39 }
 0x55f   : > { %v2359_v35 = vunpack.c.l.bf16 %v2355_v38  ;;  %v2353_v43 = vpack.c.bf16 %v2349_v40, %v2349_v40 }
 0x560   : > { %v2362_v33 = vmul.f32 %v2358_v31, %v3756_v60  ;;  %v2356_v36 = vunpack.c.l.bf16 %v2352_v32  ;;  %v2937_v60 = vld [vmem:[%s3841_s5 + $0x28] sm:$0xff] }
 0x561   : > { %v2363_v44 = vmul.f32 %v2359_v35, %v3754_v59  ;;  %v2357_v45 = vunpack.c.l.bf16 %v2353_v43 }
 0x562   : > { %v2360_v30 = vmul.f32 %v2356_v36, %v3752_v58  ;;  %v2379_v58 = vpop.permute.xlu1 %2378 }
 0x563   : > { %v2365_v46 = vpack.c.bf16 %v2363_v44, %v2362_v33  ;;  %v2361_v47 = vmul.f32 %v2357_v45, %v3758_v50  ;;  %v2498_v33 = vperm.slane %v2493_v15, %v3337_v37 }
 0x565   : > { %2418 = vmatpush.bf16.msra.mxu2 %v2365_v46  ;;  %v2364_v34 = vpack.c.bf16 %v2361_v47, %v2360_v30  ;;  %v2520_v38 = vpop.permute.xlu2 %2519  ;;  %v2545_v32 = vpop.permute.xlu0 %2544 }
 0x566   : > { %v2525_v47 = vperm.slane %v2520_v38, %v3337_v37 }
 0x569   : > { %2419 = vmatpush.bf16.msra.mxu2 %v2364_v34 }
 0x56a   : > { %v2394_v2 = vpop.permute.xlu1 %2393 }
 0x56c   : > { %2917 = vmatmul.msk.bf16.vlgmr.msra.gmra.mxu2 %vm893_vm3, %v2936_v48  ;;  %v2507_v48 = vperm.slane %v2502_v29, %v3337_v37 }
 0x572   : > { %v2511_v31 = vpop.permute.xlu1 %2510 }
 0x573   : > { %v2516_v34 = vperm.slane %v2511_v31, %v3337_v37 }
 0x57c   : > { %2918 = vmatmul.msk.bf16.gmra.mxu2 %vm893_vm3, %v2937_v60 }
 0x5ef   : > { %v2421_v59 = vpop.f32.mrf.mxu2 }
 0x5f0   : > { %v2422_v55 = vadd.f32 %v2421_v59, %v2379_v58 }
 0x5f2   : > { %v2451_v61 = vmul.f32 %v2422_v55, %v2422_v55 }
 0x5f7   : > { %v2423_v42 = vpop.f32.mrf.mxu2 }
 0x5f8   : > { %v2424_v52 = vadd.f32 %v2423_v42, %v2384_v49 }
 0x5fa   : > { %v2452_v57 = vmul.f32 %v2424_v52, %v2424_v52  ;;  %v2441_v53 = vadd.f32 %v2424_v52, %v2422_v55 }
 0x5fc   : > { %v2455_v12 = vadd.f32 %v2452_v57, %v2451_v61  ;;  %v2572_v57 = vpop.permute.xlu0 %2571 }
 0x5ff   : > { %v2426_v50 = vpop.f32.mrf.mxu2 }
 0x600   : > { %v2427_v56 = vadd.f32 %v2426_v50, %v2389_v54  ;;  %v2563_v50 = vpop.permute.xlu2 %2562  ;;  %v2554_v54 = vpop.permute.xlu1 %2553 }
 0x602   : > { %v2453_v62 = vmul.f32 %v2427_v56, %v2427_v56  ;;  %v2442_v3 = vadd.f32 %v2441_v53, %v2427_v56 }
 0x604   : > { %v2456_v1 = vadd.f32 %v2455_v12, %v2453_v62  ;;  %v2533_v62 = vunpack.c.l.bf16 %v2525_v47 }
 0x607   : > { %v2428_v63 = vpop.f32.mrf.mxu2 }
 0x608   : > { %v2429_v4 = vadd.f32 %v2428_v63, %v2394_v2  ;;  %v2532_v2 = vunpack.c.l.bf16 %v2516_v34  ;;  %v2531_v63 = vunpack.c.l.bf16 %v2507_v48 }
 0x60a   : > { %v2443_v18 = vadd.f32 %v2442_v3, %v2429_v4  ;;  %v2454_v8 = vmul.f32 %v2429_v4, %v2429_v4 }
 0x60c   : > { %v2444_v9 = vrot.slane %v2443_v18, 4  ;;  %v2457_v10 = vadd.f32 %v2456_v1, %v2454_v8  ;;  %v2559_v8 = vperm.slane %v2554_v54, %v3337_v37 }
 0x60e   : > { %v2445_v11 = vadd.f32 %v2444_v9, %v2443_v18  ;;  %v2458_v23 = vrot.slane %v2457_v10, 4  ;;  %v2568_v18 = vperm.slane %v2563_v50, %v3337_v37  ;;  %v2550_v9 = vperm.slane %v2545_v32, %v3337_v37 }
 0x610   : > { %v2446_v17 = vrot.slane %v2445_v11, 2  ;;  %v2459_v16 = vadd.f32 %v2458_v23, %v2457_v10  ;;  %v2577_v10 = vperm.slane %v2572_v57, %v3337_v37 }
 0x612   : > { %v2447_v7 = vadd.f32 %v2446_v17, %v2445_v11  ;;  %v2460_v21 = vrot.slane %v2459_v16, 2 }
 0x614   : > { %v2448_v27 = vrot.slane %v2447_v7, 1  ;;  %v2461_v6 = vadd.f32 %v2460_v21, %v2459_v16 }
 0x616   : > { %v2449_v13 = vadd.f32 %v2448_v27, %v2447_v7  ;;  %v2462_v25 = vrot.slane %v2461_v6, 1 }
 0x618   : > { %v2450_v19 = vmul.f32 0.03125, %v2449_v13  ;;  %v2463_v22 = vadd.f32 %v2462_v25, %v2461_v6  ;;  %v2584_v13 = vunpack.c.l.bf16 %v2568_v18  ;;  %v2583_v25 = vunpack.c.l.bf16 %v2559_v8 }
 0x61a   : > { %v2464_v26 = vmul.f32 0.03125, %v2463_v22  ;;  %v2465_v28 = vmul.f32 %v2450_v19, %v2450_v19  ;;  %v2478_v44 = vsub.f32 %v2422_v55, %v2450_v19  ;;  %v2479_v45 = vsub.f32 %v2424_v52, %v2450_v19 }
 0x61b   : > { %v2480_v46 = vsub.f32 %v2427_v56, %v2450_v19  ;;  %v2481_v30 = vsub.f32 %v2429_v4, %v2450_v19  ;;  %v2530_v56 = vunpack.c.l.bf16 %v2498_v33  ;;  %v2582_v19 = vunpack.c.l.bf16 %v2550_v9 }
 0x61c   : > { %v2466_v20 = vsub.f32 %v2464_v26, %v2465_v28  ;;  %v2585_v22 = vunpack.c.l.bf16 %v2577_v10 }
 0x61e   : > { %v2467_v24 = vadd.f32 1e-05, %v2466_v20 }
 0x620   : > { %3039 = vrsqrt.f32 %v2467_v24  ;;  %vm2474_vm1 = vweird.f32 %v2467_v24 }
 0x626   : > { %v3040_v41 = vpop.eup %3039 }
 0x627   : > { %v2469_v39 = vmul.f32 %v3040_v41, %v2467_v24  ;;  %vm2475_vm0 = vweird.f32 %v3040_v41 }
 0x628   : > { %vm2476_vm2 = vmor %vm2474_vm1, %vm2475_vm0 }
 0x629   : > { %v2470_v40 = vmul.f32 %v3040_v41, %v2469_v39 }
 0x62b   : > { %v2471_v35 = vmul.f32 0.5, %v2470_v40 }
 0x62d   : > { %v2472_v43 = vsub.f32 1.5, %v2471_v35 }
 0x62f   : > { %v2473_v36 = vmul.f32 %v3040_v41, %v2472_v43 }
 0x631   : > { %v2477_v60 = vsel %vm2476_vm2, %v3040_v41, %v2473_v36 }
 0x632   : > { %v2482_v59 = vmul.f32 %v2478_v44, %v2477_v60  ;;  %v2483_v42 = vmul.f32 %v2479_v45, %v2477_v60  ;;  %v2484_v58 = vmul.f32 %v2480_v46, %v2477_v60  ;;  %v2485_v49 = vmul.f32 %v2481_v30, %v2477_v60 }
 0x634   : > { %v2486_v61 = vpack.c.bf16 %v2482_v59, %v2482_v59  ;;  %v2487_v53 = vpack.c.bf16 %v2483_v42, %v2483_v42  ;;  %v2488_v55 = vpack.c.bf16 %v2484_v58, %v2484_v58  ;;  %v2489_v52 = vpack.c.bf16 %v2485_v49, %v2485_v49 }
 0x636   : > { %v2526_v12 = vunpack.c.l.bf16 %v2486_v61  ;;  %v2527_v3 = vunpack.c.l.bf16 %v2487_v53  ;;  %v2528_v4 = vunpack.c.l.bf16 %v2488_v55  ;;  %v2529_v1 = vunpack.c.l.bf16 %v2489_v52 }
 0x638   : > { %v2534_v11 = vmul.f32 %v2530_v56, %v2526_v12  ;;  %v2535_v23 = vmul.f32 %v2531_v63, %v2527_v3  ;;  %v2536_v17 = vmul.f32 %v2532_v2, %v2528_v4  ;;  %v2537_v16 = vmul.f32 %v2533_v62, %v2529_v1 }
 0x63a   : > { %v2538_v7 = vpack.c.bf16 %v2534_v11, %v2534_v11  ;;  %v2539_v21 = vpack.c.bf16 %v2535_v23, %v2535_v23  ;;  %v2540_v27 = vpack.c.bf16 %v2536_v17, %v2536_v17  ;;  %v2541_v6 = vpack.c.bf16 %v2537_v16, %v2537_v16 }
 0x63c   : > { %v2578_v26 = vunpack.c.l.bf16 %v2538_v7  ;;  %v2579_v28 = vunpack.c.l.bf16 %v2539_v21  ;;  %v2580_v20 = vunpack.c.l.bf16 %v2540_v27  ;;  %v2581_v24 = vunpack.c.l.bf16 %v2541_v6 }
 0x63e   : > { %v2586_v15 = vadd.f32 %v2582_v19, %v2578_v26  ;;  %v2587_v29 = vadd.f32 %v2583_v25, %v2579_v28  ;;  %v2588_v41 = vadd.f32 %v2584_v13, %v2580_v20  ;;  %v2589_v37 = vadd.f32 %v2585_v22, %v2581_v24 }
 0x640   : > { %v2590_v39 = vpack.c.bf16 %v2586_v15, %v2586_v15  ;;  %v2591_v38 = vpack.c.bf16 %v2587_v29, %v2587_v29  ;;  %v2592_v40 = vpack.c.bf16 %v2588_v41, %v2588_v41  ;;  %v2593_v31 = vpack.c.bf16 %v2589_v37, %v2589_v37 }
 0x642   : > { %v3796_v32 = vunpack.c.l.bf16 %v2590_v39  ;;  %v3798_v35 = vunpack.c.l.bf16 %v2591_v38  ;;  %v3800_v43 = vunpack.c.l.bf16 %v2592_v40  ;;  %v3802_v33 = vunpack.c.l.bf16 %v2593_v31 }
 0x644   : > { %v2598_v36 = vmul.f32 %v3796_v32, %v3796_v32  ;;  %v2599_v44 = vmul.f32 %v3798_v35, %v3798_v35  ;;  %v2600_v45 = vmul.f32 %v3800_v43, %v3800_v43  ;;  %v2601_v46 = vmul.f32 %v3802_v33, %v3802_v33 }
 0x646   : > { %v2602_v30 = vpack.c.bf16 %v2598_v36, %v2598_v36  ;;  %v2603_v47 = vpack.c.bf16 %v2599_v44, %v2599_v44  ;;  %v2604_v34 = vpack.c.bf16 %v2600_v45, %v2600_v45  ;;  %v2605_v48 = vpack.c.bf16 %v2601_v46, %v2601_v46 }
 0x648   : > { %v2606_v60 = vunpack.c.l.bf16 %v2602_v30  ;;  %v2607_v59 = vunpack.c.l.bf16 %v2603_v47  ;;  %v2608_v42 = vunpack.c.l.bf16 %v2604_v34  ;;  %v2609_v58 = vunpack.c.l.bf16 %v2605_v48 }
 0x64a   : > { %v2610_v49 = vmul.f32 %v2606_v60, %v3796_v32  ;;  %v2611_v50 = vmul.f32 %v2607_v59, %v3798_v35  ;;  %v2612_v54 = vmul.f32 %v2608_v42, %v3800_v43  ;;  %v2613_v57 = vmul.f32 %v2609_v58, %v3802_v33 }
 0x64c   : > { %v2614_v61 = vpack.c.bf16 %v2610_v49, %v2610_v49  ;;  %v2615_v53 = vpack.c.bf16 %v2611_v50, %v2611_v50  ;;  %v2616_v55 = vpack.c.bf16 %v2612_v54, %v2612_v54  ;;  %v2617_v52 = vpack.c.bf16 %v2613_v57, %v2613_v57 }
 0x64e   : > { %v2618_v56 = vunpack.c.l.bf16 %v2614_v61  ;;  %v2619_v62 = vunpack.c.l.bf16 %v2615_v53  ;;  %v2620_v2 = vunpack.c.l.bf16 %v2616_v55  ;;  %v2621_v63 = vunpack.c.l.bf16 %v2617_v52 }
 0x650   : > { %v2622_v12 = vmul.f32 0.044677734, %v2618_v56  ;;  %v2623_v3 = vmul.f32 0.044677734, %v2619_v62  ;;  %v2624_v4 = vmul.f32 0.044677734, %v2620_v2  ;;  %v2625_v1 = vmul.f32 0.044677734, %v2621_v63 }
 0x652   : > { %v2626_v18 = vpack.c.bf16 %v2622_v12, %v2622_v12  ;;  %v2627_v8 = vpack.c.bf16 %v2623_v3, %v2623_v3  ;;  %v2628_v9 = vpack.c.bf16 %v2624_v4, %v2624_v4  ;;  %v2629_v10 = vpack.c.bf16 %v2625_v1, %v2625_v1 }
 0x654   : > { %v2630_v11 = vunpack.c.l.bf16 %v2626_v18  ;;  %v2631_v23 = vunpack.c.l.bf16 %v2627_v8  ;;  %v2632_v17 = vunpack.c.l.bf16 %v2628_v9  ;;  %v2633_v16 = vunpack.c.l.bf16 %v2629_v10 }
 0x656   : > { %v2634_v7 = vadd.f32 %v2630_v11, %v3796_v32  ;;  %v2635_v21 = vadd.f32 %v2631_v23, %v3798_v35  ;;  %v2636_v27 = vadd.f32 %v2632_v17, %v3800_v43  ;;  %v2637_v6 = vadd.f32 %v2633_v16, %v3802_v33 }
 0x658   : > { %v2638_v13 = vpack.c.bf16 %v2634_v7, %v2634_v7  ;;  %v2639_v25 = vpack.c.bf16 %v2635_v21, %v2635_v21  ;;  %v2640_v19 = vpack.c.bf16 %v2636_v27, %v2636_v27  ;;  %v2641_v22 = vpack.c.bf16 %v2637_v6, %v2637_v6 }
 0x65a   : > { %v2642_v26 = vunpack.c.l.bf16 %v2638_v13  ;;  %v2643_v28 = vunpack.c.l.bf16 %v2639_v25  ;;  %v2644_v20 = vunpack.c.l.bf16 %v2640_v19  ;;  %v2645_v24 = vunpack.c.l.bf16 %v2641_v22 }
 0x65c   : > { %v2646_v15 = vmul.f32 0.796875, %v2642_v26  ;;  %v2647_v29 = vmul.f32 0.796875, %v2643_v28  ;;  %v2648_v41 = vmul.f32 0.796875, %v2644_v20  ;;  %v2649_v37 = vmul.f32 0.796875, %v2645_v24 }
 0x65e   : > { %v2650_v39 = vpack.c.bf16 %v2646_v15, %v2646_v15  ;;  %v2651_v38 = vpack.c.bf16 %v2647_v29, %v2647_v29  ;;  %v2652_v40 = vpack.c.bf16 %v2648_v41, %v2648_v41  ;;  %v2653_v31 = vpack.c.bf16 %v2649_v37, %v2649_v37 }
 0x660   : > { %v2654_v36 = vunpack.c.l.bf16 %v2650_v39  ;;  %v2655_v44 = vunpack.c.l.bf16 %v2651_v38  ;;  %v2656_v45 = vunpack.c.l.bf16 %v2652_v40  ;;  %v2657_v46 = vunpack.c.l.bf16 %v2653_v31 }
 0x662   : > { %3041 = vtanh.f32 %v2654_v36 }
 0x663   : > { %3043 = vtanh.f32 %v2655_v44 }
 0x664   : > { %3045 = vtanh.f32 %v2656_v45 }
 0x665   : > { %3047 = vtanh.f32 %v2657_v46 }
 0x668   : > { %v3042_v30 = vpop.eup %3041 }
 0x669   : > { %v3044_v47 = vpop.eup %3043  ;;  %v2662_v34 = vpack.c.bf16 %v3042_v30, %v3042_v30 }
 0x66a   : > { %v3046_v48 = vpop.eup %3045  ;;  %v2663_v60 = vpack.c.bf16 %v3044_v47, %v3044_v47 }
 0x66b   : > { %v3048_v59 = vpop.eup %3047  ;;  %v2664_v42 = vpack.c.bf16 %v3046_v48, %v3046_v48  ;;  %v2666_v58 = vunpack.c.l.bf16 %v2662_v34 }
 0x66c   : > { %v2665_v49 = vpack.c.bf16 %v3048_v59, %v3048_v59  ;;  %v2667_v50 = vunpack.c.l.bf16 %v2663_v60 }
 0x66d   : > { %v2668_v54 = vunpack.c.l.bf16 %v2664_v42  ;;  %v2670_v57 = vadd.f32 1.0, %v2666_v58 }
 0x66e   : > { %v2669_v61 = vunpack.c.l.bf16 %v2665_v49  ;;  %v2671_v53 = vadd.f32 1.0, %v2667_v50 }
 0x66f   : > { %v2672_v55 = vadd.f32 1.0, %v2668_v54  ;;  %v2674_v52 = vpack.c.bf16 %v2670_v57, %v2670_v57 }
 0x670   : > { %v2673_v56 = vadd.f32 1.0, %v2669_v61  ;;  %v2675_v62 = vpack.c.bf16 %v2671_v53, %v2671_v53 }
 0x671   : > { %v2676_v2 = vpack.c.bf16 %v2672_v55, %v2672_v55  ;;  %v2678_v63 = vunpack.c.l.bf16 %v2674_v52 }
 0x672   : > { %v2677_v12 = vpack.c.bf16 %v2673_v56, %v2673_v56  ;;  %v2679_v3 = vunpack.c.l.bf16 %v2675_v62 }
 0x673   : > { %v2680_v4 = vunpack.c.l.bf16 %v2676_v2  ;;  %v2682_v1 = vmul.f32 0.5, %v2678_v63 }
 0x674   : > { %v2681_v18 = vunpack.c.l.bf16 %v2677_v12  ;;  %v2683_v8 = vmul.f32 0.5, %v2679_v3 }
 0x675   : > { %v2684_v9 = vmul.f32 0.5, %v2680_v4  ;;  %v2686_v10 = vpack.c.bf16 %v2682_v1, %v2682_v1 }
 0x676   : > { %v2685_v11 = vmul.f32 0.5, %v2681_v18  ;;  %v2687_v23 = vpack.c.bf16 %v2683_v8, %v2683_v8 }
 0x677   : > { %v2688_v17 = vpack.c.bf16 %v2684_v9, %v2684_v9  ;;  %v2690_v16 = vunpack.c.l.bf16 %v2686_v10 }
 0x678   : > { %v2689_v7 = vpack.c.bf16 %v2685_v11, %v2685_v11  ;;  %v2691_v21 = vunpack.c.l.bf16 %v2687_v23 }
 0x679   : > { %v2692_v27 = vunpack.c.l.bf16 %v2688_v17  ;;  %v2694_v6 = vmul.f32 %v2690_v16, %v3796_v32 }
 0x67a   : > { %v2693_v13 = vunpack.c.l.bf16 %v2689_v7  ;;  %v2695_v25 = vmul.f32 %v2691_v21, %v3798_v35  ;;  %v3051_v35 = vld [vmem:[%s3147_s26] ss:$0 sm:$0xff] }
 0x67b   : > { %v2696_v19 = vmul.f32 %v2692_v27, %v3800_v43  ;;  %v2698_v22 = vpack.c.bf16 %v2694_v6, %v2694_v6 }
 0x67c   : > { %v2697_v26 = vmul.f32 %v2693_v13, %v3802_v33  ;;  %v2699_v28 = vpack.c.bf16 %v2695_v25, %v2695_v25 }
 0x67d   : > { %v2700_v20 = vpack.c.bf16 %v2696_v19, %v2696_v19  ;;  %v2702_v24 = vunpack.c.l.bf16 %v2698_v22 }
 0x67e   : > { %v2701_v15 = vpack.c.bf16 %v2697_v26, %v2697_v26  ;;  %v2703_v29 = vunpack.c.l.bf16 %v2699_v28 }
 0x67f   : > { %v2704_v41 = vunpack.c.l.bf16 %v2700_v20  ;;  %v2706_v37 = vadd.f32 %v2702_v24, %v3652_v0 }
 0x680   : > { %v2705_v39 = vunpack.c.l.bf16 %v2701_v15  ;;  %v2707_v32 = vadd.f32 %v2703_v29, %v3649_v51 }
 0x681   : > { %v2708_v38 = vadd.f32 %v2704_v41, %v3658_v14  ;;  %v2710_v40 = vmul.f32 %v3051_v35, %v2706_v37 }
 0x682   : > { %v2709_v43 = vadd.f32 %v2705_v39, %v3664_v5  ;;  %v2711_v31 = vmul.f32 %v3051_v35, %v2707_v32 }
 0x683   : > { %v2712_v33 = vmul.f32 %v3051_v35, %v2708_v38 }
 0x684   : > { %v2713_v36 = vmul.f32 %v3051_v35, %v2709_v43  ;;  %v2957_v44 = vpack.c.bf16 %v2711_v31, %v2710_v40 }
 0x686   : > { %2958 = vst [vmem:[%s420_s22] sm:$0xff] %v2957_v44   ;;  %v2962_v45 = vpack.c.bf16 %v2713_v36, %v2712_v33 }
 0x688   : > { %2966 = vst [vmem:[%s420_s22 + $0x8] sm:$0xff] %v2962_v45  }
 0x689 PF: > { %s21_s17 = sadd.s32 1, %s3058_s17  }
 0x68a   : > { %p18_p4 = scmp.ge.s32.totalorder %s21_s17, 4  }
 0x68c   :  { %20 = sbr.rel (!%p18_p4) target bundleno = 1 (0x1), region = 122 }

</bundles_post_ra>
